<compile_context>
chip_gen: v6e
topology: v6e:2x2x1
jax: 0.10.0
libtpu: 0.0.40
codegen_flags: <defaults>
</compile_context>

<pallas_src>
import functools

import jax
import jax.numpy as jnp
from jax.experimental import pallas as pl
from jax.experimental.pallas import tpu as pltpu

# ---------------- model hyper-parameters (small, synthetic) ----------------
CATEGORIES = (3, 5)          # cardinality of each categorical column
NUM_SPECIAL_TOKENS = 2       # as in lucidrains FTTransformer
NUM_CONTINUOUS = 4
DIM = 32                     # token embedding dim
DEPTH = 2                    # number of transformer layers
HEADS = 4
DIM_HEAD = 8
INNER = HEADS * DIM_HEAD     # 32
FF_MULT = 4
HIDDEN = DIM * FF_MULT       # 128
DIM_OUT = 2
SCALE = DIM_HEAD ** -0.5
LN_EPS = 1e-5
SEQ = 1 + len(CATEGORIES) + NUM_CONTINUOUS   # CLS + tokens = 7
SEQ_PAD = 8                                  # padded to one full sublane tile
QKV_WIDTH = 2 * INNER + HEADS * DIM          # Q(32) + K(32) + V'(4*32) = 192


def _layer_norm(x, g, b):
    mu = jnp.mean(x, axis=-1, keepdims=True)
    var = jnp.mean((x - mu) ** 2, axis=-1, keepdims=True)
    return (x - mu) * jax.lax.rsqrt(var + LN_EPS) * g + b


def _gelu_exact(x):
    # matches torch.nn.GELU() default (erf-based, not tanh approximation)
    return 0.5 * x * (1.0 + jax.lax.erf(x * (1.0 / jnp.sqrt(2.0)).astype(x.dtype)))


# ------------- fused all-layers transformer + head kernel -------------------
def fused_transformer_kernel(x_ref, wqkvp_ref, w1_ref, w2m_ref, vec_ref,
                             head_vec_ref, head_w_ref, o_ref, *, depth, seq_len):
    TB, S_pad, D = x_ref.shape
    R = TB * S_pad

    # Canonical 2D working view: rows = TB*S_pad tokens, lanes = D features.
    # S_pad == 8, so this reshape (and its inverses) are layout no-ops.
    x = x_ref[...].reshape(R, D)

    # Key-padding mask, built once as (1, S, S) and broadcast inside jnp.where
    # (no per-batch materialization of identical 8x8 masks).
    key_ok = jax.lax.broadcasted_iota(jnp.int32, (1, S_pad, S_pad), 2) < seq_len
    neg_inf = jnp.float32(-1e30)

    for layer in range(depth):                       # static unroll over layers
        vec = vec_ref[layer]                         # (8, HIDDEN) packed vectors
        g1, be1 = vec[0:1, :D], vec[1:2, :D]
        b1 = vec[2:3, :]
        g2, be2, b2m = vec[3:4, :D], vec[4:5, :D], vec[5:6, :D]

        # ---- attention (pre-norm) ----
        # Wo is folded into the per-head V projections and SCALE into Wq at
        # pack time:  v'_h = v_h @ Wo_h ,  q' = q * scale  (both exact).  Head
        # outputs are therefore SUMMED — no lane concatenate, no output-proj
        # matmul — and the fused projection is one wide (R,32)x(32,192) matmul.
        h = _layer_norm(x, g1, be1)                                   # (R, D) f32
        qkv = jnp.dot(h.astype(jnp.bfloat16), wqkvp_ref[layer],
                      preferred_element_type=jnp.float32)             # (R, 192)
        qkv3 = qkv.reshape(TB, S_pad, QKV_WIDTH)

        attn_out = jnp.zeros((TB, S_pad, D), jnp.float32)
        for hd in range(HEADS):   # only the tiny SxS score matmuls stay per-head
            q = qkv3[:, :, hd * DIM_HEAD:(hd + 1) * DIM_HEAD]          # pre-scaled
            k = qkv3[:, :, INNER + hd * DIM_HEAD:INNER + (hd + 1) * DIM_HEAD]
            vp = qkv3[:, :, 2 * INNER + hd * D:2 * INNER + (hd + 1) * D]
            sim = jnp.einsum('bqd,bkd->bqk', q, k,
                             preferred_element_type=jnp.float32)       # (TB, S, S)
            sim = jnp.where(key_ok, sim, neg_inf)
            sim = sim - jnp.max(sim, axis=-1, keepdims=True)
            e = jnp.exp(sim)
            p = e * pl.reciprocal(jnp.sum(e, axis=-1, keepdims=True), approx=True)
            attn_out = attn_out + jnp.einsum('bqk,bkd->bqd', p, vp,
                                             preferred_element_type=jnp.float32)
        x = x + attn_out.reshape(R, D)

        # ---- feed-forward (pre-norm); pruning mask pre-folded into w2/b2 ----
        # TODO(synk): switch to tanh-GELU (EUP) only if bundle dumps show the
        # VALU slot saturated; exact erf kept to match torch.nn.GELU().
        hf = _layer_norm(x, g2, be2)
        hf = jnp.dot(hf.astype(jnp.bfloat16), w1_ref[layer],
                     preferred_element_type=jnp.float32) + b1          # (R, HIDDEN)
        hf = _gelu_exact(hf)
        hf = jnp.dot(hf.astype(jnp.bfloat16), w2m_ref[layer],
                     preferred_element_type=jnp.float32) + b2m         # (R, D)
        x = x + hf

    # ---- classification head on the CLS token; only (TB, DIM_OUT) written ----
    hv = head_vec_ref[...]
    hg, hb = hv[0:1, :D], hv[1:2, :D]
    hbias = hv[2:3, :DIM_OUT]
    # Select the CLS row (s == 0) with a masked sublane reduction (layout-safe).
    cls_sel = jax.lax.broadcasted_iota(jnp.int32, (1, S_pad, 1), 1) == 0
    cls = jnp.sum(jnp.where(cls_sel, x.reshape(TB, S_pad, D), 0.0), axis=1)  # (TB, D)
    ch = _layer_norm(cls, hg, hb)
    ch = jnp.maximum(ch, 0.0)
    o_ref[...] = jnp.dot(ch, head_w_ref[...],
                         preferred_element_type=jnp.float32) + hbias


def fused_transformer_head(x, stacks, *, batch_tile=None):
    """All DEPTH transformer layers + classification head in one Pallas call,
    gridded over batch; returns (B, DIM_OUT) logits."""
    wqkvp, w1, w2m, vec, head_vec, head_w = stacks
    B, S, D = x.shape

    # Pad the token axis to a full sublane tile so in-kernel reshapes are free;
    # padded keys are masked inside the kernel.
    if S < SEQ_PAD:
        x = jnp.pad(x, ((0, 0), (0, SEQ_PAD - S), (0, 0)))

    if batch_tile is None:
        # >=2 grid steps when B allows (v7x: two TensorCores), tile a multiple
        # of 8 rows, capped at 256 (~5 MiB live f32 intermediates per step —
        # fits v5e's 16 MiB scoped default and v7x's 32 MiB), and sized near
        # ceil(B / n_steps) so batch padding waste is minimal.
        n_steps = max(2, pl.cdiv(B, 256))
        batch_tile = min(256, max(8, ((pl.cdiv(B, n_steps) + 7) // 8) * 8))
    pad_b = (-B) % batch_tile
    if pad_b:
        x = jnp.pad(x, ((0, pad_b), (0, 0), (0, 0)))
    Bp = B + pad_b
    grid = (Bp // batch_tile,)

    def full_spec(a):
        return pl.BlockSpec(a.shape, lambda b, _n=a.ndim: (0,) * _n)

    kernel = functools.partial(fused_transformer_kernel, depth=DEPTH, seq_len=S)

    out = pl.pallas_call(
        kernel,
        out_shape=jax.ShapeDtypeStruct((Bp, DIM_OUT), jnp.float32),
        grid=grid,
        in_specs=[pl.BlockSpec((batch_tile, SEQ_PAD, D), lambda b: (b, 0, 0)),
                  full_spec(wqkvp), full_spec(w1), full_spec(w2m),
                  full_spec(vec), full_spec(head_vec), full_spec(head_w)],
        out_specs=pl.BlockSpec((batch_tile, DIM_OUT), lambda b: (b, 0)),
        compiler_params=pltpu.CompilerParams(
            dimension_semantics=("parallel",),
            vmem_limit_bytes=32 * 1024 * 1024),
    )(x, wqkvp, w1, w2m, vec, head_vec, head_w)
    return out[:B]


# ------------------------------ parameter init ------------------------------
def init_params(key):
    ks = iter(jax.random.split(key, 8 + 12 * DEPTH))
    nrm = lambda shape, s=0.02: (jax.random.normal(next(ks), shape, jnp.float32) * s)

    total_tokens = sum(CATEGORIES) + NUM_SPECIAL_TOKENS
    offsets = jnp.array(
        [NUM_SPECIAL_TOKENS + sum(CATEGORIES[:i]) for i in range(len(CATEGORIES))],
        dtype=jnp.int32)

    params = {
        "categ_table": nrm((total_tokens, DIM)),
        "categ_offsets": offsets,
        "num_w": nrm((NUM_CONTINUOUS, DIM)),
        "num_b": nrm((NUM_CONTINUOUS, DIM)),
        "cls": nrm((1, 1, DIM)),
        "head_g": jnp.ones((DIM,), jnp.float32),
        "head_b": jnp.zeros((DIM,), jnp.float32),
        "head_w": nrm((DIM, DIM_OUT)),
        "head_bias": jnp.zeros((DIM_OUT,), jnp.float32),
        "layers": [],
    }
    for _ in range(DEPTH):
        params["layers"].append({
            "g1": jnp.ones((1, DIM), jnp.float32),
            "be1": jnp.zeros((1, DIM), jnp.float32),
            "wqkv": nrm((DIM, 3 * INNER)),
            "wo": nrm((INNER, DIM)),
            "g2": jnp.ones((1, DIM), jnp.float32),
            "be2": jnp.zeros((1, DIM), jnp.float32),
            "w1": nrm((DIM, HIDDEN)),
            "b1": nrm((1, HIDDEN)),
            "w2": nrm((HIDDEN, DIM)),
            "b2": nrm((1, DIM)),
        })
    return params


def init_pruning_masks(key):
    # deterministic binary masks, one per layer, applied to the FF output Linear
    masks = {}
    for i, k in enumerate(jax.random.split(key, DEPTH)):
        m = (jax.random.uniform(k, (1, DIM)) > 0.3).astype(jnp.float32)
        masks[f"ff_layer_{i}_output"] = m
    return masks


def prepare_stacked_params(params, masks):
    """One-time pack (hoisted out of the jitted forward):
       * fold pruning masks into w2/b2 (exact: (h@w2+b2)*m == h@(w2*m)+(b2*m)),
       * fold the attention output projection into the per-head V projections
         (exact: concat_h(P_h v_h) @ Wo == sum_h P_h (v_h @ Wo_h)),
       * fold SCALE into the Q columns (exact),
       * cast matmul weights to bf16 (f32 accumulation in-kernel),
       * pack small LN/bias vectors into (DEPTH, 8, HIDDEN) and (8, HIDDEN)."""
    wqkvp, w1, w2m, vecs = [], [], [], []
    for i, l in enumerate(params["layers"]):
        mask = masks.get(f"ff_layer_{i}_output", jnp.ones((1, DIM), jnp.float32))
        wq = l["wqkv"][:, :INNER] * SCALE
        wk = l["wqkv"][:, INNER:2 * INNER]
        wv = l["wqkv"][:, 2 * INNER:]
        wvp = jnp.concatenate(
            [wv[:, h * DIM_HEAD:(h + 1) * DIM_HEAD]
             @ l["wo"][h * DIM_HEAD:(h + 1) * DIM_HEAD, :] for h in range(HEADS)],
            axis=1)                                              # (DIM, HEADS*DIM)
        wqkvp.append(jnp.concatenate([wq, wk, wvp], axis=1).astype(jnp.bfloat16))
        w1.append(l["w1"].astype(jnp.bfloat16))
        w2m.append((l["w2"] * mask).astype(jnp.bfloat16))
        v = jnp.zeros((8, HIDDEN), jnp.float32)
        v = v.at[0, :DIM].set(l["g1"][0])
        v = v.at[1, :DIM].set(l["be1"][0])
        v = v.at[2, :].set(l["b1"][0])
        v = v.at[3, :DIM].set(l["g2"][0])
        v = v.at[4, :DIM].set(l["be2"][0])
        v = v.at[5, :DIM].set((l["b2"] * mask)[0])
        vecs.append(v)

    head_vec = jnp.zeros((8, HIDDEN), jnp.float32)
    head_vec = head_vec.at[0, :DIM].set(params["head_g"])
    head_vec = head_vec.at[1, :DIM].set(params["head_b"])
    head_vec = head_vec.at[2, :DIM_OUT].set(params["head_bias"])
    head_w = params["head_w"].astype(jnp.float32)

    return (jnp.stack(wqkvp), jnp.stack(w1), jnp.stack(w2m), jnp.stack(vecs),
            head_vec, head_w)


# ------------------------------- forward pass -------------------------------
@jax.jit
def pruned_ftt_forward(params, stacks, x_categ, x_numer):
    # embeddings (glue, plain JAX)
    categ_idx = x_categ + params["categ_offsets"][None, :]
    categ_emb = jnp.take(params["categ_table"], categ_idx, axis=0)      # (B, nc, D)
    numer_emb = x_numer[..., None] * params["num_w"] + params["num_b"]  # (B, nn, D)
    B = x_categ.shape[0]
    cls = jnp.broadcast_to(params["cls"], (B, 1, DIM))
    x = jnp.concatenate([cls, categ_emb, numer_emb], axis=1)            # (B, S, D)

    # fused transformer layers (pruned FF outputs) + classification head
    return fused_transformer_head(x, stacks)                            # (B, DIM_OUT)


# ----------------------------------- main ------------------------------------
if __name__ == "__main__":
    root = jax.random.PRNGKey(0)
    k_params, k_masks, k_categ, k_numer = jax.random.split(root, 4)

    params = init_params(k_params)
    masks = init_pruning_masks(k_masks)
    # packing / folding hoisted out of the per-call path (once per weight update)
    stacks = prepare_stacked_params(params, masks)

    B = 2
    x_categ = jax.random.randint(k_categ, (B, len(CATEGORIES)), 0,
                                 min(CATEGORIES), dtype=jnp.int32)
    x_numer = jax.random.normal(k_numer, (B, NUM_CONTINUOUS), jnp.float32)

    out = pruned_ftt_forward(params, stacks, x_categ, x_numer)
    out = jax.block_until_ready(out)
    assert out.shape == (B, DIM_OUT)
    print("KERNEL_OK")
</pallas_src>

<mosaic_0001>
module attributes {stable_mosaic.version = 11 : i64} {
  func.func @fused_transformer_kernel(%arg0: i32, %arg1: memref<8x8x32xf32, #tpu.memory_space<vmem>>, %arg2: memref<2x32x192xbf16, #tpu.memory_space<vmem>>, %arg3: memref<2x32x128xbf16, #tpu.memory_space<vmem>>, %arg4: memref<2x128x32xbf16, #tpu.memory_space<vmem>>, %arg5: memref<2x8x128xf32, #tpu.memory_space<vmem>>, %arg6: memref<8x128xf32, #tpu.memory_space<vmem>>, %arg7: memref<32x2xf32, #tpu.memory_space<vmem>>, %arg8: memref<8x2xf32, #tpu.memory_space<vmem>>) attributes {dimension_semantics = [#tpu.dimension_semantics<parallel>], iteration_bounds = array<i64: 1>, scalar_prefetch = 0 : i64, scratch_operands = 0 : i64, tpu.core_type = #tpu.core_type<tc>, window_params = [{transform_indices = @transform_0, window_bounds = array<i64: 8, 8, 32>}, {pipeline_mode = #tpu.pipeline_mode<synchronous>, transform_indices = @transform_1, window_bounds = array<i64: 2, 32, 192>}, {pipeline_mode = #tpu.pipeline_mode<synchronous>, transform_indices = @transform_2, window_bounds = array<i64: 2, 32, 128>}, {pipeline_mode = #tpu.pipeline_mode<synchronous>, transform_indices = @transform_3, window_bounds = array<i64: 2, 128, 32>}, {pipeline_mode = #tpu.pipeline_mode<synchronous>, transform_indices = @transform_4, window_bounds = array<i64: 2, 8, 128>}, {pipeline_mode = #tpu.pipeline_mode<synchronous>, transform_indices = @transform_5, window_bounds = array<i64: 8, 128>}, {pipeline_mode = #tpu.pipeline_mode<synchronous>, transform_indices = @transform_6, window_bounds = array<i64: 32, 2>}, {transform_indices = @transform_7, window_bounds = array<i64: 8, 2>}]} {
    %c0 = arith.constant 0 : index
    %c0_0 = arith.constant 0 : index
    %c0_1 = arith.constant 0 : index
    %0 = vector.load %arg1[%c0, %c0_0, %c0_1] : memref<8x8x32xf32, #tpu.memory_space<vmem>>, vector<8x8x32xf32>
    %1 = vector.shape_cast %0 : vector<8x8x32xf32> to vector<64x32xf32>
    %2 = tpu.iota {dimensions = array<i32: 2>} : vector<1x8x8xi32>
    %c7_i32 = arith.constant 7 : i32
    %3 = vector.broadcast %c7_i32 : i32 to vector<1x8x8xi32>
    %4 = arith.cmpi slt, %2, %3 : vector<1x8x8xi32>
    %c0_2 = arith.constant 0 : index
    %c0_3 = arith.constant 0 : index
    %c0_4 = arith.constant 0 : index
    %5 = vector.load %arg5[%c0_2, %c0_3, %c0_4] : memref<2x8x128xf32, #tpu.memory_space<vmem>>, vector<1x8x128xf32>
    %6 = vector.shape_cast %5 : vector<1x8x128xf32> to vector<8x128xf32>
    %7 = vector.extract_strided_slice %6 {offsets = [0, 0], sizes = [1, 32], strides = [1, 1]} : vector<8x128xf32> to vector<1x32xf32>
    %8 = vector.extract_strided_slice %6 {offsets = [1, 0], sizes = [1, 32], strides = [1, 1]} : vector<8x128xf32> to vector<1x32xf32>
    %9 = vector.extract_strided_slice %6 {offsets = [2, 0], sizes = [1, 128], strides = [1, 1]} : vector<8x128xf32> to vector<1x128xf32>
    %10 = vector.extract_strided_slice %6 {offsets = [3, 0], sizes = [1, 32], strides = [1, 1]} : vector<8x128xf32> to vector<1x32xf32>
    %11 = vector.extract_strided_slice %6 {offsets = [4, 0], sizes = [1, 32], strides = [1, 1]} : vector<8x128xf32> to vector<1x32xf32>
    %12 = vector.extract_strided_slice %6 {offsets = [5, 0], sizes = [1, 32], strides = [1, 1]} : vector<8x128xf32> to vector<1x32xf32>
    %cst = arith.constant dense<0.000000e+00> : vector<64xf32>
    %13 = vector.multi_reduction <add>, %1, %cst [1] : vector<64x32xf32> to vector<64xf32>
    %14 = vector.shape_cast %13 : vector<64xf32> to vector<64x1xf32>
    %cst_5 = arith.constant 3.200000e+01 : f32
    %15 = vector.broadcast %cst_5 : f32 to vector<64x1xf32>
    %16 = arith.divf %14, %15 : vector<64x1xf32>
    %17 = vector.broadcast %16 : vector<64x1xf32> to vector<64x32xf32>
    %18 = arith.subf %1, %17 : vector<64x32xf32>
    %19 = arith.mulf %18, %18 : vector<64x32xf32>
    %cst_6 = arith.constant dense<0.000000e+00> : vector<64xf32>
    %20 = vector.multi_reduction <add>, %19, %cst_6 [1] : vector<64x32xf32> to vector<64xf32>
    %21 = vector.shape_cast %20 : vector<64xf32> to vector<64x1xf32>
    %cst_7 = arith.constant 3.200000e+01 : f32
    %22 = vector.broadcast %cst_7 : f32 to vector<64x1xf32>
    %23 = arith.divf %21, %22 : vector<64x1xf32>
    %24 = vector.broadcast %16 : vector<64x1xf32> to vector<64x32xf32>
    %25 = arith.subf %1, %24 : vector<64x32xf32>
    %cst_8 = arith.constant 9.99999974E-6 : f32
    %26 = vector.broadcast %cst_8 : f32 to vector<64x1xf32>
    %27 = arith.addf %23, %26 : vector<64x1xf32>
    %28 = math.rsqrt %27 : vector<64x1xf32>
    %29 = vector.broadcast %28 : vector<64x1xf32> to vector<64x32xf32>
    %30 = arith.mulf %25, %29 : vector<64x32xf32>
    %31 = vector.broadcast %7 : vector<1x32xf32> to vector<64x32xf32>
    %32 = arith.mulf %30, %31 : vector<64x32xf32>
    %33 = vector.broadcast %8 : vector<1x32xf32> to vector<64x32xf32>
    %34 = arith.addf %32, %33 : vector<64x32xf32>
    %35 = arith.truncf %34 : vector<64x32xf32> to vector<64x32xbf16>
    %c0_9 = arith.constant 0 : index
    %c0_10 = arith.constant 0 : index
    %c0_11 = arith.constant 0 : index
    %36 = vector.load %arg2[%c0_9, %c0_10, %c0_11] : memref<2x32x192xbf16, #tpu.memory_space<vmem>>, vector<1x32x192xbf16>
    %37 = vector.shape_cast %36 : vector<1x32x192xbf16> to vector<32x192xbf16>
    %cst_12 = arith.constant dense<0.000000e+00> : vector<64x192xf32>
    %38 = tpu.matmul %35, %37, %cst_12 {dimension_numbers = #tpu.dot_dimension_numbers<[1], [0], [0], [1], [0, 0, 1, 1], [], []>} : vector<64x32xbf16>, vector<32x192xbf16>, vector<64x192xf32> -> vector<64x192xf32>
    %39 = vector.shape_cast %38 : vector<64x192xf32> to vector<8x8x192xf32>
    %cst_13 = arith.constant 0.000000e+00 : f32
    %40 = vector.broadcast %cst_13 : f32 to vector<8x8x32xf32>
    %41 = vector.extract_strided_slice %39 {offsets = [0, 0, 0], sizes = [8, 8, 8], strides = [1, 1, 1]} : vector<8x8x192xf32> to vector<8x8x8xf32>
    %42 = vector.extract_strided_slice %39 {offsets = [0, 0, 32], sizes = [8, 8, 8], strides = [1, 1, 1]} : vector<8x8x192xf32> to vector<8x8x8xf32>
    %43 = vector.extract_strided_slice %39 {offsets = [0, 0, 64], sizes = [8, 8, 32], strides = [1, 1, 1]} : vector<8x8x192xf32> to vector<8x8x32xf32>
    "tpu.trace_start"() <{level = 10 : i32, message = "bqd,bkd->bqk"}> : () -> ()
    %cst_14 = arith.constant dense<0.000000e+00> : vector<8x8x8xf32>
    %44 = tpu.matmul %41, %42, %cst_14 {dimension_numbers = #tpu.dot_dimension_numbers<[2], [2], [1], [1], [0, 0, 0, 1, 1, 1], [0], [0]>} : vector<8x8x8xf32>, vector<8x8x8xf32>, vector<8x8x8xf32> -> vector<8x8x8xf32>
    %cst_15 = arith.constant -1.000000e+30 : f32
    "tpu.trace_stop"() : () -> ()
    %45 = vector.shape_cast %4 : vector<1x8x8xi1> to vector<1x8x8xi1>
    %46 = vector.broadcast %45 : vector<1x8x8xi1> to vector<8x8x8xi1>
    %47 = vector.broadcast %cst_15 : f32 to vector<8x8x8xf32>
    %48 = arith.select %46, %44, %47 : vector<8x8x8xi1>, vector<8x8x8xf32>
    %cst_16 = arith.constant dense<0xFF800000> : vector<8x8xf32>
    %49 = vector.multi_reduction <maximumf>, %48, %cst_16 [2] : vector<8x8x8xf32> to vector<8x8xf32>
    %50 = vector.shape_cast %49 : vector<8x8xf32> to vector<8x8x1xf32>
    %51 = vector.broadcast %50 : vector<8x8x1xf32> to vector<8x8x8xf32>
    %52 = arith.subf %48, %51 : vector<8x8x8xf32>
    %53 = math.exp %52 : vector<8x8x8xf32>
    %cst_17 = arith.constant dense<0.000000e+00> : vector<8x8xf32>
    %54 = vector.multi_reduction <add>, %53, %cst_17 [2] : vector<8x8x8xf32> to vector<8x8xf32>
    %55 = vector.shape_cast %54 : vector<8x8xf32> to vector<8x8x1xf32>
    %56 = tpu.reciprocal %55 {approx = true} : vector<8x8x1xf32> -> vector<8x8x1xf32>
    %57 = vector.broadcast %56 : vector<8x8x1xf32> to vector<8x8x8xf32>
    %58 = arith.mulf %53, %57 : vector<8x8x8xf32>
    "tpu.trace_start"() <{level = 10 : i32, message = "bqk,bkd->bqd"}> : () -> ()
    %cst_18 = arith.constant dense<0.000000e+00> : vector<8x8x32xf32>
    %59 = tpu.matmul %58, %43, %cst_18 {dimension_numbers = #tpu.dot_dimension_numbers<[2], [1], [1], [2], [0, 0, 0, 1, 1, 2], [0], [0]>} : vector<8x8x8xf32>, vector<8x8x32xf32>, vector<8x8x32xf32> -> vector<8x8x32xf32>
    "tpu.trace_stop"() : () -> ()
    %60 = arith.addf %40, %59 : vector<8x8x32xf32>
    %61 = vector.extract_strided_slice %39 {offsets = [0, 0, 8], sizes = [8, 8, 8], strides = [1, 1, 1]} : vector<8x8x192xf32> to vector<8x8x8xf32>
    %62 = vector.extract_strided_slice %39 {offsets = [0, 0, 40], sizes = [8, 8, 8], strides = [1, 1, 1]} : vector<8x8x192xf32> to vector<8x8x8xf32>
    %63 = vector.extract_strided_slice %39 {offsets = [0, 0, 96], sizes = [8, 8, 32], strides = [1, 1, 1]} : vector<8x8x192xf32> to vector<8x8x32xf32>
    "tpu.trace_start"() <{level = 10 : i32, message = "bqd,bkd->bqk"}> : () -> ()
    %cst_19 = arith.constant dense<0.000000e+00> : vector<8x8x8xf32>
    %64 = tpu.matmul %61, %62, %cst_19 {dimension_numbers = #tpu.dot_dimension_numbers<[2], [2], [1], [1], [0, 0, 0, 1, 1, 1], [0], [0]>} : vector<8x8x8xf32>, vector<8x8x8xf32>, vector<8x8x8xf32> -> vector<8x8x8xf32>
    %cst_20 = arith.constant -1.000000e+30 : f32
    "tpu.trace_stop"() : () -> ()
    %65 = vector.shape_cast %4 : vector<1x8x8xi1> to vector<1x8x8xi1>
    %66 = vector.broadcast %65 : vector<1x8x8xi1> to vector<8x8x8xi1>
    %67 = vector.broadcast %cst_20 : f32 to vector<8x8x8xf32>
    %68 = arith.select %66, %64, %67 : vector<8x8x8xi1>, vector<8x8x8xf32>
    %cst_21 = arith.constant dense<0xFF800000> : vector<8x8xf32>
    %69 = vector.multi_reduction <maximumf>, %68, %cst_21 [2] : vector<8x8x8xf32> to vector<8x8xf32>
    %70 = vector.shape_cast %69 : vector<8x8xf32> to vector<8x8x1xf32>
    %71 = vector.broadcast %70 : vector<8x8x1xf32> to vector<8x8x8xf32>
    %72 = arith.subf %68, %71 : vector<8x8x8xf32>
    %73 = math.exp %72 : vector<8x8x8xf32>
    %cst_22 = arith.constant dense<0.000000e+00> : vector<8x8xf32>
    %74 = vector.multi_reduction <add>, %73, %cst_22 [2] : vector<8x8x8xf32> to vector<8x8xf32>
    %75 = vector.shape_cast %74 : vector<8x8xf32> to vector<8x8x1xf32>
    %76 = tpu.reciprocal %75 {approx = true} : vector<8x8x1xf32> -> vector<8x8x1xf32>
    %77 = vector.broadcast %76 : vector<8x8x1xf32> to vector<8x8x8xf32>
    %78 = arith.mulf %73, %77 : vector<8x8x8xf32>
    "tpu.trace_start"() <{level = 10 : i32, message = "bqk,bkd->bqd"}> : () -> ()
    %cst_23 = arith.constant dense<0.000000e+00> : vector<8x8x32xf32>
    %79 = tpu.matmul %78, %63, %cst_23 {dimension_numbers = #tpu.dot_dimension_numbers<[2], [1], [1], [2], [0, 0, 0, 1, 1, 2], [0], [0]>} : vector<8x8x8xf32>, vector<8x8x32xf32>, vector<8x8x32xf32> -> vector<8x8x32xf32>
    "tpu.trace_stop"() : () -> ()
    %80 = arith.addf %60, %79 : vector<8x8x32xf32>
    %81 = vector.extract_strided_slice %39 {offsets = [0, 0, 16], sizes = [8, 8, 8], strides = [1, 1, 1]} : vector<8x8x192xf32> to vector<8x8x8xf32>
    %82 = vector.extract_strided_slice %39 {offsets = [0, 0, 48], sizes = [8, 8, 8], strides = [1, 1, 1]} : vector<8x8x192xf32> to vector<8x8x8xf32>
    %83 = vector.extract_strided_slice %39 {offsets = [0, 0, 128], sizes = [8, 8, 32], strides = [1, 1, 1]} : vector<8x8x192xf32> to vector<8x8x32xf32>
    "tpu.trace_start"() <{level = 10 : i32, message = "bqd,bkd->bqk"}> : () -> ()
    %cst_24 = arith.constant dense<0.000000e+00> : vector<8x8x8xf32>
    %84 = tpu.matmul %81, %82, %cst_24 {dimension_numbers = #tpu.dot_dimension_numbers<[2], [2], [1], [1], [0, 0, 0, 1, 1, 1], [0], [0]>} : vector<8x8x8xf32>, vector<8x8x8xf32>, vector<8x8x8xf32> -> vector<8x8x8xf32>
    %cst_25 = arith.constant -1.000000e+30 : f32
    "tpu.trace_stop"() : () -> ()
    %85 = vector.shape_cast %4 : vector<1x8x8xi1> to vector<1x8x8xi1>
    %86 = vector.broadcast %85 : vector<1x8x8xi1> to vector<8x8x8xi1>
    %87 = vector.broadcast %cst_25 : f32 to vector<8x8x8xf32>
    %88 = arith.select %86, %84, %87 : vector<8x8x8xi1>, vector<8x8x8xf32>
    %cst_26 = arith.constant dense<0xFF800000> : vector<8x8xf32>
    %89 = vector.multi_reduction <maximumf>, %88, %cst_26 [2] : vector<8x8x8xf32> to vector<8x8xf32>
    %90 = vector.shape_cast %89 : vector<8x8xf32> to vector<8x8x1xf32>
    %91 = vector.broadcast %90 : vector<8x8x1xf32> to vector<8x8x8xf32>
    %92 = arith.subf %88, %91 : vector<8x8x8xf32>
    %93 = math.exp %92 : vector<8x8x8xf32>
    %cst_27 = arith.constant dense<0.000000e+00> : vector<8x8xf32>
    %94 = vector.multi_reduction <add>, %93, %cst_27 [2] : vector<8x8x8xf32> to vector<8x8xf32>
    %95 = vector.shape_cast %94 : vector<8x8xf32> to vector<8x8x1xf32>
    %96 = tpu.reciprocal %95 {approx = true} : vector<8x8x1xf32> -> vector<8x8x1xf32>
    %97 = vector.broadcast %96 : vector<8x8x1xf32> to vector<8x8x8xf32>
    %98 = arith.mulf %93, %97 : vector<8x8x8xf32>
    "tpu.trace_start"() <{level = 10 : i32, message = "bqk,bkd->bqd"}> : () -> ()
    %cst_28 = arith.constant dense<0.000000e+00> : vector<8x8x32xf32>
    %99 = tpu.matmul %98, %83, %cst_28 {dimension_numbers = #tpu.dot_dimension_numbers<[2], [1], [1], [2], [0, 0, 0, 1, 1, 2], [0], [0]>} : vector<8x8x8xf32>, vector<8x8x32xf32>, vector<8x8x32xf32> -> vector<8x8x32xf32>
    "tpu.trace_stop"() : () -> ()
    %100 = arith.addf %80, %99 : vector<8x8x32xf32>
    %101 = vector.extract_strided_slice %39 {offsets = [0, 0, 24], sizes = [8, 8, 8], strides = [1, 1, 1]} : vector<8x8x192xf32> to vector<8x8x8xf32>
    %102 = vector.extract_strided_slice %39 {offsets = [0, 0, 56], sizes = [8, 8, 8], strides = [1, 1, 1]} : vector<8x8x192xf32> to vector<8x8x8xf32>
    %103 = vector.extract_strided_slice %39 {offsets = [0, 0, 160], sizes = [8, 8, 32], strides = [1, 1, 1]} : vector<8x8x192xf32> to vector<8x8x32xf32>
    "tpu.trace_start"() <{level = 10 : i32, message = "bqd,bkd->bqk"}> : () -> ()
    %cst_29 = arith.constant dense<0.000000e+00> : vector<8x8x8xf32>
    %104 = tpu.matmul %101, %102, %cst_29 {dimension_numbers = #tpu.dot_dimension_numbers<[2], [2], [1], [1], [0, 0, 0, 1, 1, 1], [0], [0]>} : vector<8x8x8xf32>, vector<8x8x8xf32>, vector<8x8x8xf32> -> vector<8x8x8xf32>
    %cst_30 = arith.constant -1.000000e+30 : f32
    "tpu.trace_stop"() : () -> ()
    %105 = vector.shape_cast %4 : vector<1x8x8xi1> to vector<1x8x8xi1>
    %106 = vector.broadcast %105 : vector<1x8x8xi1> to vector<8x8x8xi1>
    %107 = vector.broadcast %cst_30 : f32 to vector<8x8x8xf32>
    %108 = arith.select %106, %104, %107 : vector<8x8x8xi1>, vector<8x8x8xf32>
    %cst_31 = arith.constant dense<0xFF800000> : vector<8x8xf32>
    %109 = vector.multi_reduction <maximumf>, %108, %cst_31 [2] : vector<8x8x8xf32> to vector<8x8xf32>
    %110 = vector.shape_cast %109 : vector<8x8xf32> to vector<8x8x1xf32>
    %111 = vector.broadcast %110 : vector<8x8x1xf32> to vector<8x8x8xf32>
    %112 = arith.subf %108, %111 : vector<8x8x8xf32>
    %113 = math.exp %112 : vector<8x8x8xf32>
    %cst_32 = arith.constant dense<0.000000e+00> : vector<8x8xf32>
    %114 = vector.multi_reduction <add>, %113, %cst_32 [2] : vector<8x8x8xf32> to vector<8x8xf32>
    %115 = vector.shape_cast %114 : vector<8x8xf32> to vector<8x8x1xf32>
    %116 = tpu.reciprocal %115 {approx = true} : vector<8x8x1xf32> -> vector<8x8x1xf32>
    %117 = vector.broadcast %116 : vector<8x8x1xf32> to vector<8x8x8xf32>
    %118 = arith.mulf %113, %117 : vector<8x8x8xf32>
    "tpu.trace_start"() <{level = 10 : i32, message = "bqk,bkd->bqd"}> : () -> ()
    %cst_33 = arith.constant dense<0.000000e+00> : vector<8x8x32xf32>
    %119 = tpu.matmul %118, %103, %cst_33 {dimension_numbers = #tpu.dot_dimension_numbers<[2], [1], [1], [2], [0, 0, 0, 1, 1, 2], [0], [0]>} : vector<8x8x8xf32>, vector<8x8x32xf32>, vector<8x8x32xf32> -> vector<8x8x32xf32>
    "tpu.trace_stop"() : () -> ()
    %120 = arith.addf %100, %119 : vector<8x8x32xf32>
    %121 = vector.shape_cast %120 : vector<8x8x32xf32> to vector<64x32xf32>
    %122 = arith.addf %1, %121 : vector<64x32xf32>
    %cst_34 = arith.constant dense<0.000000e+00> : vector<64xf32>
    %123 = vector.multi_reduction <add>, %122, %cst_34 [1] : vector<64x32xf32> to vector<64xf32>
    %124 = vector.shape_cast %123 : vector<64xf32> to vector<64x1xf32>
    %cst_35 = arith.constant 3.200000e+01 : f32
    %125 = vector.broadcast %cst_35 : f32 to vector<64x1xf32>
    %126 = arith.divf %124, %125 : vector<64x1xf32>
    %127 = vector.broadcast %126 : vector<64x1xf32> to vector<64x32xf32>
    %128 = arith.subf %122, %127 : vector<64x32xf32>
    %129 = arith.mulf %128, %128 : vector<64x32xf32>
    %cst_36 = arith.constant dense<0.000000e+00> : vector<64xf32>
    %130 = vector.multi_reduction <add>, %129, %cst_36 [1] : vector<64x32xf32> to vector<64xf32>
    %131 = vector.shape_cast %130 : vector<64xf32> to vector<64x1xf32>
    %cst_37 = arith.constant 3.200000e+01 : f32
    %132 = vector.broadcast %cst_37 : f32 to vector<64x1xf32>
    %133 = arith.divf %131, %132 : vector<64x1xf32>
    %134 = vector.broadcast %126 : vector<64x1xf32> to vector<64x32xf32>
    %135 = arith.subf %122, %134 : vector<64x32xf32>
    %cst_38 = arith.constant 9.99999974E-6 : f32
    %136 = vector.broadcast %cst_38 : f32 to vector<64x1xf32>
    %137 = arith.addf %133, %136 : vector<64x1xf32>
    %138 = math.rsqrt %137 : vector<64x1xf32>
    %139 = vector.broadcast %138 : vector<64x1xf32> to vector<64x32xf32>
    %140 = arith.mulf %135, %139 : vector<64x32xf32>
    %141 = vector.broadcast %10 : vector<1x32xf32> to vector<64x32xf32>
    %142 = arith.mulf %140, %141 : vector<64x32xf32>
    %143 = vector.broadcast %11 : vector<1x32xf32> to vector<64x32xf32>
    %144 = arith.addf %142, %143 : vector<64x32xf32>
    %145 = arith.truncf %144 : vector<64x32xf32> to vector<64x32xbf16>
    %c0_39 = arith.constant 0 : index
    %c0_40 = arith.constant 0 : index
    %c0_41 = arith.constant 0 : index
    %146 = vector.load %arg3[%c0_39, %c0_40, %c0_41] : memref<2x32x128xbf16, #tpu.memory_space<vmem>>, vector<1x32x128xbf16>
    %147 = vector.shape_cast %146 : vector<1x32x128xbf16> to vector<32x128xbf16>
    %cst_42 = arith.constant dense<0.000000e+00> : vector<64x128xf32>
    %148 = tpu.matmul %145, %147, %cst_42 {dimension_numbers = #tpu.dot_dimension_numbers<[1], [0], [0], [1], [0, 0, 1, 1], [], []>} : vector<64x32xbf16>, vector<32x128xbf16>, vector<64x128xf32> -> vector<64x128xf32>
    %149 = vector.broadcast %9 : vector<1x128xf32> to vector<64x128xf32>
    %150 = arith.addf %148, %149 : vector<64x128xf32>
    %cst_43 = arith.constant 5.000000e-01 : f32
    %151 = vector.broadcast %cst_43 : f32 to vector<64x128xf32>
    %152 = arith.mulf %151, %150 : vector<64x128xf32>
    %cst_44 = arith.constant 2.000000e+00 : f32
    %153 = math.sqrt %cst_44 : f32
    %cst_45 = arith.constant 1.000000e+00 : f32
    %154 = arith.divf %cst_45, %153 : f32
    %155 = vector.broadcast %154 : f32 to vector<64x128xf32>
    %156 = arith.mulf %150, %155 : vector<64x128xf32>
    %157 = math.erf %156 : vector<64x128xf32>
    %cst_46 = arith.constant 1.000000e+00 : f32
    %158 = vector.broadcast %cst_46 : f32 to vector<64x128xf32>
    %159 = arith.addf %158, %157 : vector<64x128xf32>
    %160 = arith.mulf %152, %159 : vector<64x128xf32>
    %161 = arith.truncf %160 : vector<64x128xf32> to vector<64x128xbf16>
    %c0_47 = arith.constant 0 : index
    %c0_48 = arith.constant 0 : index
    %c0_49 = arith.constant 0 : index
    %162 = vector.load %arg4[%c0_47, %c0_48, %c0_49] : memref<2x128x32xbf16, #tpu.memory_space<vmem>>, vector<1x128x32xbf16>
    %163 = vector.shape_cast %162 : vector<1x128x32xbf16> to vector<128x32xbf16>
    %cst_50 = arith.constant dense<0.000000e+00> : vector<64x32xf32>
    %164 = tpu.matmul %161, %163, %cst_50 {dimension_numbers = #tpu.dot_dimension_numbers<[1], [0], [0], [1], [0, 0, 1, 1], [], []>} : vector<64x128xbf16>, vector<128x32xbf16>, vector<64x32xf32> -> vector<64x32xf32>
    %165 = vector.broadcast %12 : vector<1x32xf32> to vector<64x32xf32>
    %166 = arith.addf %164, %165 : vector<64x32xf32>
    %167 = arith.addf %122, %166 : vector<64x32xf32>
    %c1 = arith.constant 1 : index
    %c0_51 = arith.constant 0 : index
    %c0_52 = arith.constant 0 : index
    %168 = vector.load %arg5[%c1, %c0_51, %c0_52] : memref<2x8x128xf32, #tpu.memory_space<vmem>>, vector<1x8x128xf32>
    %169 = vector.shape_cast %168 : vector<1x8x128xf32> to vector<8x128xf32>
    %170 = vector.extract_strided_slice %169 {offsets = [0, 0], sizes = [1, 32], strides = [1, 1]} : vector<8x128xf32> to vector<1x32xf32>
    %171 = vector.extract_strided_slice %169 {offsets = [1, 0], sizes = [1, 32], strides = [1, 1]} : vector<8x128xf32> to vector<1x32xf32>
    %172 = vector.extract_strided_slice %169 {offsets = [2, 0], sizes = [1, 128], strides = [1, 1]} : vector<8x128xf32> to vector<1x128xf32>
    %173 = vector.extract_strided_slice %169 {offsets = [3, 0], sizes = [1, 32], strides = [1, 1]} : vector<8x128xf32> to vector<1x32xf32>
    %174 = vector.extract_strided_slice %169 {offsets = [4, 0], sizes = [1, 32], strides = [1, 1]} : vector<8x128xf32> to vector<1x32xf32>
    %175 = vector.extract_strided_slice %169 {offsets = [5, 0], sizes = [1, 32], strides = [1, 1]} : vector<8x128xf32> to vector<1x32xf32>
    %cst_53 = arith.constant dense<0.000000e+00> : vector<64xf32>
    %176 = vector.multi_reduction <add>, %167, %cst_53 [1] : vector<64x32xf32> to vector<64xf32>
    %177 = vector.shape_cast %176 : vector<64xf32> to vector<64x1xf32>
    %cst_54 = arith.constant 3.200000e+01 : f32
    %178 = vector.broadcast %cst_54 : f32 to vector<64x1xf32>
    %179 = arith.divf %177, %178 : vector<64x1xf32>
    %180 = vector.broadcast %179 : vector<64x1xf32> to vector<64x32xf32>
    %181 = arith.subf %167, %180 : vector<64x32xf32>
    %182 = arith.mulf %181, %181 : vector<64x32xf32>
    %cst_55 = arith.constant dense<0.000000e+00> : vector<64xf32>
    %183 = vector.multi_reduction <add>, %182, %cst_55 [1] : vector<64x32xf32> to vector<64xf32>
    %184 = vector.shape_cast %183 : vector<64xf32> to vector<64x1xf32>
    %cst_56 = arith.constant 3.200000e+01 : f32
    %185 = vector.broadcast %cst_56 : f32 to vector<64x1xf32>
    %186 = arith.divf %184, %185 : vector<64x1xf32>
    %187 = vector.broadcast %179 : vector<64x1xf32> to vector<64x32xf32>
    %188 = arith.subf %167, %187 : vector<64x32xf32>
    %cst_57 = arith.constant 9.99999974E-6 : f32
    %189 = vector.broadcast %cst_57 : f32 to vector<64x1xf32>
    %190 = arith.addf %186, %189 : vector<64x1xf32>
    %191 = math.rsqrt %190 : vector<64x1xf32>
    %192 = vector.broadcast %191 : vector<64x1xf32> to vector<64x32xf32>
    %193 = arith.mulf %188, %192 : vector<64x32xf32>
    %194 = vector.broadcast %170 : vector<1x32xf32> to vector<64x32xf32>
    %195 = arith.mulf %193, %194 : vector<64x32xf32>
    %196 = vector.broadcast %171 : vector<1x32xf32> to vector<64x32xf32>
    %197 = arith.addf %195, %196 : vector<64x32xf32>
    %198 = arith.truncf %197 : vector<64x32xf32> to vector<64x32xbf16>
    %c1_58 = arith.constant 1 : index
    %c0_59 = arith.constant 0 : index
    %c0_60 = arith.constant 0 : index
    %199 = vector.load %arg2[%c1_58, %c0_59, %c0_60] : memref<2x32x192xbf16, #tpu.memory_space<vmem>>, vector<1x32x192xbf16>
    %200 = vector.shape_cast %199 : vector<1x32x192xbf16> to vector<32x192xbf16>
    %cst_61 = arith.constant dense<0.000000e+00> : vector<64x192xf32>
    %201 = tpu.matmul %198, %200, %cst_61 {dimension_numbers = #tpu.dot_dimension_numbers<[1], [0], [0], [1], [0, 0, 1, 1], [], []>} : vector<64x32xbf16>, vector<32x192xbf16>, vector<64x192xf32> -> vector<64x192xf32>
    %202 = vector.shape_cast %201 : vector<64x192xf32> to vector<8x8x192xf32>
    %cst_62 = arith.constant 0.000000e+00 : f32
    %203 = vector.broadcast %cst_62 : f32 to vector<8x8x32xf32>
    %204 = vector.extract_strided_slice %202 {offsets = [0, 0, 0], sizes = [8, 8, 8], strides = [1, 1, 1]} : vector<8x8x192xf32> to vector<8x8x8xf32>
    %205 = vector.extract_strided_slice %202 {offsets = [0, 0, 32], sizes = [8, 8, 8], strides = [1, 1, 1]} : vector<8x8x192xf32> to vector<8x8x8xf32>
    %206 = vector.extract_strided_slice %202 {offsets = [0, 0, 64], sizes = [8, 8, 32], strides = [1, 1, 1]} : vector<8x8x192xf32> to vector<8x8x32xf32>
    "tpu.trace_start"() <{level = 10 : i32, message = "bqd,bkd->bqk"}> : () -> ()
    %cst_63 = arith.constant dense<0.000000e+00> : vector<8x8x8xf32>
    %207 = tpu.matmul %204, %205, %cst_63 {dimension_numbers = #tpu.dot_dimension_numbers<[2], [2], [1], [1], [0, 0, 0, 1, 1, 1], [0], [0]>} : vector<8x8x8xf32>, vector<8x8x8xf32>, vector<8x8x8xf32> -> vector<8x8x8xf32>
    %cst_64 = arith.constant -1.000000e+30 : f32
    "tpu.trace_stop"() : () -> ()
    %208 = vector.shape_cast %4 : vector<1x8x8xi1> to vector<1x8x8xi1>
    %209 = vector.broadcast %208 : vector<1x8x8xi1> to vector<8x8x8xi1>
    %210 = vector.broadcast %cst_64 : f32 to vector<8x8x8xf32>
    %211 = arith.select %209, %207, %210 : vector<8x8x8xi1>, vector<8x8x8xf32>
    %cst_65 = arith.constant dense<0xFF800000> : vector<8x8xf32>
    %212 = vector.multi_reduction <maximumf>, %211, %cst_65 [2] : vector<8x8x8xf32> to vector<8x8xf32>
    %213 = vector.shape_cast %212 : vector<8x8xf32> to vector<8x8x1xf32>
    %214 = vector.broadcast %213 : vector<8x8x1xf32> to vector<8x8x8xf32>
    %215 = arith.subf %211, %214 : vector<8x8x8xf32>
    %216 = math.exp %215 : vector<8x8x8xf32>
    %cst_66 = arith.constant dense<0.000000e+00> : vector<8x8xf32>
    %217 = vector.multi_reduction <add>, %216, %cst_66 [2] : vector<8x8x8xf32> to vector<8x8xf32>
    %218 = vector.shape_cast %217 : vector<8x8xf32> to vector<8x8x1xf32>
    %219 = tpu.reciprocal %218 {approx = true} : vector<8x8x1xf32> -> vector<8x8x1xf32>
    %220 = vector.broadcast %219 : vector<8x8x1xf32> to vector<8x8x8xf32>
    %221 = arith.mulf %216, %220 : vector<8x8x8xf32>
    "tpu.trace_start"() <{level = 10 : i32, message = "bqk,bkd->bqd"}> : () -> ()
    %cst_67 = arith.constant dense<0.000000e+00> : vector<8x8x32xf32>
    %222 = tpu.matmul %221, %206, %cst_67 {dimension_numbers = #tpu.dot_dimension_numbers<[2], [1], [1], [2], [0, 0, 0, 1, 1, 2], [0], [0]>} : vector<8x8x8xf32>, vector<8x8x32xf32>, vector<8x8x32xf32> -> vector<8x8x32xf32>
    "tpu.trace_stop"() : () -> ()
    %223 = arith.addf %203, %222 : vector<8x8x32xf32>
    %224 = vector.extract_strided_slice %202 {offsets = [0, 0, 8], sizes = [8, 8, 8], strides = [1, 1, 1]} : vector<8x8x192xf32> to vector<8x8x8xf32>
    %225 = vector.extract_strided_slice %202 {offsets = [0, 0, 40], sizes = [8, 8, 8], strides = [1, 1, 1]} : vector<8x8x192xf32> to vector<8x8x8xf32>
    %226 = vector.extract_strided_slice %202 {offsets = [0, 0, 96], sizes = [8, 8, 32], strides = [1, 1, 1]} : vector<8x8x192xf32> to vector<8x8x32xf32>
    "tpu.trace_start"() <{level = 10 : i32, message = "bqd,bkd->bqk"}> : () -> ()
    %cst_68 = arith.constant dense<0.000000e+00> : vector<8x8x8xf32>
    %227 = tpu.matmul %224, %225, %cst_68 {dimension_numbers = #tpu.dot_dimension_numbers<[2], [2], [1], [1], [0, 0, 0, 1, 1, 1], [0], [0]>} : vector<8x8x8xf32>, vector<8x8x8xf32>, vector<8x8x8xf32> -> vector<8x8x8xf32>
    %cst_69 = arith.constant -1.000000e+30 : f32
    "tpu.trace_stop"() : () -> ()
    %228 = vector.shape_cast %4 : vector<1x8x8xi1> to vector<1x8x8xi1>
    %229 = vector.broadcast %228 : vector<1x8x8xi1> to vector<8x8x8xi1>
    %230 = vector.broadcast %cst_69 : f32 to vector<8x8x8xf32>
    %231 = arith.select %229, %227, %230 : vector<8x8x8xi1>, vector<8x8x8xf32>
    %cst_70 = arith.constant dense<0xFF800000> : vector<8x8xf32>
    %232 = vector.multi_reduction <maximumf>, %231, %cst_70 [2] : vector<8x8x8xf32> to vector<8x8xf32>
    %233 = vector.shape_cast %232 : vector<8x8xf32> to vector<8x8x1xf32>
    %234 = vector.broadcast %233 : vector<8x8x1xf32> to vector<8x8x8xf32>
    %235 = arith.subf %231, %234 : vector<8x8x8xf32>
    %236 = math.exp %235 : vector<8x8x8xf32>
    %cst_71 = arith.constant dense<0.000000e+00> : vector<8x8xf32>
    %237 = vector.multi_reduction <add>, %236, %cst_71 [2] : vector<8x8x8xf32> to vector<8x8xf32>
    %238 = vector.shape_cast %237 : vector<8x8xf32> to vector<8x8x1xf32>
    %239 = tpu.reciprocal %238 {approx = true} : vector<8x8x1xf32> -> vector<8x8x1xf32>
    %240 = vector.broadcast %239 : vector<8x8x1xf32> to vector<8x8x8xf32>
    %241 = arith.mulf %236, %240 : vector<8x8x8xf32>
    "tpu.trace_start"() <{level = 10 : i32, message = "bqk,bkd->bqd"}> : () -> ()
    %cst_72 = arith.constant dense<0.000000e+00> : vector<8x8x32xf32>
    %242 = tpu.matmul %241, %226, %cst_72 {dimension_numbers = #tpu.dot_dimension_numbers<[2], [1], [1], [2], [0, 0, 0, 1, 1, 2], [0], [0]>} : vector<8x8x8xf32>, vector<8x8x32xf32>, vector<8x8x32xf32> -> vector<8x8x32xf32>
    "tpu.trace_stop"() : () -> ()
    %243 = arith.addf %223, %242 : vector<8x8x32xf32>
    %244 = vector.extract_strided_slice %202 {offsets = [0, 0, 16], sizes = [8, 8, 8], strides = [1, 1, 1]} : vector<8x8x192xf32> to vector<8x8x8xf32>
    %245 = vector.extract_strided_slice %202 {offsets = [0, 0, 48], sizes = [8, 8, 8], strides = [1, 1, 1]} : vector<8x8x192xf32> to vector<8x8x8xf32>
    %246 = vector.extract_strided_slice %202 {offsets = [0, 0, 128], sizes = [8, 8, 32], strides = [1, 1, 1]} : vector<8x8x192xf32> to vector<8x8x32xf32>
    "tpu.trace_start"() <{level = 10 : i32, message = "bqd,bkd->bqk"}> : () -> ()
    %cst_73 = arith.constant dense<0.000000e+00> : vector<8x8x8xf32>
    %247 = tpu.matmul %244, %245, %cst_73 {dimension_numbers = #tpu.dot_dimension_numbers<[2], [2], [1], [1], [0, 0, 0, 1, 1, 1], [0], [0]>} : vector<8x8x8xf32>, vector<8x8x8xf32>, vector<8x8x8xf32> -> vector<8x8x8xf32>
    %cst_74 = arith.constant -1.000000e+30 : f32
    "tpu.trace_stop"() : () -> ()
    %248 = vector.shape_cast %4 : vector<1x8x8xi1> to vector<1x8x8xi1>
    %249 = vector.broadcast %248 : vector<1x8x8xi1> to vector<8x8x8xi1>
    %250 = vector.broadcast %cst_74 : f32 to vector<8x8x8xf32>
    %251 = arith.select %249, %247, %250 : vector<8x8x8xi1>, vector<8x8x8xf32>
    %cst_75 = arith.constant dense<0xFF800000> : vector<8x8xf32>
    %252 = vector.multi_reduction <maximumf>, %251, %cst_75 [2] : vector<8x8x8xf32> to vector<8x8xf32>
    %253 = vector.shape_cast %252 : vector<8x8xf32> to vector<8x8x1xf32>
    %254 = vector.broadcast %253 : vector<8x8x1xf32> to vector<8x8x8xf32>
    %255 = arith.subf %251, %254 : vector<8x8x8xf32>
    %256 = math.exp %255 : vector<8x8x8xf32>
    %cst_76 = arith.constant dense<0.000000e+00> : vector<8x8xf32>
    %257 = vector.multi_reduction <add>, %256, %cst_76 [2] : vector<8x8x8xf32> to vector<8x8xf32>
    %258 = vector.shape_cast %257 : vector<8x8xf32> to vector<8x8x1xf32>
    %259 = tpu.reciprocal %258 {approx = true} : vector<8x8x1xf32> -> vector<8x8x1xf32>
    %260 = vector.broadcast %259 : vector<8x8x1xf32> to vector<8x8x8xf32>
    %261 = arith.mulf %256, %260 : vector<8x8x8xf32>
    "tpu.trace_start"() <{level = 10 : i32, message = "bqk,bkd->bqd"}> : () -> ()
    %cst_77 = arith.constant dense<0.000000e+00> : vector<8x8x32xf32>
    %262 = tpu.matmul %261, %246, %cst_77 {dimension_numbers = #tpu.dot_dimension_numbers<[2], [1], [1], [2], [0, 0, 0, 1, 1, 2], [0], [0]>} : vector<8x8x8xf32>, vector<8x8x32xf32>, vector<8x8x32xf32> -> vector<8x8x32xf32>
    "tpu.trace_stop"() : () -> ()
    %263 = arith.addf %243, %262 : vector<8x8x32xf32>
    %264 = vector.extract_strided_slice %202 {offsets = [0, 0, 24], sizes = [8, 8, 8], strides = [1, 1, 1]} : vector<8x8x192xf32> to vector<8x8x8xf32>
    %265 = vector.extract_strided_slice %202 {offsets = [0, 0, 56], sizes = [8, 8, 8], strides = [1, 1, 1]} : vector<8x8x192xf32> to vector<8x8x8xf32>
    %266 = vector.extract_strided_slice %202 {offsets = [0, 0, 160], sizes = [8, 8, 32], strides = [1, 1, 1]} : vector<8x8x192xf32> to vector<8x8x32xf32>
    "tpu.trace_start"() <{level = 10 : i32, message = "bqd,bkd->bqk"}> : () -> ()
    %cst_78 = arith.constant dense<0.000000e+00> : vector<8x8x8xf32>
    %267 = tpu.matmul %264, %265, %cst_78 {dimension_numbers = #tpu.dot_dimension_numbers<[2], [2], [1], [1], [0, 0, 0, 1, 1, 1], [0], [0]>} : vector<8x8x8xf32>, vector<8x8x8xf32>, vector<8x8x8xf32> -> vector<8x8x8xf32>
    %cst_79 = arith.constant -1.000000e+30 : f32
    "tpu.trace_stop"() : () -> ()
    %268 = vector.shape_cast %4 : vector<1x8x8xi1> to vector<1x8x8xi1>
    %269 = vector.broadcast %268 : vector<1x8x8xi1> to vector<8x8x8xi1>
    %270 = vector.broadcast %cst_79 : f32 to vector<8x8x8xf32>
    %271 = arith.select %269, %267, %270 : vector<8x8x8xi1>, vector<8x8x8xf32>
    %cst_80 = arith.constant dense<0xFF800000> : vector<8x8xf32>
    %272 = vector.multi_reduction <maximumf>, %271, %cst_80 [2] : vector<8x8x8xf32> to vector<8x8xf32>
    %273 = vector.shape_cast %272 : vector<8x8xf32> to vector<8x8x1xf32>
    %274 = vector.broadcast %273 : vector<8x8x1xf32> to vector<8x8x8xf32>
    %275 = arith.subf %271, %274 : vector<8x8x8xf32>
    %276 = math.exp %275 : vector<8x8x8xf32>
    %cst_81 = arith.constant dense<0.000000e+00> : vector<8x8xf32>
    %277 = vector.multi_reduction <add>, %276, %cst_81 [2] : vector<8x8x8xf32> to vector<8x8xf32>
    %278 = vector.shape_cast %277 : vector<8x8xf32> to vector<8x8x1xf32>
    %279 = tpu.reciprocal %278 {approx = true} : vector<8x8x1xf32> -> vector<8x8x1xf32>
    %280 = vector.broadcast %279 : vector<8x8x1xf32> to vector<8x8x8xf32>
    %281 = arith.mulf %276, %280 : vector<8x8x8xf32>
    "tpu.trace_start"() <{level = 10 : i32, message = "bqk,bkd->bqd"}> : () -> ()
    %cst_82 = arith.constant dense<0.000000e+00> : vector<8x8x32xf32>
    %282 = tpu.matmul %281, %266, %cst_82 {dimension_numbers = #tpu.dot_dimension_numbers<[2], [1], [1], [2], [0, 0, 0, 1, 1, 2], [0], [0]>} : vector<8x8x8xf32>, vector<8x8x32xf32>, vector<8x8x32xf32> -> vector<8x8x32xf32>
    "tpu.trace_stop"() : () -> ()
    %283 = arith.addf %263, %282 : vector<8x8x32xf32>
    %284 = vector.shape_cast %283 : vector<8x8x32xf32> to vector<64x32xf32>
    %285 = arith.addf %167, %284 : vector<64x32xf32>
    %cst_83 = arith.constant dense<0.000000e+00> : vector<64xf32>
    %286 = vector.multi_reduction <add>, %285, %cst_83 [1] : vector<64x32xf32> to vector<64xf32>
    %287 = vector.shape_cast %286 : vector<64xf32> to vector<64x1xf32>
    %cst_84 = arith.constant 3.200000e+01 : f32
    %288 = vector.broadcast %cst_84 : f32 to vector<64x1xf32>
    %289 = arith.divf %287, %288 : vector<64x1xf32>
    %290 = vector.broadcast %289 : vector<64x1xf32> to vector<64x32xf32>
    %291 = arith.subf %285, %290 : vector<64x32xf32>
    %292 = arith.mulf %291, %291 : vector<64x32xf32>
    %cst_85 = arith.constant dense<0.000000e+00> : vector<64xf32>
    %293 = vector.multi_reduction <add>, %292, %cst_85 [1] : vector<64x32xf32> to vector<64xf32>
    %294 = vector.shape_cast %293 : vector<64xf32> to vector<64x1xf32>
    %cst_86 = arith.constant 3.200000e+01 : f32
    %295 = vector.broadcast %cst_86 : f32 to vector<64x1xf32>
    %296 = arith.divf %294, %295 : vector<64x1xf32>
    %297 = vector.broadcast %289 : vector<64x1xf32> to vector<64x32xf32>
    %298 = arith.subf %285, %297 : vector<64x32xf32>
    %cst_87 = arith.constant 9.99999974E-6 : f32
    %299 = vector.broadcast %cst_87 : f32 to vector<64x1xf32>
    %300 = arith.addf %296, %299 : vector<64x1xf32>
    %301 = math.rsqrt %300 : vector<64x1xf32>
    %302 = vector.broadcast %301 : vector<64x1xf32> to vector<64x32xf32>
    %303 = arith.mulf %298, %302 : vector<64x32xf32>
    %304 = vector.broadcast %173 : vector<1x32xf32> to vector<64x32xf32>
    %305 = arith.mulf %303, %304 : vector<64x32xf32>
    %306 = vector.broadcast %174 : vector<1x32xf32> to vector<64x32xf32>
    %307 = arith.addf %305, %306 : vector<64x32xf32>
    %308 = arith.truncf %307 : vector<64x32xf32> to vector<64x32xbf16>
    %c1_88 = arith.constant 1 : index
    %c0_89 = arith.constant 0 : index
    %c0_90 = arith.constant 0 : index
    %309 = vector.load %arg3[%c1_88, %c0_89, %c0_90] : memref<2x32x128xbf16, #tpu.memory_space<vmem>>, vector<1x32x128xbf16>
    %310 = vector.shape_cast %309 : vector<1x32x128xbf16> to vector<32x128xbf16>
    %cst_91 = arith.constant dense<0.000000e+00> : vector<64x128xf32>
    %311 = tpu.matmul %308, %310, %cst_91 {dimension_numbers = #tpu.dot_dimension_numbers<[1], [0], [0], [1], [0, 0, 1, 1], [], []>} : vector<64x32xbf16>, vector<32x128xbf16>, vector<64x128xf32> -> vector<64x128xf32>
    %312 = vector.broadcast %172 : vector<1x128xf32> to vector<64x128xf32>
    %313 = arith.addf %311, %312 : vector<64x128xf32>
    %cst_92 = arith.constant 5.000000e-01 : f32
    %314 = vector.broadcast %cst_92 : f32 to vector<64x128xf32>
    %315 = arith.mulf %314, %313 : vector<64x128xf32>
    %cst_93 = arith.constant 2.000000e+00 : f32
    %316 = math.sqrt %cst_93 : f32
    %cst_94 = arith.constant 1.000000e+00 : f32
    %317 = arith.divf %cst_94, %316 : f32
    %318 = vector.broadcast %317 : f32 to vector<64x128xf32>
    %319 = arith.mulf %313, %318 : vector<64x128xf32>
    %320 = math.erf %319 : vector<64x128xf32>
    %cst_95 = arith.constant 1.000000e+00 : f32
    %321 = vector.broadcast %cst_95 : f32 to vector<64x128xf32>
    %322 = arith.addf %321, %320 : vector<64x128xf32>
    %323 = arith.mulf %315, %322 : vector<64x128xf32>
    %324 = arith.truncf %323 : vector<64x128xf32> to vector<64x128xbf16>
    %c1_96 = arith.constant 1 : index
    %c0_97 = arith.constant 0 : index
    %c0_98 = arith.constant 0 : index
    %325 = vector.load %arg4[%c1_96, %c0_97, %c0_98] : memref<2x128x32xbf16, #tpu.memory_space<vmem>>, vector<1x128x32xbf16>
    %326 = vector.shape_cast %325 : vector<1x128x32xbf16> to vector<128x32xbf16>
    %cst_99 = arith.constant dense<0.000000e+00> : vector<64x32xf32>
    %327 = tpu.matmul %324, %326, %cst_99 {dimension_numbers = #tpu.dot_dimension_numbers<[1], [0], [0], [1], [0, 0, 1, 1], [], []>} : vector<64x128xbf16>, vector<128x32xbf16>, vector<64x32xf32> -> vector<64x32xf32>
    %328 = vector.broadcast %175 : vector<1x32xf32> to vector<64x32xf32>
    %329 = arith.addf %327, %328 : vector<64x32xf32>
    %330 = arith.addf %285, %329 : vector<64x32xf32>
    %c0_100 = arith.constant 0 : index
    %c0_101 = arith.constant 0 : index
    %331 = vector.load %arg6[%c0_100, %c0_101] : memref<8x128xf32, #tpu.memory_space<vmem>>, vector<8x128xf32>
    %332 = vector.extract_strided_slice %331 {offsets = [0, 0], sizes = [1, 32], strides = [1, 1]} : vector<8x128xf32> to vector<1x32xf32>
    %333 = vector.extract_strided_slice %331 {offsets = [1, 0], sizes = [1, 32], strides = [1, 1]} : vector<8x128xf32> to vector<1x32xf32>
    %334 = vector.extract_strided_slice %331 {offsets = [2, 0], sizes = [1, 2], strides = [1, 1]} : vector<8x128xf32> to vector<1x2xf32>
    %335 = tpu.iota {dimensions = array<i32: 1>} : vector<1x8x1xi32>
    %c0_i32 = arith.constant 0 : i32
    %336 = vector.broadcast %c0_i32 : i32 to vector<1x8x1xi32>
    %337 = arith.cmpi eq, %335, %336 : vector<1x8x1xi32>
    %338 = vector.shape_cast %330 : vector<64x32xf32> to vector<8x8x32xf32>
    %cst_102 = arith.constant 0.000000e+00 : f32
    %339 = vector.shape_cast %337 : vector<1x8x1xi1> to vector<1x8x1xi1>
    %340 = vector.broadcast %339 : vector<1x8x1xi1> to vector<8x8x32xi1>
    %341 = vector.broadcast %cst_102 : f32 to vector<8x8x32xf32>
    %342 = arith.select %340, %338, %341 : vector<8x8x32xi1>, vector<8x8x32xf32>
    %cst_103 = arith.constant dense<0.000000e+00> : vector<8x32xf32>
    %343 = vector.multi_reduction <add>, %342, %cst_103 [1] : vector<8x8x32xf32> to vector<8x32xf32>
    %cst_104 = arith.constant dense<0.000000e+00> : vector<8xf32>
    %344 = vector.multi_reduction <add>, %343, %cst_104 [1] : vector<8x32xf32> to vector<8xf32>
    %345 = vector.shape_cast %344 : vector<8xf32> to vector<8x1xf32>
    %cst_105 = arith.constant 3.200000e+01 : f32
    %346 = vector.broadcast %cst_105 : f32 to vector<8x1xf32>
    %347 = arith.divf %345, %346 : vector<8x1xf32>
    %348 = vector.broadcast %347 : vector<8x1xf32> to vector<8x32xf32>
    %349 = arith.subf %343, %348 : vector<8x32xf32>
    %350 = arith.mulf %349, %349 : vector<8x32xf32>
    %cst_106 = arith.constant dense<0.000000e+00> : vector<8xf32>
    %351 = vector.multi_reduction <add>, %350, %cst_106 [1] : vector<8x32xf32> to vector<8xf32>
    %352 = vector.shape_cast %351 : vector<8xf32> to vector<8x1xf32>
    %cst_107 = arith.constant 3.200000e+01 : f32
    %353 = vector.broadcast %cst_107 : f32 to vector<8x1xf32>
    %354 = arith.divf %352, %353 : vector<8x1xf32>
    %355 = vector.broadcast %347 : vector<8x1xf32> to vector<8x32xf32>
    %356 = arith.subf %343, %355 : vector<8x32xf32>
    %cst_108 = arith.constant 9.99999974E-6 : f32
    %357 = vector.broadcast %cst_108 : f32 to vector<8x1xf32>
    %358 = arith.addf %354, %357 : vector<8x1xf32>
    %359 = math.rsqrt %358 : vector<8x1xf32>
    %360 = vector.broadcast %359 : vector<8x1xf32> to vector<8x32xf32>
    %361 = arith.mulf %356, %360 : vector<8x32xf32>
    %362 = vector.broadcast %332 : vector<1x32xf32> to vector<8x32xf32>
    %363 = arith.mulf %361, %362 : vector<8x32xf32>
    %364 = vector.broadcast %333 : vector<1x32xf32> to vector<8x32xf32>
    %365 = arith.addf %363, %364 : vector<8x32xf32>
    %cst_109 = arith.constant 0.000000e+00 : f32
    %366 = vector.broadcast %cst_109 : f32 to vector<8x32xf32>
    %367 = arith.maximumf %365, %366 : vector<8x32xf32>
    %c0_110 = arith.constant 0 : index
    %c0_111 = arith.constant 0 : index
    %368 = vector.load %arg7[%c0_110, %c0_111] : memref<32x2xf32, #tpu.memory_space<vmem>>, vector<32x2xf32>
    %cst_112 = arith.constant dense<0.000000e+00> : vector<8x2xf32>
    %369 = tpu.matmul %367, %368, %cst_112 {dimension_numbers = #tpu.dot_dimension_numbers<[1], [0], [0], [1], [0, 0, 1, 1], [], []>} : vector<8x32xf32>, vector<32x2xf32>, vector<8x2xf32> -> vector<8x2xf32>
    %370 = vector.broadcast %334 : vector<1x2xf32> to vector<8x2xf32>
    %371 = arith.addf %369, %370 : vector<8x2xf32>
    %c0_113 = arith.constant 0 : index
    %c0_114 = arith.constant 0 : index
    %372 = vector.load %arg8[%c0_113, %c0_114] : memref<8x2xf32, #tpu.memory_space<vmem>>, vector<8x2xf32>
    tpu.vector_store %arg8[%c0_113, %c0_114], %371 {strides = array<i32>} : memref<8x2xf32, #tpu.memory_space<vmem>>, vector<8x2xf32>,
    return
  }
  func.func @transform_0(%arg0: i32) -> (i32, i32, i32) {
    %c0_i32 = arith.constant 0 : i32
    %c0_i32_0 = arith.constant 0 : i32
    %c0_i32_1 = arith.constant 0 : i32
    return %arg0, %c0_i32, %c0_i32_0 : i32, i32, i32
  }
  func.func @transform_1(%arg0: i32) -> (i32, i32, i32) {
    %c0_i32 = arith.constant 0 : i32
    %c0_i32_0 = arith.constant 0 : i32
    %c0_i32_1 = arith.constant 0 : i32
    %c0_i32_2 = arith.constant 0 : i32
    return %c0_i32, %c0_i32_0, %c0_i32_1 : i32, i32, i32
  }
  func.func @transform_2(%arg0: i32) -> (i32, i32, i32) {
    %c0_i32 = arith.constant 0 : i32
    %c0_i32_0 = arith.constant 0 : i32
    %c0_i32_1 = arith.constant 0 : i32
    %c0_i32_2 = arith.constant 0 : i32
    return %c0_i32, %c0_i32_0, %c0_i32_1 : i32, i32, i32
  }
  func.func @transform_3(%arg0: i32) -> (i32, i32, i32) {
    %c0_i32 = arith.constant 0 : i32
    %c0_i32_0 = arith.constant 0 : i32
    %c0_i32_1 = arith.constant 0 : i32
    %c0_i32_2 = arith.constant 0 : i32
    return %c0_i32, %c0_i32_0, %c0_i32_1 : i32, i32, i32
  }
  func.func @transform_4(%arg0: i32) -> (i32, i32, i32) {
    %c0_i32 = arith.constant 0 : i32
    %c0_i32_0 = arith.constant 0 : i32
    %c0_i32_1 = arith.constant 0 : i32
    %c0_i32_2 = arith.constant 0 : i32
    return %c0_i32, %c0_i32_0, %c0_i32_1 : i32, i32, i32
  }
  func.func @transform_5(%arg0: i32) -> (i32, i32) {
    %c0_i32 = arith.constant 0 : i32
    %c0_i32_0 = arith.constant 0 : i32
    %c0_i32_1 = arith.constant 0 : i32
    return %c0_i32, %c0_i32_0 : i32, i32
  }
  func.func @transform_6(%arg0: i32) -> (i32, i32) {
    %c0_i32 = arith.constant 0 : i32
    %c0_i32_0 = arith.constant 0 : i32
    %c0_i32_1 = arith.constant 0 : i32
    return %c0_i32, %c0_i32_0 : i32, i32
  }
  func.func @transform_7(%arg0: i32) -> (i32, i32) {
    %c0_i32 = arith.constant 0 : i32
    %c0_i32_0 = arith.constant 0 : i32
    return %arg0, %c0_i32 : i32, i32
  }
}

</mosaic_0001>

<bundles_post_ra>
// kernel: pruned_ftt_forward.1
= control target key start
LH: loop header
LB: loop body
LE: loop exit
PB: predicated region body
PF: predicated region fallthrough
CT: control target
= control target key end

     0   :  { %vm39_vm0 = vcmask 261120   ;;  %v13999_v57 = vmov 0   ;;  %vm14001_vm1 = vmmov 0   ;;  %s14002_s27 = smov 96   ;;  %s14003_s28 = smov 88   ;;  %vm285_vm2 = vcmask 64512   ;;  %s16511_s0 = inlined_call_operand.vmem [shape: f32[8,8,32], index: 0, kind: input, shape index: {}]   ;;  %s16512_s1 = inlined_call_operand.vmem [shape: bf16[2,32,192], index: 1, kind: input, shape index: {}]   ;;  %s16513_s4 = inlined_call_operand.vmem [shape: f32[2,8,128], index: 4, kind: input, shape index: {}]   ;;  %s16514_s2 = inlined_call_operand.vmem [shape: bf16[2,32,128], index: 2, kind: input, shape index: {}]   ;;  %s16515_s3 = inlined_call_operand.vmem [shape: bf16[2,128,32], index: 3, kind: input, shape index: {}]   ;;  %s16516_s6 = inlined_call_operand.vmem [shape: f32[32,2], index: 6, kind: input, shape index: {}]   ;;  %s16517_s5 = inlined_call_operand.vmem [shape: f32[8,128], index: 5, kind: input, shape index: {}]   ;;  %s16518_s7 = inlined_call_operand.vmem [shape: f32[8,2], index: 7, kind: output, shape index: {}]  }
   0x1   :  { %v27_v0 = vld [vmem:[%s16511_s0] sm:$0xff]  ;;  %v29_v1 = vld [vmem:[%s16511_s0 + $0x10] sm:$0xff]  ;;  %v28_v2 = vld [vmem:[%s16511_s0 + $0x8] sm:$0xff]  ;;  %241 = vmatprep.mubr.bf16.mxu0 %v13999_v57  ;;  %271 = vmatprep.mubr.bf16.mxu1 %v13999_v57  ;;  %s14004_s29 = smov 120   ;;  %s14005_s30 = smov 32   ;;  %vm12061_vm5 = vcmask 1041409  }
   0x2   :  { %v40_v3 = vsel %vm39_vm0, %v27_v0, 0.0  ;;  %v46_v4 = vsel %vm39_vm0, %v29_v1, 0.0  ;;  %v30_v5 = vld [vmem:[%s16511_s0 + $0x18] sm:$0xff]  ;;  %v43_v6 = vsel %vm39_vm0, %v28_v2, 0.0  ;;  %v31_v8 = vld [vmem:[%s16511_s0 + $0x20] sm:$0xff]  ;;  %v32_v9 = vld [vmem:[%s16511_s0 + $0x28] sm:$0xff] }
   0x3   :  { %41 = vadd.xlane.f32.xlu0 %v40_v3  ;;  %47 = vadd.xlane.f32.xlu1 %v46_v4  ;;  %v49_v7 = vsel %vm39_vm0, %v30_v5, 0.0  ;;  %v52_v10 = vsel %vm39_vm0, %v31_v8, 0.0  ;;  %v55_v11 = vsel %vm39_vm0, %v32_v9, 0.0  ;;  %v33_v12 = vld [vmem:[%s16511_s0 + $0x30] sm:$0xff]  ;;  %v34_v13 = vld [vmem:[%s16511_s0 + $0x38] sm:$0xff]  ;;  %v35_v4 = vlaneseq  ;;  %s14006_s8 = smov 64  }
   0x4   :  { %v58_v14 = vsel %vm39_vm0, %v33_v12, 0.0  ;;  %v61_v15 = vsel %vm39_vm0, %v34_v13, 0.0  ;;  %v13603_v56 = vld [vmem:[%s16512_s1 + $0x14] ss:$8 sps:$4 sm:$0xff]   ;;  %v13605_v58 = vld [vmem:[%s16512_s1 + $0x10] ss:$8 sps:$4 sm:$0xff]  }
   0x5   :  { %221 = vmatprep.subr.bf16.mxu0 %v13603_v56  ;;  %v13606_v59 = vld [vmem:[%s16512_s1 + $0x4] ss:$8 sps:$4 sm:$0xff]   ;;  %v13608_v60 = vld [vmem:[%s16512_s1] ss:$8 sps:$4 sm:$0xff]   ;;  %13587 = vmatprep.subr.bf16.mxu1 %v13603_v56  ;;  %s14007_s9 = smov 80   ;;  %s14008_s10 = smov 112  }
   0x6   :  { %222 = vmatpush1.bf16.msra.mxu0 %v13605_v58  ;;  %13589 = vmatpush1.bf16.msra.mxu1 %v13605_v58  ;;  %s14009_s11 = smov 72   ;;  %s14010_s12 = smov 104   ;;  %vm12063_vm6 = vcmask 1042434   ;;  %vm12065_vm7 = vcmask 1043459   ;;  %vm12067_vm8 = vcmask 1044484   ;;  %vm12069_vm9 = vcmask 1045509  }
   0x7   :  { %44 = vadd.xlane.f32.xlu0 %v43_v6  ;;  %50 = vadd.xlane.f32.xlu1 %v49_v7  ;;  %vm12071_vm10 = vcmask 1046534   ;;  %vm12073_vm11 = vcmask 1047559   ;;  %vm12299_vm12 = vcmask 15360  }
   0x8   :  { %223 = vmatprep.subr.bf16.mxu0 %v13606_v59  ;;  %13588 = vmatprep.subr.bf16.mxu1 %v13606_v59 }
   0xa   :  { %224 = vmatpush1.bf16.msra.mxu0 %v13608_v60  ;;  %13590 = vmatpush1.bf16.msra.mxu1 %v13608_v60 }
   0xb   :  { %53 = vadd.xlane.f32.xlu0 %v52_v10  ;;  %56 = vadd.xlane.f32.xlu1 %v55_v11  ;;  %v14138_v10 = vshrl.u32 %v35_v4, 7 }
   0xd   :  { %16537 = vst [vmem:[#allocation2_spill] sm:$0xff] %v14138_v10 }
   0xf   :  { %59 = vadd.xlane.f32.xlu0 %v58_v14  ;;  %62 = vadd.xlane.f32.xlu1 %v61_v15 }
  0x8c   :  { %v42_v16 = vpop.xlane.xlu0 %41  ;;  %v48_v17 = vpop.xlane.xlu1 %47 }
  0x8d   :  { %v65_v18 = vmul.f32 0.03125, %v42_v16  ;;  %v67_v19 = vmul.f32 0.03125, %v48_v17  ;;  %v38_v17 = vld [vmem:[%s16513_s4] sm:$0xff] }
  0x8f   :  { %v14083_v20 = vsub.f32 %v27_v0, %v65_v18  ;;  %v14085_v21 = vsub.f32 %v29_v1, %v67_v19  ;;  %v14144_v18 = vsub.s32 0, %v14138_v10 }
  0x90   :  { %v45_v22 = vpop.xlane.xlu0 %44  ;;  %v51_v23 = vpop.xlane.xlu1 %50 }
  0x91   :  { %v66_v24 = vmul.f32 0.03125, %v45_v22  ;;  %v68_v25 = vmul.f32 0.03125, %v51_v23  ;;  %v81_v26 = vmul.f32 %v14083_v20, %v14083_v20  ;;  %v83_v27 = vmul.f32 %v14085_v21, %v14085_v21  ;;  %16538 = vst [vmem:[#allocation3_spill] sm:$0xff] %v14144_v18 }
  0x93   :  { %v14091_v28 = vsub.f32 %v28_v2, %v66_v24  ;;  %v14093_v29 = vsub.f32 %v30_v5, %v68_v25  ;;  %v89_v30 = vsel %vm39_vm0, %v81_v26, 0.0  ;;  %v95_v33 = vsel %vm39_vm0, %v83_v27, 0.0 }
  0x94   :  { %90 = vadd.xlane.f32.xlu0 %v89_v30  ;;  %v54_v31 = vpop.xlane.xlu0 %53  ;;  %v57_v32 = vpop.xlane.xlu1 %56  ;;  %v148_v27 = vrot.slane %v38_v17, %v14144_v18 }
  0x95   :  { %v69_v34 = vmul.f32 0.03125, %v54_v31  ;;  %v70_v35 = vmul.f32 0.03125, %v57_v32  ;;  %v82_v36 = vmul.f32 %v14091_v28, %v14091_v28  ;;  %v84_v37 = vmul.f32 %v14093_v29, %v14093_v29 }
  0x96   :  { %v14149_v32 = vsub.s32 1, %v14138_v10 }
  0x97   :  { %v14101_v38 = vsub.f32 %v31_v8, %v69_v34  ;;  %v14103_v39 = vsub.f32 %v32_v9, %v70_v35  ;;  %v92_v40 = vsel %vm39_vm0, %v82_v36, 0.0  ;;  %v98_v43 = vsel %vm39_vm0, %v84_v37, 0.0 }
  0x98   :  { %96 = vadd.xlane.f32.xlu0 %v95_v33  ;;  %93 = vadd.xlane.f32.xlu1 %v92_v40  ;;  %v60_v41 = vpop.xlane.xlu0 %59  ;;  %v63_v42 = vpop.xlane.xlu1 %62  ;;  %16539 = vst [vmem:[#allocation4_spill] sm:$0xff] %v14149_v32  ;;  %v160_v36 = vrot.slane %v38_v17, %v14149_v32 }
  0x99   :  { %v71_v44 = vmul.f32 0.03125, %v60_v41  ;;  %v72_v45 = vmul.f32 0.03125, %v63_v42  ;;  %v85_v46 = vmul.f32 %v14101_v38, %v14101_v38  ;;  %v86_v47 = vmul.f32 %v14103_v39, %v14103_v39 }
  0x9b   :  { %v14111_v48 = vsub.f32 %v33_v12, %v71_v44  ;;  %v14113_v49 = vsub.f32 %v34_v13, %v72_v45  ;;  %v101_v50 = vsel %vm39_vm0, %v85_v46, 0.0  ;;  %v104_v51 = vsel %vm39_vm0, %v86_v47, 0.0 }
  0x9c   :  { %99 = vadd.xlane.f32.xlu1 %v98_v43  ;;  %102 = vadd.xlane.f32.xlu0 %v101_v50 }
  0x9d   :  { %v87_v52 = vmul.f32 %v14111_v48, %v14111_v48  ;;  %v88_v53 = vmul.f32 %v14113_v49, %v14113_v49 }
  0x9f   :  { %v107_v54 = vsel %vm39_vm0, %v87_v52, 0.0  ;;  %v110_v55 = vsel %vm39_vm0, %v88_v53, 0.0 }
  0xa0   :  { %105 = vadd.xlane.f32.xlu1 %v104_v51  ;;  %108 = vadd.xlane.f32.xlu0 %v107_v54 }
  0xa4   :  { %111 = vadd.xlane.f32.xlu1 %v110_v55 }
 0x11d   :  { %v91_v61 = vpop.xlane.xlu0 %90 }
 0x11e   :  { %v113_v62 = vmul.f32 0.03125, %v91_v61 }
 0x120   :  { %v121_v63 = vadd.f32 1e-05, %v113_v62 }
 0x121   :  { %v94_v0 = vpop.xlane.xlu1 %93  ;;  %v97_v1 = vpop.xlane.xlu0 %96 }
 0x122   :  { %13635 = vrsqrt.f32 %v121_v63  ;;  %v114_v2 = vmul.f32 0.03125, %v94_v0  ;;  %v115_v3 = vmul.f32 0.03125, %v97_v1 }
 0x124   :  { %v122_v5 = vadd.f32 1e-05, %v114_v2  ;;  %v123_v6 = vadd.f32 1e-05, %v115_v3 }
 0x125   :  { %v100_v7 = vpop.xlane.xlu1 %99  ;;  %v103_v8 = vpop.xlane.xlu0 %102 }
 0x126   :  { %13637 = vrsqrt.f32 %v122_v5  ;;  %v116_v9 = vmul.f32 0.03125, %v100_v7  ;;  %v117_v12 = vmul.f32 0.03125, %v103_v8 }
 0x127   :  { %13639 = vrsqrt.f32 %v123_v6 }
 0x128   :  { %v124_v11 = vadd.f32 1e-05, %v116_v9  ;;  %v125_v19 = vadd.f32 1e-05, %v117_v12 }
 0x129   :  { %v106_v13 = vpop.xlane.xlu1 %105  ;;  %v109_v14 = vpop.xlane.xlu0 %108 }
 0x12a   :  { %13641 = vrsqrt.f32 %v124_v11  ;;  %v118_v15 = vmul.f32 0.03125, %v106_v13  ;;  %v119_v16 = vmul.f32 0.03125, %v109_v14 }
 0x12c   :  { %v126_v22 = vadd.f32 1e-05, %v118_v15  ;;  %v127_v23 = vadd.f32 1e-05, %v119_v16 }
 0x12d   :  { %v112_v24 = vpop.xlane.xlu1 %111 }
 0x12e   :  { %13643 = vrsqrt.f32 %v126_v22  ;;  %v120_v25 = vmul.f32 0.03125, %v112_v24 }
 0x12f   :  { %v13636_v26 = vpop.eup %13635  ;;  %13645 = vrsqrt.f32 %v127_v23 }
 0x130   :  { %13647 = vrsqrt.f32 %v125_v19  ;;  %v128_v30 = vadd.f32 1e-05, %v120_v25  ;;  %v137_v31 = vmul.f32 %v13636_v26, %v14083_v20 }
 0x132   :  { %13649 = vrsqrt.f32 %v128_v30  ;;  %v149_v35 = vmul.f32 %v148_v27, %v137_v31 }
 0x133   :  { %v13638_v33 = vpop.eup %13637 }
 0x134   :  { %v138_v34 = vmul.f32 %v13638_v33, %v14091_v28  ;;  %v13640_v37 = vpop.eup %13639  ;;  %v161_v42 = vadd.f32 %v160_v36, %v149_v35 }
 0x135   :  { %v139_v44 = vmul.f32 %v13640_v37, %v14085_v21 }
 0x136   :  { %v150_v40 = vmul.f32 %v148_v27, %v138_v34 }
 0x137   :  { %v13642_v41 = vpop.eup %13641  ;;  %v151_v51 = vmul.f32 %v148_v27, %v139_v44 }
 0x138   :  { %v162_v43 = vadd.f32 %v160_v36, %v150_v40  ;;  %v140_v45 = vmul.f32 %v13642_v41, %v14093_v29 }
 0x139   :  { %v163_v56 = vadd.f32 %v160_v36, %v151_v51 }
 0x13a   :  { %v169_v20 = vpack.c.bf16 %v162_v43, %v161_v42  ;;  %v152_v46 = vmul.f32 %v148_v27, %v140_v45 }
 0x13b   :  { %v13644_v47 = vpop.eup %13643 }
 0x13c   :  { %v13646_v50 = vpop.eup %13645  ;;  %12309 = vmatmul.mubr.msk.bf16.vlgmr.msra.gmra.mxu0 %vm39_vm0, %v169_v20  ;;  %v164_v53 = vadd.f32 %v160_v36, %v152_v46  ;;  %v142_v54 = vmul.f32 %v13644_v47, %v14103_v39 }
 0x13d   :  { %v13648_v28 = vpop.eup %13647  ;;  %251 = vmatprep.mubr.bf16.mxu0 %v13999_v57  ;;  %v143_v52 = vmul.f32 %v13646_v50, %v14111_v48 }
 0x13e   :  { %v141_v58 = vmul.f32 %v13648_v28, %v14101_v38  ;;  %v170_v59 = vpack.c.bf16 %v164_v53, %v163_v56  ;;  %v154_v61 = vmul.f32 %v148_v27, %v142_v54 }
 0x13f   :  { %v13650_v55 = vpop.eup %13649  ;;  %v155_v29 = vmul.f32 %v148_v27, %v143_v52  ;;  %v14354_v52 = vand.u32 127, %v35_v4 }
 0x140   :  { %v144_v21 = vmul.f32 %v13650_v55, %v14113_v49  ;;  %v153_v0 = vmul.f32 %v148_v27, %v141_v58  ;;  %v166_v1 = vadd.f32 %v160_v36, %v154_v61  ;;  %v16522_v49 = vmov 0.0  }
 0x141   :  { %v167_v62 = vadd.f32 %v160_v36, %v155_v29  ;;  %12864 = vmatprep.subr.mxu1 %v16522_v49  ;;  %12909 = vmatprep.subr.mxu0 %v16522_v49  ;;  %vm37_vm3 = vcmp.lt.s32.totalorder %v14354_v52, 7 }
 0x142   :  { %v156_v60 = vmul.f32 %v148_v27, %v144_v21  ;;  %v165_v39 = vadd.f32 %v160_v36, %v153_v0 }
 0x144   :  { %12310 = vmatmul.mubr.msk.bf16.gmra.mxu0 %vm39_vm0, %v170_v59  ;;  %v168_v63 = vadd.f32 %v160_v36, %v156_v60  ;;  %v171_v2 = vpack.c.bf16 %v166_v1, %v165_v39 }
 0x145   :  { %261 = vmatprep.mubr.bf16.mxu0 %v13999_v57 }
 0x146   :  { %v172_v48 = vpack.c.bf16 %v168_v63, %v167_v62 }
 0x148   :  { %12312 = vmatmul.mubr.msk.bf16.vlgmr.msra.gmra.mxu1 %vm39_vm0, %v172_v48 }
 0x149   :  { %12866 = vmatprep.mubr.msk.f32.mxu1 %vm14001_vm1, %v16522_v49 }
 0x14c   :  { %12311 = vmatmul.mubr.msk.bf16.gmra.mxu0 %vm39_vm0, %v171_v2 }
 0x14d   :  { %12911 = vmatprep.mubr.msk.f32.mxu0 %vm14001_vm1, %v16522_v49 }
 0x1fc   :  { %v14171_v38 = vpop.f32.mrf.mxu0 }
 0x1fd   :  { %283 = vrot.lane.b32.xlu0 %v14171_v38, %s14002_s27 }
 0x1fe   :  { %v14175_v3 = vpop.f32.mrf.mxu0 }
 0x200   :  { %v14177_v5 = vpop.f32.mrf.mxu0 }
 0x201   :  { %361 = vrot.lane.b32.xlu1 %v14177_v5, %s14002_s27 }
 0x202   :  { %v14181_v6 = vpop.f32.mrf.mxu0 }
 0x204   :  { %v14183_v7 = vpop.f32.mrf.mxu0 }
 0x206   :  { %v14185_v8 = vpop.f32.mrf.mxu0 }
 0x208   :  { %v14187_v9 = vpop.f32.mrf.mxu0  ;;  %v14189_v11 = vpop.f32.mrf.mxu1 }
 0x209   :  { %746 = vrot.lane.b32.xlu0 %v14189_v11, %s14002_s27 }
 0x20a   :  { %v14193_v12 = vpop.f32.mrf.mxu0  ;;  %v14195_v13 = vpop.f32.mrf.mxu1 }
 0x20c   :  { %v14197_v14 = vpop.f32.mrf.mxu0  ;;  %v14199_v15 = vpop.f32.mrf.mxu1 }
 0x20d   :  { %592 = vrot.lane.b32.xlu0 %v14197_v14, %s14002_s27  ;;  %823 = vrot.lane.b32.xlu1 %v14199_v15, %s14002_s27 }
 0x20e   :  { %v14213_v16 = vpop.f32.mrf.mxu0  ;;  %v14357_v53 = vpop.f32.mrf.mxu1 }
 0x210   :  { %v14219_v17 = vpop.f32.mrf.mxu0 }
 0x211   :  { %999 = vrot.lane.b32.xlu0 %v14171_v38, %s14003_s28  ;;  %438 = vrot.lane.b32.xlu1 %v14183_v7, %s14002_s27 }
 0x212   :  { %v14371_v1 = vpop.f32.mrf.mxu0 }
 0x215   :  { %997 = vrot.lane.b32.xlu0 %v14171_v38, %s14004_s29  ;;  %515 = vrot.lane.b32.xlu1 %v14187_v9, %s14002_s27 }
 0x219   :  { %1155 = vrot.lane.b32.xlu0 %v14183_v7, %s14003_s28  ;;  %1077 = vrot.lane.b32.xlu1 %v14177_v5, %s14003_s28 }
 0x21d   :  { %1153 = vrot.lane.b32.xlu0 %v14183_v7, %s14004_s29  ;;  %669 = vrot.lane.b32.xlu1 %v14219_v17, %s14002_s27 }
 0x221   :  { %1311 = vrot.lane.b32.xlu0 %v14197_v14, %s14003_s28  ;;  %1075 = vrot.lane.b32.xlu1 %v14177_v5, %s14004_s29 }
 0x225   :  { %1309 = vrot.lane.b32.xlu0 %v14197_v14, %s14004_s29  ;;  %1233 = vrot.lane.b32.xlu1 %v14187_v9, %s14003_s28 }
 0x229   :  { %1467 = vrot.lane.b32.xlu0 %v14189_v11, %s14003_s28  ;;  %1231 = vrot.lane.b32.xlu1 %v14187_v9, %s14004_s29 }
 0x22d   :  { %1465 = vrot.lane.b32.xlu0 %v14189_v11, %s14004_s29  ;;  %1545 = vrot.lane.b32.xlu1 %v14199_v15, %s14003_s28 }
 0x231   :  { %1717 = vrot.lane.b32.xlu0 %v14171_v38, %s14005_s30  ;;  %1389 = vrot.lane.b32.xlu1 %v14219_v17, %s14003_s28 }
 0x235   :  { %1869 = vrot.lane.b32.xlu0 %v14183_v7, %s14005_s30  ;;  %1387 = vrot.lane.b32.xlu1 %v14219_v17, %s14004_s29 }
 0x239   :  { %2173 = vrot.lane.b32.xlu0 %v14189_v11, %s14005_s30  ;;  %1543 = vrot.lane.b32.xlu1 %v14199_v15, %s14004_s29 }
 0x23d   :  { %1793 = vrot.lane.b32.xlu1 %v14177_v5, %s14005_s30 }
 0x241   :  { %1945 = vrot.lane.b32.xlu1 %v14187_v9, %s14005_s30 }
 0x245   :  { %2021 = vrot.lane.b32.xlu1 %v14197_v14, %s14005_s30 }
 0x249   :  { %2249 = vrot.lane.b32.xlu1 %v14199_v15, %s14005_s30 }
 0x24d   :  { %2097 = vrot.lane.b32.xlu1 %v14219_v17, %s14005_s30 }
 0x26f   :  { %v284_v19 = vpop.permute.xlu0 %283 }
 0x270   :  { %12865 = vmatpush3.xpose.msk.msra.mxu1 %vm285_vm2, %v284_v19 }
 0x271   :  { %12869 = vmatprep.subr.mxu1 %v16522_v49 }
 0x273   :  { %v362_v22 = vpop.permute.xlu1 %361  ;;  %12867 = vmatmul.mubr.msk.f32.vlgmr.msra.gmra.mxu1 %vm285_vm2, %v14171_v38 }
 0x274   :  { %12870 = vmatpush3.xpose.msk.msra.mxu1 %vm285_vm2, %v362_v22  ;;  %12871 = vmatprep.mubr.msk.f32.mxu1 %vm14001_vm1, %v16522_v49 }
 0x275   :  { %12874 = vmatprep.subr.mxu1 %v16522_v49 }
 0x277   :  { %12872 = vmatmul.mubr.msk.f32.vlgmr.msra.gmra.mxu1 %vm285_vm2, %v14177_v5 }
 0x278   :  { %12876 = vmatprep.mubr.msk.f32.mxu1 %vm14001_vm1, %v16522_v49 }
 0x27b   :  { %v747_v23 = vpop.permute.xlu0 %746 }
 0x27f   :  { %v824_v24 = vpop.permute.xlu1 %823  ;;  %v593_v25 = vpop.permute.xlu0 %592 }
 0x283   :  { %v439_v26 = vpop.permute.xlu1 %438  ;;  %v1000_v27 = vpop.permute.xlu0 %999 }
 0x284   :  { %12875 = vmatpush3.xpose.msk.msra.mxu1 %vm285_vm2, %v439_v26 }
 0x285   :  { %12879 = vmatprep.subr.mxu1 %v16522_v49 }
 0x287   :  { %v516_v30 = vpop.permute.xlu1 %515  ;;  %12877 = vmatmul.mubr.msk.f32.vlgmr.msra.gmra.mxu1 %vm285_vm2, %v14183_v7  ;;  %v998_v31 = vpop.permute.xlu0 %997 }
 0x288   :  { %12880 = vmatpush3.xpose.msk.msra.mxu1 %vm285_vm2, %v516_v30  ;;  %12881 = vmatprep.mubr.msk.f32.mxu1 %vm14001_vm1, %v16522_v49 }
 0x289   :  { %12884 = vmatprep.subr.mxu1 %v16522_v49 }
 0x28b   :  { %v1078_v33 = vpop.permute.xlu1 %1077  ;;  %12882 = vmatmul.mubr.msk.f32.vlgmr.msra.gmra.mxu1 %vm285_vm2, %v14187_v9  ;;  %v1156_v34 = vpop.permute.xlu0 %1155 }
 0x28c   :  { %12885 = vmatpush3.xpose.msk.msra.mxu1 %vm285_vm2, %v593_v25  ;;  %12910 = vmatpush3.xpose.msk.msra.mxu0 %vm285_vm2, %v1078_v33 }
 0x28d   :  { %12886 = vmatprep.mubr.msk.f32.mxu1 %vm14001_vm1, %v16522_v49  ;;  %12889 = vmatprep.subr.mxu1 %v16522_v49 }
 0x28e   :  { %12919 = vmatprep.subr.mxu0 %v16522_v49 }
 0x28f   :  { %v670_v35 = vpop.permute.xlu1 %669  ;;  %12887 = vmatmul.mubr.msk.f32.vlgmr.msra.gmra.mxu1 %vm285_vm2, %v14197_v14  ;;  %v1154_v36 = vpop.permute.xlu0 %1153 }
 0x290   :  { %12890 = vmatpush3.xpose.msk.msra.mxu1 %vm285_vm2, %v670_v35  ;;  %12891 = vmatprep.mubr.msk.f32.mxu1 %vm14001_vm1, %v16522_v49 }
 0x291   :  { %12894 = vmatprep.subr.mxu1 %v16522_v49 }
 0x293   :  { %v1076_v37 = vpop.permute.xlu1 %1075  ;;  %12892 = vmatmul.mubr.msk.f32.vlgmr.msra.gmra.mxu1 %vm285_vm2, %v14219_v17  ;;  %v1312_v40 = vpop.permute.xlu0 %1311 }
 0x294   :  { %12895 = vmatpush3.xpose.msk.msra.mxu1 %vm285_vm2, %v747_v23  ;;  %12912 = vmatmul.mubr.msk.f32.vlgmr.msra.gmra.mxu0 %vm285_vm2, %v1076_v37 }
 0x295   :  { %12896 = vmatprep.mubr.msk.f32.mxu1 %vm14001_vm1, %v16522_v49  ;;  %12899 = vmatprep.subr.mxu1 %v16522_v49 }
 0x296   :  { %12921 = vmatprep.mubr.msk.f32.mxu0 %vm14001_vm1, %v16522_v49 }
 0x297   :  { %v1234_v41 = vpop.permute.xlu1 %1233  ;;  %12897 = vmatmul.mubr.msk.f32.vlgmr.msra.gmra.mxu1 %vm285_vm2, %v14189_v11  ;;  %v1310_v42 = vpop.permute.xlu0 %1309 }
 0x298   :  { %12900 = vmatpush3.xpose.msk.msra.mxu1 %vm285_vm2, %v824_v24  ;;  %12920 = vmatpush3.xpose.msk.msra.mxu0 %vm285_vm2, %v1234_v41 }
 0x299   :  { %12901 = vmatprep.mubr.msk.f32.mxu1 %vm14001_vm1, %v16522_v49  ;;  %12904 = vmatprep.subr.mxu1 %v16522_v49 }
 0x29a   :  { %12929 = vmatprep.subr.mxu0 %v16522_v49 }
 0x29b   :  { %v1232_v43 = vpop.permute.xlu1 %1231  ;;  %12902 = vmatmul.mubr.msk.f32.vlgmr.msra.gmra.mxu1 %vm285_vm2, %v14199_v15  ;;  %v1468_v44 = vpop.permute.xlu0 %1467 }
 0x29c   :  { %12905 = vmatpush3.xpose.msk.msra.mxu1 %vm285_vm2, %v1000_v27  ;;  %12922 = vmatmul.mubr.msk.f32.vlgmr.msra.gmra.mxu0 %vm285_vm2, %v1232_v43 }
 0x29d   :  { %12906 = vmatprep.mubr.msk.f32.mxu1 %vm14001_vm1, %v16522_v49  ;;  %12914 = vmatprep.subr.mxu1 %v16522_v49 }
 0x29e   :  { %12931 = vmatprep.mubr.msk.f32.mxu0 %vm14001_vm1, %v16522_v49 }
 0x29f   :  { %v1546_v45 = vpop.permute.xlu1 %1545  ;;  %12907 = vmatmul.mubr.msk.f32.vlgmr.msra.gmra.mxu1 %vm285_vm2, %v998_v31  ;;  %v1466_v46 = vpop.permute.xlu0 %1465 }
 0x2a0   :  { %12915 = vmatpush3.xpose.msk.msra.mxu1 %vm285_vm2, %v1156_v34  ;;  %12916 = vmatprep.mubr.msk.f32.mxu1 %vm14001_vm1, %v16522_v49 }
 0x2a1   :  { %12924 = vmatprep.subr.mxu1 %v16522_v49 }
 0x2a3   :  { %v1390_v20 = vpop.permute.xlu1 %1389  ;;  %12917 = vmatmul.mubr.msk.f32.vlgmr.msra.gmra.mxu1 %vm285_vm2, %v1154_v36  ;;  %v1718_v50 = vpop.permute.xlu0 %1717 }
 0x2a4   :  { %12925 = vmatpush3.xpose.msk.msra.mxu1 %vm285_vm2, %v1312_v40  ;;  %12930 = vmatpush3.xpose.msk.msra.mxu0 %vm285_vm2, %v1390_v20 }
 0x2a5   :  { %12926 = vmatprep.mubr.msk.f32.mxu1 %vm14001_vm1, %v16522_v49  ;;  %12939 = vmatprep.subr.mxu0 %v16522_v49 }
 0x2a6   :  { %12934 = vmatprep.subr.mxu1 %v16522_v49 }
 0x2a7   :  { %v1388_v47 = vpop.permute.xlu1 %1387  ;;  %12927 = vmatmul.mubr.msk.f32.vlgmr.msra.gmra.mxu1 %vm285_vm2, %v1310_v42 }
 0x2a8   :  { %12932 = vmatmul.mubr.msk.f32.vlgmr.msra.gmra.mxu0 %vm285_vm2, %v1388_v47  ;;  %12935 = vmatpush3.xpose.msk.msra.mxu1 %vm285_vm2, %v1468_v44 }
 0x2a9   :  { %12940 = vmatpush3.xpose.msk.msra.mxu0 %vm285_vm2, %v1546_v45  ;;  %12936 = vmatprep.mubr.msk.f32.mxu1 %vm14001_vm1, %v16522_v49 }
 0x2aa   :  { %12941 = vmatprep.mubr.msk.f32.mxu0 %vm14001_vm1, %v16522_v49  ;;  %12944 = vmatprep.subr.mxu1 %v16522_v49 }
 0x2ab   :  { %v1544_v51 = vpop.permute.xlu1 %1543  ;;  %12937 = vmatmul.mubr.msk.f32.vlgmr.msra.gmra.mxu1 %vm285_vm2, %v1466_v46  ;;  %12949 = vmatprep.subr.mxu0 %v16522_v49 }
 0x2ac   :  { %12942 = vmatmul.mubr.msk.f32.vlgmr.msra.gmra.mxu0 %vm285_vm2, %v1544_v51  ;;  %12945 = vmatpush3.msra.mxu1 %v1718_v50 }
 0x2ad   :  { %12951 = vmatprep.mubr.msk.f32.mxu0 %vm14001_vm1, %v16522_v49  ;;  %12946 = vmatprep.mubr.msk.f32.mxu1 %vm14001_vm1, %v16522_v49 }
 0x2ae   :  { %12954 = vmatprep.subr.mxu1 %v16522_v49 }
 0x2af   :  { %v1794_v28 = vpop.permute.xlu1 %1793 }
 0x2b0   :  { %12950 = vmatpush3.msra.mxu0 %v1794_v28 }
 0x2b1   :  { %12959 = vmatprep.subr.mxu0 %v16522_v49 }
 0x333   :  { %v356_v54 = vpop.f32.mrf.mxu1 }
 0x334   :  { %v14361_v55 = vsel %vm37_vm3, %v356_v54, -1e+30 }
 0x335   :  { %v12868_v56 = vpop.f32.mrf.mxu1  ;;  %v909_v21 = vsel %vm285_vm2, %v14361_v55, -inf }
 0x336   :  { %910 = vmax.xlane.f32.xlu0 %v909_v21 }
 0x337   :  { %v433_v29 = vpop.f32.mrf.mxu1 }
 0x338   :  { %v14381_v25 = vsel %vm37_vm3, %v433_v29, -1e+30 }
 0x339   :  { %v12873_v58 = vpop.f32.mrf.mxu1  ;;  %v912_v30 = vsel %vm285_vm2, %v14381_v25, -inf }
 0x347   :  { %v510_v59 = vpop.f32.mrf.mxu1 }
 0x348   :  { %v14367_v4 = vsel %vm37_vm3, %v510_v59, -1e+30 }
 0x349   :  { %v12878_v60 = vpop.f32.mrf.mxu1  ;;  %v915_v61 = vsel %vm285_vm2, %v14367_v4, -inf }
 0x34a   :  { %916 = vmax.xlane.f32.xlu0 %v915_v61 }
 0x34b   :  { %v587_v62 = vpop.f32.mrf.mxu1 }
 0x34c   :  { %v14387_v31 = vsel %vm37_vm3, %v587_v62, -1e+30 }
 0x34d   :  { %v12883_v63 = vpop.f32.mrf.mxu1  ;;  %v918_v41 = vsel %vm285_vm2, %v14387_v31, -inf }
 0x34f   :  { %v664_v0 = vpop.f32.mrf.mxu1 }
 0x350   :  { %v14399_v42 = vsel %vm37_vm3, %v664_v0, -1e+30 }
 0x351   :  { %v12888_v48 = vpop.f32.mrf.mxu1  ;;  %v921_v45 = vsel %vm285_vm2, %v14399_v42, -inf }
 0x353   :  { %v741_v39 = vpop.f32.mrf.mxu1 }
 0x354   :  { %v1149_v2 = vpop.f32.mrf.mxu0  ;;  %v14423_v60 = vsel %vm37_vm3, %v741_v39, -1e+30 }
 0x355   :  { %v14375_v19 = vsel %vm37_vm3, %v1149_v2, -1e+30  ;;  %v12893_v22 = vpop.f32.mrf.mxu1  ;;  %v924_v2 = vsel %vm285_vm2, %v14423_v60, -inf }
 0x356   :  { %v12913_v23 = vpop.f32.mrf.mxu0  ;;  %v1632_v24 = vsel %vm285_vm2, %v14375_v19, -inf }
 0x357   :  { %1633 = vmax.xlane.f32.xlu1 %v1632_v24  ;;  %v818_v26 = vpop.f32.mrf.mxu1 }
 0x358   :  { %v14405_v20 = vsel %vm37_vm3, %v818_v26, -1e+30 }
 0x359   :  { %v12898_v27 = vpop.f32.mrf.mxu1  ;;  %v927_v50 = vsel %vm285_vm2, %v14405_v20, -inf }
 0x35b   :  { %913 = vmax.xlane.f32.xlu1 %v912_v30  ;;  %v895_v33 = vpop.f32.mrf.mxu1 }
 0x35c   :  { %v1305_v34 = vpop.f32.mrf.mxu0  ;;  %v14447_v27 = vsel %vm37_vm3, %v895_v33, -1e+30  ;;  %v14469_v33 = vpop.permute.xlu0 %1869 }
 0x35d   :  { %v14391_v35 = vsel %vm37_vm3, %v1305_v34, -1e+30  ;;  %v12903_v36 = vpop.f32.mrf.mxu1  ;;  %v930_v34 = vsel %vm285_vm2, %v14447_v27, -inf }
 0x35e   :  { %v12923_v37 = vpop.f32.mrf.mxu0  ;;  %v1638_v40 = vsel %vm285_vm2, %v14391_v35, -inf }
 0x35f   :  { %1639 = vmax.xlane.f32.xlu0 %v1638_v40  ;;  %919 = vmax.xlane.f32.xlu1 %v918_v41  ;;  %v1071_v43 = vpop.f32.mrf.mxu1 }
 0x360   :  { %v14411_v51 = vsel %vm37_vm3, %v1071_v43, -1e+30  ;;  %v14471_v37 = vpop.permute.xlu0 %2173 }
 0x361   :  { %v12908_v44 = vpop.f32.mrf.mxu1  ;;  %v1629_v59 = vsel %vm285_vm2, %v14411_v51, -inf }
 0x362   :  { %v14474_v44 = vpop.permute.xlu1 %1945 }
 0x363   :  { %922 = vmax.xlane.f32.xlu0 %v921_v45  ;;  %v1227_v46 = vpop.f32.mrf.mxu1 }
 0x364   :  { %v14427_v61 = vsel %vm37_vm3, %v1227_v46, -1e+30 }
 0x365   :  { %v12918_v47 = vpop.f32.mrf.mxu1  ;;  %v1635_v22 = vsel %vm285_vm2, %v14427_v61, -inf }
 0x366   :  { %v14476_v45 = vpop.permute.xlu1 %2021 }
 0x367   :  { %928 = vmax.xlane.f32.xlu0 %v927_v50  ;;  %v1383_v28 = vpop.f32.mrf.mxu1 }
 0x368   :  { %v1461_v54 = vpop.f32.mrf.mxu0  ;;  %v14435_v39 = vsel %vm37_vm3, %v1383_v28, -1e+30 }
 0x369   :  { %v14415_v56 = vsel %vm37_vm3, %v1461_v54, -1e+30  ;;  %v12928_v21 = vpop.f32.mrf.mxu1  ;;  %v1641_v26 = vsel %vm285_vm2, %v14435_v39, -inf }
 0x36a   :  { %v12933_v29 = vpop.f32.mrf.mxu0  ;;  %v1644_v58 = vsel %vm285_vm2, %v14415_v56, -inf  ;;  %v14483_v54 = vpop.permute.xlu1 %2249 }
 0x36b   :  { %1645 = vmax.xlane.f32.xlu1 %v1644_v58  ;;  %1630 = vmax.xlane.f32.xlu0 %v1629_v59  ;;  %v1539_v62 = vpop.f32.mrf.mxu1 }
 0x36c   :  { %v1617_v63 = vpop.f32.mrf.mxu0  ;;  %v14451_v30 = vsel %vm37_vm3, %v1539_v62, -1e+30 }
 0x36d   :  { %v12938_v0 = vpop.f32.mrf.mxu1  ;;  %v14439_v23 = vsel %vm37_vm3, %v1617_v63, -1e+30  ;;  %v1647_v36 = vsel %vm285_vm2, %v14451_v30, -inf }
 0x36e   :  { %v12943_v48 = vpop.f32.mrf.mxu0  ;;  %v1650_v24 = vsel %vm285_vm2, %v14439_v23, -inf }
 0x36f   :  { %925 = vmax.xlane.f32.xlu1 %v924_v2  ;;  %1636 = vmax.xlane.f32.xlu0 %v1635_v22 }
 0x373   :  { %1651 = vmax.xlane.f32.xlu1 %v1650_v24  ;;  %1642 = vmax.xlane.f32.xlu0 %v1641_v26 }
 0x377   :  { %931 = vmax.xlane.f32.xlu1 %v930_v34  ;;  %1648 = vmax.xlane.f32.xlu0 %v1647_v36 }
 0x388   :  { %2401 = vrot.lane.b32.xlu1 %v14177_v5, %s14006_s8 }
 0x38c   :  { %2553 = vrot.lane.b32.xlu1 %v14187_v9, %s14006_s8 }
 0x38d   :  { %2325 = vrot.lane.b32.xlu0 %v14171_v38, %s14006_s8 }
 0x390   :  { %2705 = vrot.lane.b32.xlu1 %v14219_v17, %s14006_s8 }
 0x391   :  { %2477 = vrot.lane.b32.xlu0 %v14183_v7, %s14006_s8 }
 0x395   :  { %2629 = vrot.lane.b32.xlu0 %v14197_v14, %s14006_s8 }
 0x3bf   :  { %v911_v40 = vpop.xlane.xlu0 %910 }
 0x3c0   :  { %v933_v41 = vsub.f32 %v14361_v55, %v911_v40  ;;  %v14485_v55 = vpop.permute.xlu1 %2097 }
 0x3c2   :  { %v941_v43 = vmul.f32 1.442695, %v933_v41 }
 0x3c4   :  { %13651 = vpow2.f32 %v941_v43 }
 0x3d1   :  { %v14478_v46 = vpop.eup %13651 }
 0x3d2   :  { %v957_v47 = vsel %vm285_vm2, %v14478_v46, 0.0 }
 0x3d3   :  { %958 = vadd.xlane.f32.xlu0 %v957_v47  ;;  %v917_v50 = vpop.xlane.xlu0 %916 }
 0x3d4   :  { %v935_v28 = vsub.f32 %v14367_v4, %v917_v50 }
 0x3d6   :  { %v945_v21 = vmul.f32 1.442695, %v935_v28 }
 0x3d8   :  { %13653 = vpow2.f32 %v945_v21 }
 0x3e0   :  { %v1634_v29 = vpop.xlane.xlu1 %1633 }
 0x3e1   :  { %v1654_v58 = vsub.f32 %v14375_v19, %v1634_v29 }
 0x3e3   :  { %v1663_v59 = vmul.f32 1.442695, %v1654_v58 }
 0x3e4   :  { %v914_v62 = vpop.xlane.xlu1 %913 }
 0x3e5   :  { %v14488_v63 = vpop.eup %13653  ;;  %13655 = vpow2.f32 %v1663_v59  ;;  %v934_v0 = vsub.f32 %v14381_v25, %v914_v62 }
 0x3e6   :  { %v963_v48 = vsel %vm285_vm2, %v14488_v63, 0.0 }
 0x3e7   :  { %v943_v4 = vmul.f32 1.442695, %v934_v0  ;;  %964 = vadd.xlane.f32.xlu0 %v963_v48 }
 0x3e8   :  { %v920_v2 = vpop.xlane.xlu1 %919  ;;  %v1640_v22 = vpop.xlane.xlu0 %1639 }
 0x3e9   :  { %13657 = vpow2.f32 %v943_v4  ;;  %v936_v24 = vsub.f32 %v14387_v31, %v920_v2  ;;  %v1656_v26 = vsub.f32 %v14391_v35, %v1640_v22 }
 0x3eb   :  { %v1667_v19 = vmul.f32 1.442695, %v1656_v26  ;;  %v947_v34 = vmul.f32 1.442695, %v936_v24 }
 0x3ec   :  { %v923_v36 = vpop.xlane.xlu0 %922 }
 0x3ed   :  { %v937_v40 = vsub.f32 %v14399_v42, %v923_v36  ;;  %13659 = vpow2.f32 %v1667_v19 }
 0x3ee   :  { %13661 = vpow2.f32 %v947_v34 }
 0x3ef   :  { %v949_v41 = vmul.f32 1.442695, %v937_v40 }
 0x3f0   :  { %v929_v25 = vpop.xlane.xlu0 %928 }
 0x3f1   :  { %13663 = vpow2.f32 %v949_v41  ;;  %v939_v62 = vsub.f32 %v14405_v20, %v929_v25 }
 0x3f2   :  { %v14496_v43 = vpop.eup %13655 }
 0x3f3   :  { %v1680_v47 = vsel %vm285_vm2, %v14496_v43, 0.0  ;;  %v953_v26 = vmul.f32 1.442695, %v939_v62 }
 0x3f4   :  { %v1646_v50 = vpop.xlane.xlu1 %1645  ;;  %1681 = vadd.xlane.f32.xlu1 %v1680_v47  ;;  %v1631_v28 = vpop.xlane.xlu0 %1630 }
 0x3f5   :  { %v1658_v31 = vsub.f32 %v14415_v56, %v1646_v50 }
 0x3f6   :  { %v14501_v35 = vpop.eup %13657 }
 0x3f7   :  { %v1671_v21 = vmul.f32 1.442695, %v1658_v31  ;;  %v960_v42 = vsel %vm285_vm2, %v14501_v35, 0.0 }
 0x3f8   :  { %v926_v29 = vpop.xlane.xlu1 %925  ;;  %961 = vadd.xlane.f32.xlu1 %v960_v42  ;;  %v1637_v48 = vpop.xlane.xlu0 %1636 }
 0x3f9   :  { %13665 = vpow2.f32 %v1671_v21  ;;  %v938_v58 = vsub.f32 %v14423_v60, %v926_v29  ;;  %v1653_v60 = vsub.f32 %v14411_v51, %v1631_v28  ;;  %v1655_v25 = vsub.f32 %v14427_v61, %v1637_v48 }
 0x3fa   :  { %v14506_v59 = vpop.eup %13659 }
 0x3fb   :  { %v951_v0 = vmul.f32 1.442695, %v938_v58  ;;  %v1686_v56 = vsel %vm285_vm2, %v14506_v59, 0.0  ;;  %v14511_v2 = vpop.eup %13661  ;;  %v1661_v41 = vmul.f32 1.442695, %v1653_v60 }
 0x3fc   :  { %v1652_v4 = vpop.xlane.xlu1 %1651  ;;  %1687 = vadd.xlane.f32.xlu1 %v1686_v56  ;;  %v966_v36 = vsel %vm285_vm2, %v14511_v2, 0.0  ;;  %v1665_v50 = vmul.f32 1.442695, %v1655_v25 }
 0x3fd   :  { %13667 = vpow2.f32 %v951_v0  ;;  %v1660_v22 = vsub.f32 %v14439_v23, %v1652_v4  ;;  %v1643_v23 = vpop.xlane.xlu0 %1642 }
 0x3fe   :  { %v14514_v24 = vpop.eup %13663  ;;  %v1657_v31 = vsub.f32 %v14435_v39, %v1643_v23 }
 0x3ff   :  { %v1675_v19 = vmul.f32 1.442695, %v1660_v22  ;;  %v969_v20 = vsel %vm285_vm2, %v14514_v24, 0.0 }
 0x400   :  { %v932_v34 = vpop.xlane.xlu1 %931  ;;  %970 = vadd.xlane.f32.xlu0 %v969_v20  ;;  %967 = vadd.xlane.f32.xlu1 %v966_v36  ;;  %v1669_v42 = vmul.f32 1.442695, %v1657_v31 }
 0x401   :  { %13669 = vpow2.f32 %v1675_v19  ;;  %v940_v40 = vsub.f32 %v14447_v27, %v932_v34  ;;  %v1649_v21 = vpop.xlane.xlu0 %1648 }
 0x402   :  { %13671 = vpow2.f32 %v953_v26  ;;  %v1659_v29 = vsub.f32 %v14451_v30, %v1649_v21 }
 0x403   :  { %v955_v47 = vmul.f32 1.442695, %v940_v40 }
 0x404   :  { %v1673_v62 = vmul.f32 1.442695, %v1659_v29  ;;  %v2402_v40 = vpop.permute.xlu1 %2401 }
 0x405   :  { %13673 = vpow2.f32 %v955_v47  ;;  %v14601_v47 = vpop.permute.xlu0 %2325 }
 0x406   :  { %v14523_v51 = vpop.eup %13665  ;;  %13675 = vpow2.f32 %v1661_v41 }
 0x407   :  { %v1692_v28 = vsel %vm285_vm2, %v14523_v51, 0.0  ;;  %13677 = vpow2.f32 %v1665_v50 }
 0x408   :  { %1693 = vadd.xlane.f32.xlu1 %v1692_v28  ;;  %13679 = vpow2.f32 %v1669_v42  ;;  %v14597_v23 = vpop.permute.xlu1 %2553 }
 0x409   :  { %13681 = vpow2.f32 %v1673_v62  ;;  %v14603_v28 = vpop.permute.xlu0 %2477 }
 0x40a   :  { %v14528_v27 = vpop.eup %13667 }
 0x40b   :  { %v972_v61 = vsel %vm285_vm2, %v14528_v27, 0.0 }
 0x40c   :  { %973 = vadd.xlane.f32.xlu1 %v972_v61  ;;  %v14599_v41 = vpop.permute.xlu1 %2705 }
 0x40d   :  { %v14606_v29 = vpop.permute.xlu0 %2629 }
 0x40e   :  { %v14533_v58 = vpop.eup %13669 }
 0x40f   :  { %v1698_v39 = vsel %vm285_vm2, %v14533_v58, 0.0  ;;  %v14537_v0 = vpop.eup %13671 }
 0x410   :  { %1699 = vadd.xlane.f32.xlu1 %v1698_v39  ;;  %v975_v4 = vsel %vm285_vm2, %v14537_v0, 0.0 }
 0x412   :  { %v14539_v48 = vpop.eup %13673 }
 0x413   :  { %v978_v30 = vsel %vm285_vm2, %v14539_v48, 0.0  ;;  %v14545_v56 = vpop.eup %13675 }
 0x414   :  { %979 = vadd.xlane.f32.xlu0 %v978_v30  ;;  %976 = vadd.xlane.f32.xlu1 %v975_v4  ;;  %v1677_v22 = vsel %vm285_vm2, %v14545_v56, 0.0  ;;  %v14549_v26 = vpop.eup %13677 }
 0x415   :  { %v1683_v60 = vsel %vm285_vm2, %v14549_v26, 0.0  ;;  %v14553_v19 = vpop.eup %13679 }
 0x416   :  { %v1689_v20 = vsel %vm285_vm2, %v14553_v19, 0.0  ;;  %v14557_v34 = vpop.eup %13681 }
 0x417   :  { %v1695_v36 = vsel %vm285_vm2, %v14557_v34, 0.0 }
 0x418   :  { %1678 = vadd.xlane.f32.xlu0 %v1677_v22 }
 0x41c   :  { %1684 = vadd.xlane.f32.xlu0 %v1683_v60 }
 0x420   :  { %1690 = vadd.xlane.f32.xlu0 %v1689_v20 }
 0x424   :  { %1696 = vadd.xlane.f32.xlu0 %v1695_v36 }
 0x425   :  { %2857 = vrot.lane.b32.xlu1 %v14199_v15, %s14006_s8 }
 0x429   :  { %3013 = vrot.lane.b32.xlu1 %v14177_v5, %s14007_s9 }
 0x42d   :  { %3011 = vrot.lane.b32.xlu1 %v14177_v5, %s14008_s10 }
 0x431   :  { %3169 = vrot.lane.b32.xlu1 %v14187_v9, %s14007_s9 }
 0x435   :  { %3167 = vrot.lane.b32.xlu1 %v14187_v9, %s14008_s10 }
 0x439   :  { %3325 = vrot.lane.b32.xlu1 %v14219_v17, %s14007_s9 }
 0x43a   :  { %2781 = vrot.lane.b32.xlu0 %v14189_v11, %s14006_s8 }
 0x43d   :  { %3323 = vrot.lane.b32.xlu1 %v14219_v17, %s14008_s10 }
 0x43e   :  { %2935 = vrot.lane.b32.xlu0 %v14171_v38, %s14007_s9 }
 0x441   :  { %3481 = vrot.lane.b32.xlu1 %v14199_v15, %s14007_s9 }
 0x442   :  { %2933 = vrot.lane.b32.xlu0 %v14171_v38, %s14008_s10 }
 0x445   :  { %3479 = vrot.lane.b32.xlu1 %v14199_v15, %s14008_s10 }
 0x446   :  { %3091 = vrot.lane.b32.xlu0 %v14183_v7, %s14007_s9 }
 0x44a   :  { %3089 = vrot.lane.b32.xlu0 %v14183_v7, %s14008_s10 }
 0x44e   :  { %3247 = vrot.lane.b32.xlu0 %v14197_v14, %s14007_s9 }
 0x452   :  { %3245 = vrot.lane.b32.xlu0 %v14197_v14, %s14008_s10 }
 0x456   :  { %3403 = vrot.lane.b32.xlu0 %v14189_v11, %s14007_s9 }
 0x45a   :  { %3401 = vrot.lane.b32.xlu0 %v14189_v11, %s14008_s10 }
 0x45c   :  { %v959_v62 = vpop.xlane.xlu0 %958 }
 0x470   :  { %v965_v4 = vpop.xlane.xlu0 %964 }
 0x47d   :  { %v1682_v25 = vpop.xlane.xlu1 %1681 }
 0x47e   :  { %13683 = vrcp.f32 %v1682_v25 }
 0x481   :  { %v962_v50 = vpop.xlane.xlu1 %961 }
 0x485   :  { %v1688_v31 = vpop.xlane.xlu1 %1687 }
 0x486   :  { %13685 = vrcp.f32 %v1688_v31 }
 0x489   :  { %v968_v61 = vpop.xlane.xlu1 %967 }
 0x48b   :  { %v13684_v21 = vpop.eup %13683 }
 0x48c   :  { %v1710_v42 = vmul.f32 %v13684_v21, %v14496_v43 }
 0x48e   :  { %12952 = vmatmul.mubr.msk.f32.vlgmr.msra.gmra.mxu0 %vm285_vm2, %v1710_v42 }
 0x48f   :  { %12960 = vmatpush3.msra.mxu0 %v14474_v44  ;;  %12961 = vmatprep.mubr.msk.f32.mxu0 %vm14001_vm1, %v16522_v49  ;;  %v14618_v44 = vpop.xlane.xlu0 %970 }
 0x490   :  { %12969 = vmatprep.subr.mxu0 %v16522_v49 }
 0x491   :  { %v1694_v39 = vpop.xlane.xlu1 %1693 }
 0x492   :  { %13687 = vrcp.f32 %v1694_v39 }
 0x493   :  { %v13686_v30 = vpop.eup %13685 }
 0x494   :  { %v1712_v43 = vmul.f32 %v13686_v30, %v14506_v59 }
 0x495   :  { %v974_v22 = vpop.xlane.xlu1 %973 }
 0x496   :  { %12962 = vmatmul.mubr.msk.f32.vlgmr.msra.gmra.mxu0 %vm285_vm2, %v1712_v43 }
 0x497   :  { %12970 = vmatpush3.msra.mxu0 %v14485_v55  ;;  %12971 = vmatprep.mubr.msk.f32.mxu0 %vm14001_vm1, %v16522_v49 }
 0x498   :  { %12979 = vmatprep.subr.mxu0 %v16522_v49 }
 0x499   :  { %v1700_v60 = vpop.xlane.xlu1 %1699 }
 0x49a   :  { %13689 = vrcp.f32 %v1700_v60 }
 0x49b   :  { %13691 = vrcp.f32 %v962_v50 }
 0x49c   :  { %13693 = vrcp.f32 %v968_v61 }
 0x49d   :  { %v14621_v20 = vpop.xlane.xlu1 %976  ;;  %v980_v36 = vpop.xlane.xlu0 %979 }
 0x49f   :  { %v13688_v25 = vpop.eup %13687 }
 0x4a0   :  { %v1714_v59 = vmul.f32 %v13688_v25, %v14523_v51 }
 0x4a1   :  { %v2858_v31 = vpop.permute.xlu1 %2857  ;;  %v1679_v21 = vpop.xlane.xlu0 %1678 }
 0x4a2   :  { %13695 = vrcp.f32 %v1679_v21  ;;  %12972 = vmatmul.mubr.msk.f32.vlgmr.msra.gmra.mxu0 %vm285_vm2, %v1714_v59 }
 0x4a3   :  { %12980 = vmatpush3.msra.mxu0 %v14483_v54  ;;  %12981 = vmatprep.mubr.msk.f32.mxu0 %vm14001_vm1, %v16522_v49  ;;  %13697 = vrcp.f32 %v974_v22 }
 0x4a4   :  { %12989 = vmatprep.subr.mxu0 %v16522_v49 }
 0x4a5   :  { %v3014_v55 = vpop.permute.xlu1 %3013  ;;  %v1685_v50 = vpop.xlane.xlu0 %1684 }
 0x4a6   :  { %13699 = vrcp.f32 %v1685_v50 }
 0x4a7   :  { %v13690_v42 = vpop.eup %13689  ;;  %13701 = vrcp.f32 %v980_v36 }
 0x4a8   :  { %v1716_v51 = vmul.f32 %v13690_v42, %v14533_v58  ;;  %v13692_v61 = vpop.eup %13691 }
 0x4a9   :  { %v14630_v39 = vpop.permute.xlu1 %3011  ;;  %v1691_v30 = vpop.xlane.xlu0 %1690  ;;  %v990_v54 = vmul.f32 %v13692_v61, %v14501_v35 }
 0x4aa   :  { %13703 = vrcp.f32 %v1691_v30  ;;  %12982 = vmatmul.mubr.msk.f32.vlgmr.msra.gmra.mxu0 %vm285_vm2, %v1716_v51  ;;  %v13694_v22 = vpop.eup %13693 }
 0x4ab   :  { %12990 = vmatpush3.msra.mxu0 %v2402_v40  ;;  %12991 = vmatprep.mubr.msk.f32.mxu0 %vm14001_vm1, %v16522_v49  ;;  %v992_v36 = vmul.f32 %v13694_v22, %v14511_v2 }
 0x4ac   :  { %12999 = vmatprep.subr.mxu0 %v16522_v49 }
 0x4ad   :  { %v3170_v43 = vpop.permute.xlu1 %3169  ;;  %v1697_v60 = vpop.xlane.xlu0 %1696 }
 0x4ae   :  { %13705 = vrcp.f32 %v1697_v60  ;;  %12992 = vmatmul.mubr.msk.f32.vlgmr.msra.gmra.mxu0 %vm285_vm2, %v990_v54 }
 0x4af   :  { %v13696_v58 = vpop.eup %13695  ;;  %13000 = vmatpush3.msra.mxu0 %v14597_v23  ;;  %13001 = vmatprep.mubr.msk.f32.mxu0 %vm14001_vm1, %v16522_v49  ;;  %13707 = vrcp.f32 %v959_v62 }
 0x4b0   :  { %13009 = vmatprep.subr.mxu0 %v16522_v49  ;;  %v1709_v40 = vmul.f32 %v13696_v58, %v14545_v56  ;;  %v13698_v35 = vpop.eup %13697  ;;  %13709 = vrcp.f32 %v965_v4 }
 0x4b1   :  { %v3168_v25 = vpop.permute.xlu1 %3167  ;;  %v14644_v59 = vpop.permute.xlu0 %2781  ;;  %v994_v56 = vmul.f32 %v13698_v35, %v14528_v27  ;;  %13711 = vrcp.f32 %v14618_v44 }
 0x4b2   :  { %12947 = vmatmul.mubr.msk.f32.vlgmr.msra.gmra.mxu1 %vm285_vm2, %v1709_v40  ;;  %13002 = vmatmul.mubr.msk.f32.vlgmr.msra.gmra.mxu0 %vm285_vm2, %v992_v36  ;;  %13713 = vrcp.f32 %v14621_v20 }
 0x4b3   :  { %v13700_v21 = vpop.eup %13699  ;;  %12955 = vmatpush3.msra.mxu1 %v14469_v33  ;;  %13010 = vmatpush3.msra.mxu0 %v14599_v41 }
 0x4b4   :  { %13011 = vmatprep.mubr.msk.f32.mxu0 %vm14001_vm1, %v16522_v49  ;;  %13019 = vmatprep.subr.mxu0 %v16522_v49  ;;  %v1711_v2 = vmul.f32 %v13700_v21, %v14549_v26  ;;  %v13702_v23 = vpop.eup %13701 }
 0x4b5   :  { %12956 = vmatprep.mubr.msk.f32.mxu1 %vm14001_vm1, %v16522_v49  ;;  %12964 = vmatprep.subr.mxu1 %v16522_v49  ;;  %v14658_v62 = vpop.permute.xlu0 %2935  ;;  %v3326_v41 = vpop.permute.xlu1 %3325  ;;  %v996_v26 = vmul.f32 %v13702_v23, %v14539_v48 }
 0x4b6   :  { %12957 = vmatmul.mubr.msk.f32.vlgmr.msra.gmra.mxu1 %vm285_vm2, %v1711_v2  ;;  %13012 = vmatmul.mubr.msk.f32.vlgmr.msra.gmra.mxu0 %vm285_vm2, %v994_v56 }
 0x4b7   :  { %v13704_v33 = vpop.eup %13703  ;;  %12965 = vmatpush3.msra.mxu1 %v14476_v45  ;;  %13020 = vmatpush3.msra.mxu0 %v2858_v31 }
 0x4b8   :  { %13021 = vmatprep.mubr.msk.f32.mxu0 %vm14001_vm1, %v16522_v49  ;;  %13029 = vmatprep.subr.mxu0 %v16522_v49  ;;  %v1713_v27 = vmul.f32 %v13704_v33, %v14553_v19 }
 0x4b9   :  { %12966 = vmatprep.mubr.msk.f32.mxu1 %vm14001_vm1, %v16522_v49  ;;  %12974 = vmatprep.subr.mxu1 %v16522_v49  ;;  %v14672_v4 = vpop.permute.xlu0 %2933  ;;  %v3324_v44 = vpop.permute.xlu1 %3323 }
 0x4ba   :  { %12967 = vmatmul.mubr.msk.f32.vlgmr.msra.gmra.mxu1 %vm285_vm2, %v1713_v27  ;;  %13022 = vmatmul.mubr.msk.f32.vlgmr.msra.gmra.mxu0 %vm285_vm2, %v996_v26 }
 0x4bb   :  { %v13706_v45 = vpop.eup %13705  ;;  %12975 = vmatpush3.msra.mxu1 %v14471_v37  ;;  %13030 = vmatpush3.xpose.msk.msra.mxu0 %vm285_vm2, %v3014_v55 }
 0x4bc   :  { %12976 = vmatprep.mubr.msk.f32.mxu1 %vm14001_vm1, %v16522_v49  ;;  %12984 = vmatprep.subr.mxu1 %v16522_v49  ;;  %v1715_v48 = vmul.f32 %v13706_v45, %v14557_v34  ;;  %v13708_v19 = vpop.eup %13707 }
 0x4bd   :  { %13031 = vmatprep.mubr.msk.f32.mxu0 %vm14001_vm1, %v16522_v49  ;;  %13039 = vmatprep.subr.mxu0 %v16522_v49  ;;  %v3092_v37 = vpop.permute.xlu0 %3091  ;;  %v989_v34 = vmul.f32 %v13708_v19, %v14478_v46  ;;  %v13710_v20 = vpop.eup %13709 }
 0x4be   :  { %12977 = vmatmul.mubr.msk.f32.vlgmr.msra.gmra.mxu1 %vm285_vm2, %v1715_v48  ;;  %13032 = vmatmul.mubr.msk.f32.vlgmr.msra.gmra.mxu0 %vm285_vm2, %v14630_v39  ;;  %v991_v46 = vmul.f32 %v13710_v20, %v14488_v63  ;;  %v13712_v31 = vpop.eup %13711 }
 0x4bf   :  { %12985 = vmatpush3.msra.mxu1 %v14601_v47  ;;  %13040 = vmatpush3.xpose.msk.msra.mxu0 %vm285_vm2, %v3170_v43  ;;  %v3482_v47 = vpop.permute.xlu1 %3481  ;;  %v993_v63 = vmul.f32 %v13712_v31, %v14514_v24 }
 0x4c0   :  { %12986 = vmatprep.mubr.msk.f32.mxu1 %vm14001_vm1, %v16522_v49  ;;  %12994 = vmatprep.subr.mxu1 %v16522_v49 }
 0x4c1   :  { %13041 = vmatprep.mubr.msk.f32.mxu0 %vm14001_vm1, %v16522_v49  ;;  %13049 = vmatprep.subr.mxu0 %v16522_v49  ;;  %v3090_v55 = vpop.permute.xlu0 %3089 }
 0x4c2   :  { %12987 = vmatmul.mubr.msk.f32.vlgmr.msra.gmra.mxu1 %vm285_vm2, %v989_v34  ;;  %13042 = vmatmul.mubr.msk.f32.vlgmr.msra.gmra.mxu0 %vm285_vm2, %v3168_v25 }
 0x4c3   :  { %12995 = vmatpush3.msra.mxu1 %v14603_v28  ;;  %13050 = vmatpush3.xpose.msk.msra.mxu0 %vm285_vm2, %v3326_v41  ;;  %v13714_v28 = vpop.eup %13713  ;;  %v3480_v50 = vpop.permute.xlu1 %3479 }
 0x4c4   :  { %12996 = vmatprep.mubr.msk.f32.mxu1 %vm14001_vm1, %v16522_v49  ;;  %13004 = vmatprep.subr.mxu1 %v16522_v49  ;;  %v995_v24 = vmul.f32 %v13714_v28, %v14537_v0 }
 0x4c5   :  { %13051 = vmatprep.mubr.msk.f32.mxu0 %vm14001_vm1, %v16522_v49  ;;  %13059 = vmatprep.subr.mxu0 %v16522_v49 }
 0x4c6   :  { %12997 = vmatmul.mubr.msk.f32.vlgmr.msra.gmra.mxu1 %vm285_vm2, %v991_v46  ;;  %13052 = vmatmul.mubr.msk.f32.vlgmr.msra.gmra.mxu0 %vm285_vm2, %v3324_v44 }
 0x4c7   :  { %13005 = vmatpush3.msra.mxu1 %v14606_v29  ;;  %13060 = vmatpush3.xpose.msk.msra.mxu0 %vm285_vm2, %v3482_v47  ;;  %v3248_v29 = vpop.permute.xlu0 %3247 }
 0x4c8   :  { %13006 = vmatprep.mubr.msk.f32.mxu1 %vm14001_vm1, %v16522_v49  ;;  %13014 = vmatprep.subr.mxu1 %v16522_v49 }
 0x4c9   :  { %13061 = vmatprep.mubr.msk.f32.mxu0 %vm14001_vm1, %v16522_v49  ;;  %13069 = vmatprep.subr.mxu0 %v16522_v49 }
 0x4ca   :  { %13007 = vmatmul.mubr.msk.f32.vlgmr.msra.gmra.mxu1 %vm285_vm2, %v993_v63  ;;  %13062 = vmatmul.mubr.msk.f32.vlgmr.msra.gmra.mxu0 %vm285_vm2, %v3480_v50 }
 0x4cb   :  { %13015 = vmatpush3.msra.mxu1 %v14644_v59  ;;  %13070 = vmatpush3.msra.mxu0 %v14181_v6  ;;  %v3246_v42 = vpop.permute.xlu0 %3245 }
 0x4cc   :  { %13016 = vmatprep.mubr.msk.f32.mxu1 %vm14001_vm1, %v16522_v49  ;;  %13024 = vmatprep.subr.mxu1 %v16522_v49 }
 0x4cd   :  { %13071 = vmatprep.mubr.msk.f32.mxu0 %vm14001_vm1, %v16522_v49  ;;  %13079 = vmatprep.subr.mxu0 %v16522_v49 }
 0x4ce   :  { %13017 = vmatmul.mubr.msk.f32.vlgmr.msra.gmra.mxu1 %vm285_vm2, %v995_v24 }
 0x4cf   :  { %13025 = vmatpush3.xpose.msk.msra.mxu1 %vm285_vm2, %v14658_v62  ;;  %13026 = vmatprep.mubr.msk.f32.mxu1 %vm14001_vm1, %v16522_v49  ;;  %v3404_v0 = vpop.permute.xlu0 %3403 }
 0x4d0   :  { %13034 = vmatprep.subr.mxu1 %v16522_v49 }
 0x4d2   :  { %13027 = vmatmul.mubr.msk.f32.vlgmr.msra.gmra.mxu1 %vm285_vm2, %v14672_v4 }
 0x4d3   :  { %13035 = vmatpush3.xpose.msk.msra.mxu1 %vm285_vm2, %v3092_v37  ;;  %13036 = vmatprep.mubr.msk.f32.mxu1 %vm14001_vm1, %v16522_v49  ;;  %v3402_v51 = vpop.permute.xlu0 %3401 }
 0x4d4   :  { %13044 = vmatprep.subr.mxu1 %v16522_v49 }
 0x4d6   :  { %13037 = vmatmul.mubr.msk.f32.vlgmr.msra.gmra.mxu1 %vm285_vm2, %v3090_v55 }
 0x4d7   :  { %13045 = vmatpush3.xpose.msk.msra.mxu1 %vm285_vm2, %v3248_v29  ;;  %13046 = vmatprep.mubr.msk.f32.mxu1 %vm14001_vm1, %v16522_v49 }
 0x4d8   :  { %13054 = vmatprep.subr.mxu1 %v16522_v49 }
 0x4da   :  { %13047 = vmatmul.mubr.msk.f32.vlgmr.msra.gmra.mxu1 %vm285_vm2, %v3246_v42 }
 0x4db   :  { %13055 = vmatpush3.xpose.msk.msra.mxu1 %vm285_vm2, %v3404_v0  ;;  %13056 = vmatprep.mubr.msk.f32.mxu1 %vm14001_vm1, %v16522_v49 }
 0x4dc   :  { %13064 = vmatprep.subr.mxu1 %v16522_v49 }
 0x4de   :  { %13057 = vmatmul.mubr.msk.f32.vlgmr.msra.gmra.mxu1 %vm285_vm2, %v3402_v51 }
 0x4df   :  { %13065 = vmatpush3.msra.mxu1 %v14175_v3  ;;  %13066 = vmatprep.mubr.msk.f32.mxu1 %vm14001_vm1, %v16522_v49 }
 0x4e0   :  { %13074 = vmatprep.subr.mxu1 %v16522_v49 }
 0x54e   :  { %v1865_v61 = vpop.f32.mrf.mxu0 }
 0x550   :  { %v12953_v39 = vpop.f32.mrf.mxu0 }
 0x556   :  { %v2017_v30 = vpop.f32.mrf.mxu0 }
 0x558   :  { %v12963_v54 = vpop.f32.mrf.mxu0 }
 0x562   :  { %v2169_v22 = vpop.f32.mrf.mxu0 }
 0x564   :  { %v12973_v43 = vpop.f32.mrf.mxu0 }
 0x56a   :  { %v2321_v60 = vpop.f32.mrf.mxu0 }
 0x56c   :  { %v12983_v58 = vpop.f32.mrf.mxu0 }
 0x56e   :  { %v2473_v40 = vpop.f32.mrf.mxu0 }
 0x56f   :  { %v14758_v36 = vadd.f32 %v2473_v40, %v1865_v61 }
 0x570   :  { %v12993_v35 = vpop.f32.mrf.mxu0 }
 0x572   :  { %v1789_v25 = vpop.f32.mrf.mxu1  ;;  %v2625_v59 = vpop.f32.mrf.mxu0 }
 0x573   :  { %v14760_v21 = vadd.f32 %v2625_v59, %v2017_v30 }
 0x574   :  { %v12948_v2 = vpop.f32.mrf.mxu1  ;;  %v13003_v56 = vpop.f32.mrf.mxu0 }
 0x576   :  { %v1941_v23 = vpop.f32.mrf.mxu1  ;;  %v2777_v62 = vpop.f32.mrf.mxu0 }
 0x577   :  { %v14762_v33 = vadd.f32 %v2777_v62, %v2169_v22 }
 0x578   :  { %v12958_v41 = vpop.f32.mrf.mxu1  ;;  %v13013_v27 = vpop.f32.mrf.mxu0 }
 0x57a   :  { %v2093_v26 = vpop.f32.mrf.mxu1  ;;  %v2929_v4 = vpop.f32.mrf.mxu0 }
 0x57b   :  { %v14764_v45 = vadd.f32 %v2929_v4, %v2321_v60 }
 0x57c   :  { %v12968_v48 = vpop.f32.mrf.mxu1  ;;  %v13023_v19 = vpop.f32.mrf.mxu0 }
 0x57e   :  { %v2245_v44 = vpop.f32.mrf.mxu1  ;;  %v3085_v37 = vpop.f32.mrf.mxu0 }
 0x57f   :  { %v3558_v34 = vsel %vm37_vm3, %v3085_v37, -1e+30 }
 0x580   :  { %v3568_v20 = vsel %vm285_vm2, %v3558_v34, -inf  ;;  %v12978_v47 = vpop.f32.mrf.mxu1  ;;  %v13033_v46 = vpop.f32.mrf.mxu0 }
 0x581   :  { %3569 = vmax.xlane.f32.xlu1 %v3568_v20 }
 0x582   :  { %v2397_v31 = vpop.f32.mrf.mxu1  ;;  %v3241_v55 = vpop.f32.mrf.mxu0 }
 0x583   :  { %v14769_v63 = vadd.f32 %v2397_v31, %v1789_v25  ;;  %v3560_v28 = vsel %vm37_vm3, %v3241_v55, -1e+30 }
 0x584   :  { %v3574_v50 = vsel %vm285_vm2, %v3560_v28, -inf  ;;  %v12988_v29 = vpop.f32.mrf.mxu1  ;;  %v13043_v24 = vpop.f32.mrf.mxu0 }
 0x585   :  { %3575 = vmax.xlane.f32.xlu0 %v3574_v50 }
 0x586   :  { %v2549_v42 = vpop.f32.mrf.mxu1  ;;  %v3397_v0 = vpop.f32.mrf.mxu0 }
 0x587   :  { %v14774_v51 = vadd.f32 %v2549_v42, %v1941_v23  ;;  %v3562_v61 = vsel %vm37_vm3, %v3397_v0, -1e+30 }
 0x588   :  { %v3580_v39 = vsel %vm285_vm2, %v3562_v61, -inf  ;;  %v12998_v30 = vpop.f32.mrf.mxu1  ;;  %v13053_v54 = vpop.f32.mrf.mxu0 }
 0x589   :  { %3581 = vmax.xlane.f32.xlu1 %v3580_v39 }
 0x58a   :  { %v2701_v22 = vpop.f32.mrf.mxu1  ;;  %v3553_v43 = vpop.f32.mrf.mxu0 }
 0x58b   :  { %v14779_v60 = vadd.f32 %v2701_v22, %v2093_v26  ;;  %v3564_v58 = vsel %vm37_vm3, %v3553_v43, -1e+30 }
 0x58c   :  { %v3586_v40 = vsel %vm285_vm2, %v3564_v58, -inf  ;;  %v13008_v35 = vpop.f32.mrf.mxu1  ;;  %v13063_v25 = vpop.f32.mrf.mxu0 }
 0x58d   :  { %3587 = vmax.xlane.f32.xlu1 %v3586_v40 }
 0x58e   :  { %v2853_v59 = vpop.f32.mrf.mxu1 }
 0x58f   :  { %v14784_v2 = vadd.f32 %v2853_v59, %v2245_v44 }
 0x590   :  { %v13018_v56 = vpop.f32.mrf.mxu1 }
 0x592   :  { %v3007_v23 = vpop.f32.mrf.mxu1 }
 0x593   :  { %v3557_v62 = vsel %vm37_vm3, %v3007_v23, -1e+30 }
 0x594   :  { %v3565_v41 = vsel %vm285_vm2, %v3557_v62, -inf  ;;  %v13028_v27 = vpop.f32.mrf.mxu1 }
 0x595   :  { %3566 = vmax.xlane.f32.xlu0 %v3565_v41 }
 0x596   :  { %v3163_v26 = vpop.f32.mrf.mxu1 }
 0x597   :  { %v3559_v4 = vsel %vm37_vm3, %v3163_v26, -1e+30 }
 0x598   :  { %v3571_v48 = vsel %vm285_vm2, %v3559_v4, -inf  ;;  %v13038_v19 = vpop.f32.mrf.mxu1 }
 0x599   :  { %3572 = vmax.xlane.f32.xlu0 %v3571_v48 }
 0x59a   :  { %v3319_v37 = vpop.f32.mrf.mxu1 }
 0x59b   :  { %v3561_v44 = vsel %vm37_vm3, %v3319_v37, -1e+30 }
 0x59c   :  { %v3577_v20 = vsel %vm285_vm2, %v3561_v44, -inf  ;;  %v13048_v47 = vpop.f32.mrf.mxu1 }
 0x59d   :  { %3578 = vmax.xlane.f32.xlu0 %v3577_v20 }
 0x59e   :  { %v3475_v46 = vpop.f32.mrf.mxu1 }
 0x59f   :  { %v3563_v31 = vsel %vm37_vm3, %v3475_v46, -1e+30 }
 0x5a0   :  { %v3583_v55 = vsel %vm285_vm2, %v3563_v31, -inf  ;;  %v13058_v50 = vpop.f32.mrf.mxu1 }
 0x5a1   :  { %3584 = vmax.xlane.f32.xlu0 %v3583_v55 }
 0x60a   :  { %v3570_v29 = vpop.xlane.xlu1 %3569 }
 0x60b   :  { %v3590_v24 = vsub.f32 %v3558_v34, %v3570_v29 }
 0x60d   :  { %v3599_v42 = vmul.f32 1.442695, %v3590_v24 }
 0x60e   :  { %v3576_v0 = vpop.xlane.xlu0 %3575 }
 0x60f   :  { %13715 = vpow2.f32 %v3599_v42  ;;  %v3592_v39 = vsub.f32 %v3560_v28, %v3576_v0 }
 0x611   :  { %v3603_v30 = vmul.f32 1.442695, %v3592_v39 }
 0x612   :  { %v3582_v54 = vpop.xlane.xlu1 %3581 }
 0x613   :  { %13717 = vpow2.f32 %v3603_v30  ;;  %v3594_v22 = vsub.f32 %v3562_v61, %v3582_v54 }
 0x615   :  { %v3607_v43 = vmul.f32 1.442695, %v3594_v22 }
 0x616   :  { %v3588_v40 = vpop.xlane.xlu1 %3587 }
 0x617   :  { %13719 = vpow2.f32 %v3607_v43  ;;  %v3596_v35 = vsub.f32 %v3564_v58, %v3588_v40 }
 0x619   :  { %v3611_v25 = vmul.f32 1.442695, %v3596_v35 }
 0x61b   :  { %13721 = vpow2.f32 %v3611_v25 }
 0x61c   :  { %v14798_v59 = vpop.eup %13715 }
 0x61d   :  { %v3616_v56 = vsel %vm285_vm2, %v14798_v59, 0.0 }
 0x61e   :  { %3617 = vadd.xlane.f32.xlu1 %v3616_v56  ;;  %v3567_v34 = vpop.xlane.xlu0 %3566 }
 0x61f   :  { %v3589_v23 = vsub.f32 %v3557_v62, %v3567_v34 }
 0x620   :  { %v14802_v41 = vpop.eup %13717 }
 0x621   :  { %v3597_v28 = vmul.f32 1.442695, %v3589_v23  ;;  %v3622_v61 = vsel %vm285_vm2, %v14802_v41, 0.0 }
 0x622   :  { %3623 = vadd.xlane.f32.xlu1 %v3622_v61  ;;  %v3573_v27 = vpop.xlane.xlu0 %3572 }
 0x623   :  { %13723 = vpow2.f32 %v3597_v28  ;;  %v3591_v58 = vsub.f32 %v3559_v4, %v3573_v27 }
 0x624   :  { %v14806_v26 = vpop.eup %13719 }
 0x625   :  { %v3601_v48 = vmul.f32 1.442695, %v3591_v58  ;;  %v3628_v19 = vsel %vm285_vm2, %v14806_v26, 0.0 }
 0x626   :  { %3629 = vadd.xlane.f32.xlu1 %v3628_v19  ;;  %v3579_v37 = vpop.xlane.xlu0 %3578 }
 0x627   :  { %13725 = vpow2.f32 %v3601_v48  ;;  %v3593_v62 = vsub.f32 %v3561_v44, %v3579_v37 }
 0x628   :  { %v14810_v20 = vpop.eup %13721 }
 0x629   :  { %v3605_v47 = vmul.f32 1.442695, %v3593_v62  ;;  %v3634_v46 = vsel %vm285_vm2, %v14810_v20, 0.0 }
 0x62a   :  { %3635 = vadd.xlane.f32.xlu1 %v3634_v46  ;;  %v3585_v55 = vpop.xlane.xlu0 %3584 }
 0x62b   :  { %13727 = vpow2.f32 %v3605_v47  ;;  %v3595_v4 = vsub.f32 %v3563_v31, %v3585_v55 }
 0x62d   :  { %v3609_v50 = vmul.f32 1.442695, %v3595_v4 }
 0x62f   :  { %13729 = vpow2.f32 %v3609_v50 }
 0x630   :  { %v14814_v29 = vpop.eup %13723 }
 0x631   :  { %v3613_v24 = vsel %vm285_vm2, %v14814_v29, 0.0 }
 0x632   :  { %3614 = vadd.xlane.f32.xlu0 %v3613_v24 }
 0x634   :  { %v14818_v42 = vpop.eup %13725 }
 0x635   :  { %v3619_v44 = vsel %vm285_vm2, %v14818_v42, 0.0 }
 0x636   :  { %3620 = vadd.xlane.f32.xlu0 %v3619_v44 }
 0x638   :  { %v14822_v0 = vpop.eup %13727 }
 0x639   :  { %v3625_v39 = vsel %vm285_vm2, %v14822_v0, 0.0 }
 0x63a   :  { %3626 = vadd.xlane.f32.xlu0 %v3625_v39 }
 0x63b   :  { %4325 = vrot.lane.b32.xlu1 %v14177_v5, %s14009_s11 }
 0x63c   :  { %v14828_v31 = vpop.eup %13729 }
 0x63d   :  { %v3631_v30 = vsel %vm285_vm2, %v14828_v31, 0.0 }
 0x63e   :  { %3632 = vadd.xlane.f32.xlu0 %v3631_v30 }
 0x63f   :  { %4245 = vrot.lane.b32.xlu1 %v14171_v38, %s14010_s12 }
 0x643   :  { %4323 = vrot.lane.b32.xlu1 %v14177_v5, %s14010_s12 }
 0x647   :  { %4481 = vrot.lane.b32.xlu1 %v14187_v9, %s14009_s11 }
 0x64b   :  { %4479 = vrot.lane.b32.xlu1 %v14187_v9, %s14010_s12 }
 0x64f   :  { %4637 = vrot.lane.b32.xlu1 %v14219_v17, %s14009_s11 }
 0x653   :  { %4635 = vrot.lane.b32.xlu1 %v14219_v17, %s14010_s12 }
 0x654   :  { %4247 = vrot.lane.b32.xlu0 %v14171_v38, %s14009_s11 }
 0x657   :  { %4793 = vrot.lane.b32.xlu1 %v14199_v15, %s14009_s11 }
 0x658   :  { %4403 = vrot.lane.b32.xlu0 %v14183_v7, %s14009_s11 }
 0x65b   :  { %4791 = vrot.lane.b32.xlu1 %v14199_v15, %s14010_s12 }
 0x65c   :  { %4401 = vrot.lane.b32.xlu0 %v14183_v7, %s14010_s12 }
 0x660   :  { %4559 = vrot.lane.b32.xlu0 %v14197_v14, %s14009_s11 }
 0x664   :  { %4557 = vrot.lane.b32.xlu0 %v14197_v14, %s14010_s12 }
 0x668   :  { %4715 = vrot.lane.b32.xlu0 %v14189_v11, %s14009_s11 }
 0x66c   :  { %4713 = vrot.lane.b32.xlu0 %v14189_v11, %s14010_s12 }
 0x6a7   :  { %v3618_v38 = vpop.xlane.xlu1 %3617 }
 0x6a8   :  { %13731 = vrcp.f32 %v3618_v38 }
 0x6ab   :  { %v3624_v5 = vpop.xlane.xlu1 %3623 }
 0x6ac   :  { %13733 = vrcp.f32 %v3624_v5 }
 0x6af   :  { %v3630_v9 = vpop.xlane.xlu1 %3629 }
 0x6b0   :  { %13735 = vrcp.f32 %v3630_v9 }
 0x6b3   :  { %v3636_v15 = vpop.xlane.xlu1 %3635 }
 0x6b4   :  { %13737 = vrcp.f32 %v3636_v15 }
 0x6b5   :  { %v13732_v7 = vpop.eup %13731 }
 0x6b6   :  { %v3646_v17 = vmul.f32 %v13732_v7, %v14798_v59 }
 0x6b7   :  { %v4326_v54 = vpop.permute.xlu1 %4325 }
 0x6b8   :  { %13072 = vmatmul.mubr.msk.f32.vlgmr.msra.gmra.mxu0 %vm285_vm2, %v3646_v17 }
 0x6b9   :  { %v13734_v14 = vpop.eup %13733  ;;  %13080 = vmatpush3.msra.mxu0 %v14193_v12  ;;  %13081 = vmatprep.mubr.msk.f32.mxu0 %vm14001_vm1, %v16522_v49 }
 0x6ba   :  { %13089 = vmatprep.subr.mxu0 %v16522_v49  ;;  %v3648_v11 = vmul.f32 %v13734_v14, %v14802_v41 }
 0x6bb   :  { %v14869_v22 = vpop.permute.xlu1 %4245  ;;  %v3615_v43 = vpop.xlane.xlu0 %3614 }
 0x6bc   :  { %13739 = vrcp.f32 %v3615_v43  ;;  %13082 = vmatmul.mubr.msk.f32.vlgmr.msra.gmra.mxu0 %vm285_vm2, %v3648_v11 }
 0x6bd   :  { %v13736_v40 = vpop.eup %13735  ;;  %13090 = vmatpush3.msra.mxu0 %v14371_v1  ;;  %13091 = vmatprep.mubr.msk.f32.mxu0 %vm14001_vm1, %v16522_v49 }
 0x6be   :  { %13099 = vmatprep.subr.mxu0 %v16522_v49  ;;  %v3650_v35 = vmul.f32 %v13736_v40, %v14806_v26 }
 0x6bf   :  { %v4324_v25 = vpop.permute.xlu1 %4323  ;;  %v3621_v59 = vpop.xlane.xlu0 %3620 }
 0x6c0   :  { %13741 = vrcp.f32 %v3621_v59  ;;  %13092 = vmatmul.mubr.msk.f32.vlgmr.msra.gmra.mxu0 %vm285_vm2, %v3650_v35 }
 0x6c1   :  { %v13738_v56 = vpop.eup %13737  ;;  %13100 = vmatpush3.msra.mxu0 %v14357_v53  ;;  %13101 = vmatprep.mubr.msk.f32.mxu0 %vm14001_vm1, %v16522_v49 }
 0x6c2   :  { %13109 = vmatprep.subr.mxu0 %v16522_v49  ;;  %v3652_v34 = vmul.f32 %v13738_v56, %v14810_v20 }
 0x6c3   :  { %v4482_v23 = vpop.permute.xlu1 %4481  ;;  %v3627_v41 = vpop.xlane.xlu0 %3626 }
 0x6c4   :  { %13743 = vrcp.f32 %v3627_v41  ;;  %13102 = vmatmul.mubr.msk.f32.vlgmr.msra.gmra.mxu0 %vm285_vm2, %v3652_v34 }
 0x6c5   :  { %13110 = vmatpush3.xpose.msk.msra.mxu0 %vm285_vm2, %v4326_v54  ;;  %13111 = vmatprep.mubr.msk.f32.mxu0 %vm14001_vm1, %v16522_v49 }
 0x6c6   :  { %13119 = vmatprep.subr.mxu0 %v16522_v49 }
 0x6c7   :  { %v4480_v28 = vpop.permute.xlu1 %4479  ;;  %v3633_v61 = vpop.xlane.xlu0 %3632 }
 0x6c8   :  { %13745 = vrcp.f32 %v3633_v61  ;;  %13112 = vmatmul.mubr.msk.f32.vlgmr.msra.gmra.mxu0 %vm285_vm2, %v4324_v25 }
 0x6c9   :  { %v13740_v27 = vpop.eup %13739  ;;  %13120 = vmatpush3.xpose.msk.msra.mxu0 %vm285_vm2, %v4482_v23  ;;  %13121 = vmatprep.mubr.msk.f32.mxu0 %vm14001_vm1, %v16522_v49 }
 0x6ca   :  { %13129 = vmatprep.subr.mxu0 %v16522_v49  ;;  %v3645_v58 = vmul.f32 %v13740_v27, %v14814_v29 }
 0x6cb   :  { %v4638_v26 = vpop.permute.xlu1 %4637  ;;  %v4248_v48 = vpop.permute.xlu0 %4247 }
 0x6cc   :  { %13067 = vmatmul.mubr.msk.f32.vlgmr.msra.gmra.mxu1 %vm285_vm2, %v3645_v58  ;;  %13122 = vmatmul.mubr.msk.f32.vlgmr.msra.gmra.mxu0 %vm285_vm2, %v4480_v28 }
 0x6cd   :  { %v13742_v19 = vpop.eup %13741  ;;  %13075 = vmatpush3.msra.mxu1 %v14185_v8  ;;  %13130 = vmatpush3.xpose.msk.msra.mxu0 %vm285_vm2, %v4638_v26 }
 0x6ce   :  { %13131 = vmatprep.mubr.msk.f32.mxu0 %vm14001_vm1, %v16522_v49  ;;  %13076 = vmatprep.mubr.msk.f32.mxu1 %vm14001_vm1, %v16522_v49  ;;  %v3647_v37 = vmul.f32 %v13742_v19, %v14818_v42 }
 0x6cf   :  { %v4636_v62 = vpop.permute.xlu1 %4635  ;;  %13084 = vmatprep.subr.mxu1 %v16522_v49  ;;  %v4404_v20 = vpop.permute.xlu0 %4403  ;;  %13139 = vmatprep.subr.mxu0 %v16522_v49 }
 0x6d0   :  { %13077 = vmatmul.mubr.msk.f32.vlgmr.msra.gmra.mxu1 %vm285_vm2, %v3647_v37  ;;  %13132 = vmatmul.mubr.msk.f32.vlgmr.msra.gmra.mxu0 %vm285_vm2, %v4636_v62 }
 0x6d1   :  { %v13744_v47 = vpop.eup %13743  ;;  %13085 = vmatpush3.msra.mxu1 %v14213_v16  ;;  %13086 = vmatprep.mubr.msk.f32.mxu1 %vm14001_vm1, %v16522_v49 }
 0x6d2   :  { %13094 = vmatprep.subr.mxu1 %v16522_v49  ;;  %v3649_v46 = vmul.f32 %v13744_v47, %v14822_v0  ;;  %13141 = vmatprep.mubr.msk.f32.mxu0 %vm14001_vm1, %v16522_v49 }
 0x6d3   :  { %v4794_v55 = vpop.permute.xlu1 %4793  ;;  %v4402_v4 = vpop.permute.xlu0 %4401 }
 0x6d4   :  { %13087 = vmatmul.mubr.msk.f32.vlgmr.msra.gmra.mxu1 %vm285_vm2, %v3649_v46  ;;  %13140 = vmatpush3.xpose.msk.msra.mxu0 %vm285_vm2, %v4794_v55 }
 0x6d5   :  { %v13746_v50 = vpop.eup %13745  ;;  %13095 = vmatpush3.msra.mxu1 %v14195_v13  ;;  %13096 = vmatprep.mubr.msk.f32.mxu1 %vm14001_vm1, %v16522_v49 }
 0x6d6   :  { %13104 = vmatprep.subr.mxu1 %v16522_v49  ;;  %v3651_v29 = vmul.f32 %v13746_v50, %v14828_v31  ;;  %13149 = vmatprep.subr.mxu0 %v16522_v49 }
 0x6d7   :  { %v4792_v24 = vpop.permute.xlu1 %4791  ;;  %v4560_v42 = vpop.permute.xlu0 %4559 }
 0x6d8   :  { %13097 = vmatmul.mubr.msk.f32.vlgmr.msra.gmra.mxu1 %vm285_vm2, %v3651_v29  ;;  %13142 = vmatmul.mubr.msk.f32.vlgmr.msra.gmra.mxu0 %vm285_vm2, %v4792_v24 }
 0x6d9   :  { %13105 = vmatpush3.xpose.msk.msra.mxu1 %vm285_vm2, %v4248_v48  ;;  %13106 = vmatprep.mubr.msk.f32.mxu1 %vm14001_vm1, %v16522_v49 }
 0x6da   :  { %13114 = vmatprep.subr.mxu1 %v16522_v49  ;;  %13151 = vmatprep.mubr.msk.f32.mxu0 %vm14001_vm1, %v16522_v49 }
 0x6db   :  { %v4558_v44 = vpop.permute.xlu0 %4557 }
 0x6dc   :  { %13107 = vmatmul.mubr.msk.f32.vlgmr.msra.gmra.mxu1 %vm285_vm2, %v14869_v22 }
 0x6dd   :  { %13115 = vmatpush3.xpose.msk.msra.mxu1 %vm285_vm2, %v4404_v20  ;;  %13116 = vmatprep.mubr.msk.f32.mxu1 %vm14001_vm1, %v16522_v49 }
 0x6de   :  { %13124 = vmatprep.subr.mxu1 %v16522_v49 }
 0x6df   :  { %v4716_v0 = vpop.permute.xlu0 %4715 }
 0x6e0   :  { %13117 = vmatmul.mubr.msk.f32.vlgmr.msra.gmra.mxu1 %vm285_vm2, %v4402_v4 }
 0x6e1   :  { %13125 = vmatpush3.xpose.msk.msra.mxu1 %vm285_vm2, %v4560_v42  ;;  %13126 = vmatprep.mubr.msk.f32.mxu1 %vm14001_vm1, %v16522_v49 }
 0x6e2   :  { %13134 = vmatprep.subr.mxu1 %v16522_v49 }
 0x6e3   :  { %v4714_v39 = vpop.permute.xlu0 %4713 }
 0x6e4   :  { %13127 = vmatmul.mubr.msk.f32.vlgmr.msra.gmra.mxu1 %vm285_vm2, %v4558_v44 }
 0x6e5   :  { %13135 = vmatpush3.xpose.msk.msra.mxu1 %vm285_vm2, %v4716_v0  ;;  %13136 = vmatprep.mubr.msk.f32.mxu1 %vm14001_vm1, %v16522_v49 }
 0x6e6   :  { %13144 = vmatprep.subr.mxu1 %v16522_v49 }
 0x6e8   :  { %13137 = vmatmul.mubr.msk.f32.vlgmr.msra.gmra.mxu1 %vm285_vm2, %v4714_v39 }
 0x6e9   :  { %13146 = vmatprep.mubr.msk.f32.mxu1 %vm14001_vm1, %v16522_v49 }
 0x778   :  { %v3795_v31 = vpop.f32.mrf.mxu0 }
 0x779   :  { %v14950_v30 = vadd.f32 %v3795_v31, %v14758_v36 }
 0x77a   :  { %v13073_v38 = vpop.f32.mrf.mxu0 }
 0x77c   :  { %v3941_v5 = vpop.f32.mrf.mxu0 }
 0x77d   :  { %v14953_v9 = vadd.f32 %v3941_v5, %v14760_v21 }
 0x77e   :  { %v13083_v15 = vpop.f32.mrf.mxu0 }
 0x780   :  { %v4087_v7 = vpop.f32.mrf.mxu0 }
 0x781   :  { %v14956_v17 = vadd.f32 %v4087_v7, %v14762_v33 }
 0x782   :  { %v13093_v54 = vpop.f32.mrf.mxu0 }
 0x784   :  { %v4233_v14 = vpop.f32.mrf.mxu0 }
 0x785   :  { %v14959_v11 = vadd.f32 %v4233_v14, %v14764_v45 }
 0x786   :  { %v13103_v22 = vpop.f32.mrf.mxu0 }
 0x788   :  { %v4397_v43 = vpop.f32.mrf.mxu0 }
 0x789   :  { %v4870_v36 = vsel %vm37_vm3, %v4397_v43, -1e+30 }
 0x78a   :  { %v4880_v40 = vsel %vm285_vm2, %v4870_v36, -inf  ;;  %v13113_v35 = vpop.f32.mrf.mxu0 }
 0x78b   :  { %4881 = vmax.xlane.f32.xlu1 %v4880_v40 }
 0x78c   :  { %v3722_v21 = vpop.f32.mrf.mxu1  ;;  %v4553_v25 = vpop.f32.mrf.mxu0 }
 0x78d   :  { %v14965_v59 = vadd.f32 %v3722_v21, %v14769_v63  ;;  %v4872_v33 = vsel %vm37_vm3, %v4553_v25, -1e+30 }
 0x78e   :  { %v4886_v45 = vsel %vm285_vm2, %v4872_v33, -inf  ;;  %v13068_v56 = vpop.f32.mrf.mxu1  ;;  %v13123_v34 = vpop.f32.mrf.mxu0 }
 0x78f   :  { %4887 = vmax.xlane.f32.xlu0 %v4886_v45 }
 0x790   :  { %v3868_v23 = vpop.f32.mrf.mxu1  ;;  %v4709_v41 = vpop.f32.mrf.mxu0 }
 0x791   :  { %v14971_v28 = vadd.f32 %v3868_v23, %v14774_v51  ;;  %v4874_v61 = vsel %vm37_vm3, %v4709_v41, -1e+30 }
 0x792   :  { %v4892_v27 = vsel %vm285_vm2, %v4874_v61, -inf  ;;  %v13078_v63 = vpop.f32.mrf.mxu1  ;;  %v13133_v58 = vpop.f32.mrf.mxu0 }
 0x793   :  { %4893 = vmax.xlane.f32.xlu1 %v4892_v27 }
 0x794   :  { %v4014_v26 = vpop.f32.mrf.mxu1 }
 0x795   :  { %v14977_v48 = vadd.f32 %v4014_v26, %v14779_v60 }
 0x796   :  { %v13088_v19 = vpop.f32.mrf.mxu1 }
 0x798   :  { %v4160_v37 = vpop.f32.mrf.mxu1  ;;  %v4865_v62 = vpop.f32.mrf.mxu0 }
 0x799   :  { %v14980_v20 = vadd.f32 %v4160_v37, %v14784_v2  ;;  %v4876_v51 = vsel %vm37_vm3, %v4865_v62, -1e+30 }
 0x79a   :  { %v4898_v47 = vsel %vm285_vm2, %v4876_v51, -inf  ;;  %v13098_v46 = vpop.f32.mrf.mxu1  ;;  %v13143_v55 = vpop.f32.mrf.mxu0 }
 0x79b   :  { %4899 = vmax.xlane.f32.xlu1 %v4898_v47 }
 0x79c   :  { %v4319_v4 = vpop.f32.mrf.mxu1 }
 0x79d   :  { %v4869_v50 = vsel %vm37_vm3, %v4319_v4, -1e+30 }
 0x79e   :  { %v4877_v60 = vsel %vm285_vm2, %v4869_v50, -inf  ;;  %v13108_v29 = vpop.f32.mrf.mxu1 }
 0x79f   :  { %4878 = vmax.xlane.f32.xlu0 %v4877_v60 }
 0x7a0   :  { %v4475_v24 = vpop.f32.mrf.mxu1 }
 0x7a1   :  { %v4871_v2 = vsel %vm37_vm3, %v4475_v24, -1e+30 }
 0x7a2   :  { %v4883_v42 = vsel %vm285_vm2, %v4871_v2, -inf  ;;  %v13118_v44 = vpop.f32.mrf.mxu1 }
 0x7a3   :  { %4884 = vmax.xlane.f32.xlu0 %v4883_v42 }
 0x7a4   :  { %v4631_v0 = vpop.f32.mrf.mxu1 }
 0x7a5   :  { %v14993_v39 = vsel %vm37_vm3, %v4631_v0, -1e+30 }
 0x7a6   :  { %v4889_v31 = vsel %vm285_vm2, %v14993_v39, -inf  ;;  %v13128_v38 = vpop.f32.mrf.mxu1 }
 0x7a7   :  { %4890 = vmax.xlane.f32.xlu0 %v4889_v31 }
 0x7a8   :  { %v4787_v5 = vpop.f32.mrf.mxu1 }
 0x7a9   :  { %v14999_v15 = vsel %vm37_vm3, %v4787_v5, -1e+30 }
 0x7aa   :  { %v4895_v7 = vsel %vm285_vm2, %v14999_v15, -inf  ;;  %v13138_v54 = vpop.f32.mrf.mxu1 }
 0x7ab   :  { %4896 = vmax.xlane.f32.xlu0 %v4895_v7 }
 0x7ac   :  { %5043 = vrot.lane.b32.xlu1 %v14181_v6, %s14002_s27 }
 0x7b0   :  { %5120 = vrot.lane.b32.xlu1 %v14185_v8, %s14002_s27 }
 0x7b4   :  { %5197 = vrot.lane.b32.xlu1 %v14193_v12, %s14002_s27 }
 0x7c1   :  { %4966 = vrot.lane.b32.xlu0 %v14175_v3, %s14002_s27 }
 0x814   :  { %v4882_v14 = vpop.xlane.xlu1 %4881 }
 0x815   :  { %v4902_v22 = vsub.f32 %v4870_v36, %v4882_v14 }
 0x817   :  { %v4911_v43 = vmul.f32 1.442695, %v4902_v22 }
 0x818   :  { %v4888_v40 = vpop.xlane.xlu0 %4887 }
 0x819   :  { %13747 = vpow2.f32 %v4911_v43  ;;  %v4904_v35 = vsub.f32 %v4872_v33, %v4888_v40 }
 0x81b   :  { %v4915_v21 = vmul.f32 1.442695, %v4904_v35 }
 0x81c   :  { %v4894_v25 = vpop.xlane.xlu1 %4893 }
 0x81d   :  { %13749 = vpow2.f32 %v4915_v21  ;;  %v4906_v45 = vsub.f32 %v4874_v61, %v4894_v25 }
 0x81f   :  { %v4919_v6 = vmul.f32 1.442695, %v4906_v45 }
 0x821   :  { %13751 = vpow2.f32 %v4919_v6 }
 0x824   :  { %v4900_v56 = vpop.xlane.xlu1 %4899 }
 0x825   :  { %v4908_v8 = vsub.f32 %v4876_v51, %v4900_v56 }
 0x826   :  { %v13748_v34 = vpop.eup %13747 }
 0x827   :  { %v4923_v23 = vmul.f32 1.442695, %v4908_v8  ;;  %v4928_v12 = vsel %vm285_vm2, %v13748_v34, 0.0 }
 0x828   :  { %4929 = vadd.xlane.f32.xlu1 %v4928_v12  ;;  %v5044_v3 = vpop.permute.xlu1 %5043  ;;  %v4879_v41 = vpop.xlane.xlu0 %4878 }
 0x829   :  { %13753 = vpow2.f32 %v4923_v23  ;;  %v4901_v36 = vsub.f32 %v4869_v50, %v4879_v41  ;;  %13150 = vmatpush3.msra.mxu0 %v5044_v3 }
 0x82a   :  { %v13750_v27 = vpop.eup %13749  ;;  %13159 = vmatprep.subr.mxu0 %v16522_v49 }
 0x82b   :  { %v4909_v33 = vmul.f32 1.442695, %v4901_v36  ;;  %v4934_v61 = vsel %vm285_vm2, %v13750_v27, 0.0 }
 0x82c   :  { %4935 = vadd.xlane.f32.xlu1 %v4934_v61  ;;  %v4885_v63 = vpop.xlane.xlu0 %4884 }
 0x82d   :  { %13755 = vpow2.f32 %v4909_v33  ;;  %v4903_v58 = vsub.f32 %v4871_v2, %v4885_v63 }
 0x82e   :  { %v13752_v26 = vpop.eup %13751 }
 0x82f   :  { %v4913_v19 = vmul.f32 1.442695, %v4903_v58  ;;  %v4940_v37 = vsel %vm285_vm2, %v13752_v26, 0.0 }
 0x830   :  { %4941 = vadd.xlane.f32.xlu1 %v4940_v37  ;;  %v4891_v62 = vpop.xlane.xlu0 %4890 }
 0x831   :  { %13757 = vpow2.f32 %v4913_v19  ;;  %v4905_v24 = vsub.f32 %v14993_v39, %v4891_v62  ;;  %v13989_v62 = vld [vmem:[%s16511_s0 + $0x8] sm:$0xff] }
 0x833   :  { %v4917_v2 = vmul.f32 1.442695, %v4905_v24 }
 0x834   :  { %v4897_v51 = vpop.xlane.xlu0 %4896 }
 0x835   :  { %v4907_v42 = vsub.f32 %v14999_v15, %v4897_v51  ;;  %13759 = vpow2.f32 %v4917_v2 }
 0x836   :  { %v13754_v47 = vpop.eup %13753 }
 0x837   :  { %v4946_v46 = vsel %vm285_vm2, %v13754_v47, 0.0  ;;  %v4921_v44 = vmul.f32 1.442695, %v4907_v42 }
 0x838   :  { %4947 = vadd.xlane.f32.xlu1 %v4946_v46  ;;  %v4967_v55 = vpop.permute.xlu0 %4966 }
 0x839   :  { %13145 = vmatpush3.msra.mxu1 %v4967_v55  ;;  %13761 = vpow2.f32 %v4921_v44 }
 0x83a   :  { %v13756_v4 = vpop.eup %13755  ;;  %13154 = vmatprep.subr.mxu1 %v16522_v49 }
 0x83b   :  { %v4925_v50 = vsel %vm285_vm2, %v13756_v4, 0.0 }
 0x83c   :  { %4926 = vadd.xlane.f32.xlu0 %v4925_v50 }
 0x83e   :  { %v13758_v60 = vpop.eup %13757 }
 0x83f   :  { %v4931_v29 = vsel %vm285_vm2, %v13758_v60, 0.0 }
 0x840   :  { %4932 = vadd.xlane.f32.xlu0 %v4931_v29 }
 0x842   :  { %v13760_v0 = vpop.eup %13759 }
 0x843   :  { %v4937_v31 = vsel %vm285_vm2, %v13760_v0, 0.0 }
 0x846   :  { %v15028_v38 = vpop.eup %13761 }
 0x849   :  { %5351 = vrot.lane.b32.xlu1 %v14371_v1, %s14002_s27 }
 0x84d   :  { %5505 = vrot.lane.b32.xlu1 %v14357_v53, %s14002_s27  ;;  %v4943_v53 = vsel %vm285_vm2, %v15028_v38, 0.0 }
 0x856   :  { %5274 = vrot.lane.b32.xlu0 %v14213_v16, %s14002_s27  ;;  %v5121_v16 = vpop.permute.xlu1 %5120 }
 0x85a   :  { %v5198_v1 = vpop.permute.xlu1 %5197 }
 0x875   :  { %4938 = vadd.xlane.f32.xlu0 %v4937_v31 }
 0x879   :  { %4944 = vadd.xlane.f32.xlu0 %v4943_v53 }
 0x88f   :  { %5428 = vrot.lane.b32.xlu0 %v14195_v13, %s14002_s27 }
 0x8b1   :  { %v4930_v39 = vpop.xlane.xlu1 %4929 }
 0x8b2   :  { %13763 = vrcp.f32 %v4930_v39 }
 0x8b5   :  { %v4936_v5 = vpop.xlane.xlu1 %4935 }
 0x8b6   :  { %13765 = vrcp.f32 %v4936_v5 }
 0x8b9   :  { %v4942_v15 = vpop.xlane.xlu1 %4941 }
 0x8ba   :  { %13767 = vrcp.f32 %v4942_v15 }
 0x8bf   :  { %v13764_v7 = vpop.eup %13763 }
 0x8c0   :  { %v4958_v54 = vmul.f32 %v13764_v7, %v13748_v34 }
 0x8c1   :  { %v4948_v14 = vpop.xlane.xlu1 %4947 }
 0x8c2   :  { %13769 = vrcp.f32 %v4948_v14  ;;  %13152 = vmatmul.mubr.msk.f32.vlgmr.msra.gmra.mxu0 %vm285_vm2, %v4958_v54  ;;  %v13993_v54 = vld [vmem:[%s16511_s0 + $0x10] sm:$0xff] }
 0x8c3   :  { %v13766_v22 = vpop.eup %13765  ;;  %13160 = vmatpush3.msra.mxu0 %v5198_v1  ;;  %13161 = vmatprep.mubr.msk.f32.mxu0 %vm14001_vm1, %v16522_v49  ;;  %v13992_v1 = vld [vmem:[%s16511_s0] sm:$0xff] }
 0x8c4   :  { %13169 = vmatprep.subr.mxu0 %v16522_v49  ;;  %v4960_v13 = vmul.f32 %v13766_v22, %v13750_v27  ;;  %v13994_v22 = vld [vmem:[%s16511_s0 + $0x18] sm:$0xff] }
 0x8c5   :  { %v5352_v43 = vpop.permute.xlu1 %5351  ;;  %v4927_v40 = vpop.xlane.xlu0 %4926 }
 0x8c6   :  { %13771 = vrcp.f32 %v4927_v40  ;;  %13162 = vmatmul.mubr.msk.f32.vlgmr.msra.gmra.mxu0 %vm285_vm2, %v4960_v13 }
 0x8c7   :  { %v13768_v35 = vpop.eup %13767  ;;  %13170 = vmatpush3.msra.mxu0 %v5352_v43  ;;  %13171 = vmatprep.mubr.msk.f32.mxu0 %vm14001_vm1, %v16522_v49 }
 0x8c8   :  { %13179 = vmatprep.subr.mxu0 %v16522_v49  ;;  %v4962_v21 = vmul.f32 %v13768_v35, %v13752_v26 }
 0x8c9   :  { %v5506_v25 = vpop.permute.xlu1 %5505  ;;  %v4933_v45 = vpop.xlane.xlu0 %4932 }
 0x8ca   :  { %13773 = vrcp.f32 %v4933_v45  ;;  %13172 = vmatmul.mubr.msk.f32.vlgmr.msra.gmra.mxu0 %vm285_vm2, %v4962_v21  ;;  %v13995_v21 = vld [vmem:[%s16511_s0 + $0x20] sm:$0xff] }
 0x8cb   :  { %13180 = vmatpush3.msra.mxu0 %v5506_v25  ;;  %13181 = vmatprep.mubr.msk.f32.mxu0 %vm14001_vm1, %v16522_v49 }
 0x8cd   :  { %v5275_v3 = vpop.permute.xlu0 %5274 }
 0x8cf   :  { %v13770_v6 = vpop.eup %13769 }
 0x8d0   :  { %v4964_v56 = vmul.f32 %v13770_v6, %v13754_v47 }
 0x8d2   :  { %13182 = vmatmul.mubr.msk.f32.vlgmr.msra.gmra.mxu0 %vm285_vm2, %v4964_v56 }
 0x8d3   :  { %v13772_v8 = vpop.eup %13771 }
 0x8d4   :  { %v4957_v34 = vmul.f32 %v13772_v8, %v13756_v4 }
 0x8d6   :  { %13147 = vmatmul.mubr.msk.f32.vlgmr.msra.gmra.mxu1 %vm285_vm2, %v4957_v34  ;;  %v13996_v34 = vld [vmem:[%s16511_s0 + $0x30] sm:$0xff] }
 0x8d7   :  { %v13774_v23 = vpop.eup %13773  ;;  %13155 = vmatpush3.msra.mxu1 %v5121_v16  ;;  %13156 = vmatprep.mubr.msk.f32.mxu1 %vm14001_vm1, %v16522_v49 }
 0x8d8   :  { %13164 = vmatprep.subr.mxu1 %v16522_v49  ;;  %v4959_v12 = vmul.f32 %v13774_v23, %v13758_v60 }
 0x8da   :  { %13157 = vmatmul.mubr.msk.f32.vlgmr.msra.gmra.mxu1 %vm285_vm2, %v4959_v12 }
 0x8db   :  { %13165 = vmatpush3.msra.mxu1 %v5275_v3  ;;  %13166 = vmatprep.mubr.msk.f32.mxu1 %vm14001_vm1, %v16522_v49 }
 0x8dc   :  { %13174 = vmatprep.subr.mxu1 %v16522_v49 }
 0x8fe   :  { %v4939_v41 = vpop.xlane.xlu0 %4938 }
 0x8ff   :  { %13775 = vrcp.f32 %v4939_v41 }
 0x902   :  { %v4945_v36 = vpop.xlane.xlu0 %4944 }
 0x903   :  { %13777 = vrcp.f32 %v4945_v36 }
 0x906   :  { %v5429_v61 = vpop.permute.xlu0 %5428 }
 0x90c   :  { %v13776_v27 = vpop.eup %13775 }
 0x90d   :  { %v4961_v33 = vmul.f32 %v13776_v27, %v13760_v0  ;;  %v13991_v0 = vld [vmem:[%s16511_s0 + $0x38] sm:$0xff] }
 0x90f   :  { %13167 = vmatmul.mubr.msk.f32.vlgmr.msra.gmra.mxu1 %vm285_vm2, %v4961_v33 }
 0x910   :  { %v13778_v63 = vpop.eup %13777  ;;  %13175 = vmatpush3.msra.mxu1 %v5429_v61  ;;  %13176 = vmatprep.mubr.msk.f32.mxu1 %vm14001_vm1, %v16522_v49 }
 0x911   :  { %v4963_v58 = vmul.f32 %v13778_v63, %v15028_v38 }
 0x913   :  { %13177 = vmatmul.mubr.msk.f32.vlgmr.msra.gmra.mxu1 %vm285_vm2, %v4963_v58 }
 0x982   :  { %v5115_v26 = vpop.f32.mrf.mxu0 }
 0x983   :  { %v5582_v19 = vadd.f32 %v5115_v26, %v14950_v30  ;;  %v13990_v30 = vld [vmem:[%s16511_s0 + $0x28] sm:$0xff] }
 0x984   :  { %v13153_v37 = vpop.f32.mrf.mxu0 }
 0x985   :  { %v15063_v51 = vadd.f32 %v13989_v62, %v5582_v19 }
 0x986   :  { %v5269_v47 = vpop.f32.mrf.mxu0 }
 0x987   :  { %v5600_v46 = vsel %vm39_vm0, %v15063_v51, 0.0  ;;  %v5584_v5 = vadd.f32 %v5269_v47, %v14953_v9 }
 0x988   :  { %5601 = vadd.xlane.f32.xlu1 %v5600_v46  ;;  %v13163_v55 = vpop.f32.mrf.mxu0 }
 0x989   :  { %v15101_v13 = vadd.f32 %v13994_v22, %v5584_v5 }
 0x98a   :  { %v5423_v4 = vpop.f32.mrf.mxu0 }
 0x98b   :  { %v5586_v50 = vadd.f32 %v5423_v4, %v14956_v17 }
 0x98c   :  { %v13173_v60 = vpop.f32.mrf.mxu0 }
 0x98d   :  { %v15071_v29 = vadd.f32 %v13990_v30, %v5586_v50 }
 0x98f   :  { %v5612_v24 = vsel %vm39_vm0, %v15071_v29, 0.0 }
 0x990   :  { %5613 = vadd.xlane.f32.xlu1 %v5612_v24 }
 0x992   :  { %v5577_v2 = vpop.f32.mrf.mxu0 }
 0x993   :  { %v5588_v42 = vadd.f32 %v5577_v2, %v14959_v11 }
 0x994   :  { %v13183_v44 = vpop.f32.mrf.mxu0 }
 0x995   :  { %v15079_v17 = vadd.f32 %v13991_v0, %v5588_v42 }
 0x996   :  { %v5038_v31 = vpop.f32.mrf.mxu1 }
 0x997   :  { %v5581_v38 = vadd.f32 %v5038_v31, %v14965_v59  ;;  %v5618_v53 = vsel %vm39_vm0, %v15079_v17, 0.0 }
 0x998   :  { %5619 = vadd.xlane.f32.xlu1 %v5618_v53  ;;  %v13148_v16 = vpop.f32.mrf.mxu1 }
 0x999   :  { %v15087_v11 = vadd.f32 %v13992_v1, %v5581_v38  ;;  %v13609_v1 = vld [vmem:[%s16514_s2 + $0x8] sm:$0xff]  }
 0x99a   :  { %v5192_v39 = vpop.f32.mrf.mxu1  ;;  %13184 = vmatprep.subr.bf16.mxu1 %v13609_v1 }
 0x99b   :  { %v5583_v15 = vadd.f32 %v5192_v39, %v14971_v28  ;;  %v5597_v7 = vsel %vm39_vm0, %v15087_v11, 0.0  ;;  %v5606_v28 = vsel %vm39_vm0, %v15101_v13, 0.0  ;;  %v13610_v39 = vld [vmem:[%s16514_s2] sm:$0xff]   ;;  %13185 = vmatpush3.bf16.msra.mxu1 %v13609_v1 }
 0x99c   :  { %5598 = vadd.xlane.f32.xlu0 %v5597_v7  ;;  %v13158_v59 = vpop.f32.mrf.mxu1  ;;  %13186 = vmatprep.subr.bf16.mxu1 %v13610_v39 }
 0x99d   :  { %v15096_v14 = vadd.f32 %v13993_v54, %v5583_v15 }
 0x99f   :  { %v5603_v9 = vsel %vm39_vm0, %v15096_v14, 0.0  ;;  %13187 = vmatpush3.bf16.msra.mxu1 %v13610_v39 }
 0x9a0   :  { %5604 = vadd.xlane.f32.xlu0 %v5603_v9 }
 0x9a4   :  { %5607 = vadd.xlane.f32.xlu0 %v5606_v28 }
 0x9cf   :  { %v5346_v43 = vpop.f32.mrf.mxu1 }
 0x9d0   :  { %v5585_v40 = vadd.f32 %v5346_v43, %v14977_v48 }
 0x9d1   :  { %v13168_v35 = vpop.f32.mrf.mxu1 }
 0x9d2   :  { %v15111_v25 = vadd.f32 %v13995_v21, %v5585_v40 }
 0x9d3   :  { %v5500_v45 = vpop.f32.mrf.mxu1 }
 0x9d4   :  { %v5587_v6 = vadd.f32 %v5500_v45, %v14980_v20  ;;  %v5609_v56 = vsel %vm39_vm0, %v15111_v25, 0.0 }
 0x9d5   :  { %5610 = vadd.xlane.f32.xlu0 %v5609_v56  ;;  %v13178_v8 = vpop.f32.mrf.mxu1 }
 0x9d6   :  { %v15119_v48 = vadd.f32 %v13996_v34, %v5587_v6 }
 0x9d8   :  { %v5615_v23 = vsel %vm39_vm0, %v15119_v48, 0.0 }
 0x9d9   :  { %5616 = vadd.xlane.f32.xlu0 %v5615_v23 }
 0xa11   :  { %v5602_v12 = vpop.xlane.xlu1 %5601 }
 0xa12   :  { %v5622_v3 = vmul.f32 0.03125, %v5602_v12 }
 0xa14   :  { %v15124_v41 = vsub.f32 %v15063_v51, %v5622_v3 }
 0xa16   :  { %v5638_v20 = vmul.f32 %v15124_v41, %v15124_v41 }
 0xa18   :  { %v5648_v36 = vsel %vm39_vm0, %v5638_v20, 0.0 }
 0xa19   :  { %5649 = vadd.xlane.f32.xlu1 %v5648_v36  ;;  %v5614_v63 = vpop.xlane.xlu1 %5613 }
 0xa1a   :  { %v5626_v37 = vmul.f32 0.03125, %v5614_v63 }
 0xa1c   :  { %v15141_v60 = vsub.f32 %v15071_v29, %v5626_v37 }
 0xa1e   :  { %v5642_v31 = vmul.f32 %v15141_v60, %v15141_v60 }
 0xa20   :  { %v5660_v38 = vsel %vm39_vm0, %v5642_v31, 0.0 }
 0xa21   :  { %v5620_v46 = vpop.xlane.xlu1 %5619 }
 0xa22   :  { %v5628_v30 = vmul.f32 0.03125, %v5620_v46 }
 0xa24   :  { %v15150_v44 = vsub.f32 %v15079_v17, %v5628_v30 }
 0xa25   :  { %v5599_v27 = vpop.xlane.xlu0 %5598 }
 0xa26   :  { %v5621_v33 = vmul.f32 0.03125, %v5599_v27  ;;  %v5644_v53 = vmul.f32 %v15150_v44, %v15150_v44  ;;  %v16521_v27 = vsub.s32 3, %v14138_v10 }
 0xa28   :  { %v15130_v61 = vsub.f32 %v15087_v11, %v5621_v33  ;;  %v5666_v16 = vsel %vm39_vm0, %v5644_v53, 0.0 }
 0xa29   :  { %v5605_v58 = vpop.xlane.xlu0 %5604 }
 0xa2a   :  { %v5623_v26 = vmul.f32 0.03125, %v5605_v58  ;;  %v5637_v19 = vmul.f32 %v15130_v61, %v15130_v61  ;;  %v15182_v58 = vld [vmem:[%s16513_s4] sm:$0xff] }
 0xa2c   :  { %v15135_v62 = vsub.f32 %v15096_v14, %v5623_v26  ;;  %v5645_v47 = vsel %vm39_vm0, %v5637_v19, 0.0  ;;  %v5704_v26 = vrot.slane %v15182_v58, %v16521_v27  ;;  %v16520_v19 = vsub.s32 4, %v14138_v10 }
 0xa2d   :  { %5646 = vadd.xlane.f32.xlu0 %v5645_v47  ;;  %v5608_v55 = vpop.xlane.xlu0 %5607 }
 0xa2e   :  { %v5624_v4 = vmul.f32 0.03125, %v5608_v55  ;;  %v5639_v50 = vmul.f32 %v15135_v62, %v15135_v62  ;;  %v5716_v55 = vrot.slane %v15182_v58, %v16520_v19 }
 0xa30   :  { %v15144_v24 = vsub.f32 %v15101_v13, %v5624_v4  ;;  %v5651_v2 = vsel %vm39_vm0, %v5639_v50, 0.0 }
 0xa31   :  { %5652 = vadd.xlane.f32.xlu0 %v5651_v2 }
 0xa32   :  { %v5640_v42 = vmul.f32 %v15144_v24, %v15144_v24 }
 0xa34   :  { %v5654_v0 = vsel %vm39_vm0, %v5640_v42, 0.0 }
 0xa35   :  { %5655 = vadd.xlane.f32.xlu1 %v5654_v0 }
 0xa39   :  { %5661 = vadd.xlane.f32.xlu1 %v5660_v38 }
 0xa3d   :  { %5667 = vadd.xlane.f32.xlu1 %v5666_v16 }
 0xa5e   :  { %v5611_v5 = vpop.xlane.xlu0 %5610 }
 0xa5f   :  { %v5625_v15 = vmul.f32 0.03125, %v5611_v5 }
 0xa61   :  { %v15166_v7 = vsub.f32 %v15111_v25, %v5625_v15 }
 0xa62   :  { %v5617_v59 = vpop.xlane.xlu0 %5616 }
 0xa63   :  { %v5627_v54 = vmul.f32 0.03125, %v5617_v59  ;;  %v5641_v22 = vmul.f32 %v15166_v7, %v15166_v7 }
 0xa65   :  { %v15171_v9 = vsub.f32 %v15119_v48, %v5627_v54  ;;  %v5657_v28 = vsel %vm39_vm0, %v5641_v22, 0.0 }
 0xa66   :  { %5658 = vadd.xlane.f32.xlu0 %v5657_v28 }
 0xa67   :  { %v5643_v43 = vmul.f32 %v15171_v9, %v15171_v9 }
 0xa69   :  { %v5663_v40 = vsel %vm39_vm0, %v5643_v43, 0.0 }
 0xa6a   :  { %5664 = vadd.xlane.f32.xlu0 %v5663_v40 }
 0xaa2   :  { %v5650_v35 = vpop.xlane.xlu1 %5649 }
 0xaa3   :  { %v5670_v21 = vmul.f32 0.03125, %v5650_v35 }
 0xaa5   :  { %v5678_v45 = vadd.f32 1e-05, %v5670_v21 }
 0xaa7   :  { %13779 = vrsqrt.f32 %v5678_v45 }
 0xab4   :  { %v13780_v33 = vpop.eup %13779 }
 0xab5   :  { %v5694_v63 = vmul.f32 %v13780_v33, %v15124_v41 }
 0xab6   :  { %v5647_v6 = vpop.xlane.xlu0 %5646 }
 0xab7   :  { %v5669_v56 = vmul.f32 0.03125, %v5647_v6  ;;  %v5706_v46 = vmul.f32 %v5704_v26, %v5694_v63 }
 0xab9   :  { %v5677_v8 = vadd.f32 1e-05, %v5669_v56  ;;  %v5718_v2 = vadd.f32 %v5716_v55, %v5706_v46 }
 0xaba   :  { %v5653_v34 = vpop.xlane.xlu0 %5652 }
 0xabb   :  { %13781 = vrsqrt.f32 %v5677_v8  ;;  %v5671_v23 = vmul.f32 0.03125, %v5653_v34 }
 0xabd   :  { %v5679_v12 = vadd.f32 1e-05, %v5671_v23 }
 0xabe   :  { %v5656_v3 = vpop.xlane.xlu1 %5655 }
 0xabf   :  { %13783 = vrsqrt.f32 %v5679_v12  ;;  %v5672_v20 = vmul.f32 0.03125, %v5656_v3 }
 0xac1   :  { %v5680_v36 = vadd.f32 1e-05, %v5672_v20 }
 0xac2   :  { %v5662_v39 = vpop.xlane.xlu1 %5661 }
 0xac3   :  { %13785 = vrsqrt.f32 %v5680_v36  ;;  %v5674_v5 = vmul.f32 0.03125, %v5662_v39 }
 0xac5   :  { %v5682_v59 = vadd.f32 1e-05, %v5674_v5 }
 0xac6   :  { %v5668_v15 = vpop.xlane.xlu1 %5667 }
 0xac7   :  { %13787 = vrsqrt.f32 %v5682_v59 }
 0xac8   :  { %v13782_v37 = vpop.eup %13781 }
 0xac9   :  { %v5693_v47 = vmul.f32 %v13782_v37, %v15130_v61 }
 0xacb   :  { %v5705_v41 = vmul.f32 %v5704_v26, %v5693_v47 }
 0xacc   :  { %v13784_v4 = vpop.eup %13783 }
 0xacd   :  { %v5695_v50 = vmul.f32 %v13784_v4, %v15135_v62  ;;  %v5717_v30 = vadd.f32 %v5716_v55, %v5705_v41  ;;  %v5676_v62 = vmul.f32 0.03125, %v5668_v15  ;;  %v13616_v4 = vld [vmem:[%s16515_s3 + $0x10] sm:$0xff]  }
 0xacf   :  { %v5725_v42 = vpack.c.bf16 %v5718_v2, %v5717_v30  ;;  %v5707_v38 = vmul.f32 %v5704_v26, %v5695_v50  ;;  %v5684_v54 = vadd.f32 1e-05, %v5676_v62  ;;  %v13617_v50 = vld [vmem:[%s16515_s3 + $0x8] sm:$0xff]   ;;  %v13618_v30 = vld [vmem:[%s16515_s3] sm:$0xff]   ;;  %v15229_v2 = vsub.s32 2, %v14138_v10 }
 0xad0   :  { %v13786_v0 = vpop.eup %13785 }
 0xad1   :  { %v5696_v31 = vmul.f32 %v13786_v0, %v15144_v24  ;;  %13188 = vmatprep.mubr.msk.bf16.mxu1 %vm39_vm0, %v5725_v42  ;;  %v5719_v61 = vadd.f32 %v5716_v55, %v5707_v38  ;;  %13789 = vrsqrt.f32 %v5684_v54  ;;  %16540 = vst [vmem:[#allocation5_spill] sm:$0xff] %v15229_v2  ;;  %v5736_v42 = vrot.slane %v15182_v58, %v15229_v2 }
 0xad3   :  { %v5708_v53 = vmul.f32 %v5704_v26, %v5696_v31 }
 0xad4   :  { %v13788_v21 = vpop.eup %13787 }
 0xad5   :  { %v5720_v16 = vadd.f32 %v5716_v55, %v5708_v53  ;;  %v5698_v45 = vmul.f32 %v13788_v21, %v15141_v60 }
 0xad7   :  { %v5726_v1 = vpack.c.bf16 %v5720_v16, %v5719_v61  ;;  %v5710_v34 = vmul.f32 %v5704_v26, %v5698_v45 }
 0xad9   :  { %13189 = vmatmul.mubr.msk.bf16.vlgmr.msra.gmra.mxu1 %vm39_vm0, %v5726_v1  ;;  %v5722_v36 = vadd.f32 %v5716_v55, %v5710_v34 }
 0xade   :  { %v13790_v6 = vpop.eup %13789 }
 0xadf   :  { %v5700_v23 = vmul.f32 %v13790_v6, %v15150_v44  ;;  %v13611_v44 = vld [vmem:[%s16515_s3 + $0x38] sm:$0xff]  }
 0xae0   :  { %13196 = vmatprep.subr.bf16.mxu0 %v13611_v44 }
 0xae1   :  { %v5712_v63 = vmul.f32 %v5704_v26, %v5700_v23  ;;  %13197 = vmatpush3.bf16.msra.mxu0 %v13611_v44 }
 0xae3   :  { %v5724_v60 = vadd.f32 %v5716_v55, %v5712_v63 }
 0xaef   :  { %v5659_v22 = vpop.xlane.xlu0 %5658 }
 0xaf0   :  { %v5673_v28 = vmul.f32 0.03125, %v5659_v22 }
 0xaf2   :  { %v5681_v24 = vadd.f32 1e-05, %v5673_v28 }
 0xaf3   :  { %v5665_v43 = vpop.xlane.xlu0 %5664 }
 0xaf4   :  { %13791 = vrsqrt.f32 %v5681_v24  ;;  %v5675_v40 = vmul.f32 0.03125, %v5665_v43 }
 0xaf6   :  { %v5683_v35 = vadd.f32 1e-05, %v5675_v40 }
 0xaf8   :  { %13793 = vrsqrt.f32 %v5683_v35 }
 0xb01   :  { %v13792_v56 = vpop.eup %13791 }
 0xb02   :  { %v5697_v8 = vmul.f32 %v13792_v56, %v15166_v7  ;;  %v13612_v7 = vld [vmem:[%s16515_s3 + $0x30] sm:$0xff]  }
 0xb03   :  { %13198 = vmatprep.subr.bf16.mxu0 %v13612_v7 }
 0xb04   :  { %v5709_v12 = vmul.f32 %v5704_v26, %v5697_v8  ;;  %13199 = vmatpush3.bf16.msra.mxu0 %v13612_v7 }
 0xb05   :  { %v13794_v3 = vpop.eup %13793 }
 0xb06   :  { %v5721_v20 = vadd.f32 %v5716_v55, %v5709_v12  ;;  %v5699_v33 = vmul.f32 %v13794_v3, %v15171_v9  ;;  %v13613_v9 = vld [vmem:[%s16515_s3 + $0x28] sm:$0xff]  }
 0xb07   :  { %13200 = vmatprep.subr.bf16.mxu0 %v13613_v9 }
 0xb08   :  { %v5727_v37 = vpack.c.bf16 %v5722_v36, %v5721_v20  ;;  %v5711_v47 = vmul.f32 %v5704_v26, %v5699_v33  ;;  %13201 = vmatpush3.bf16.msra.mxu0 %v13613_v9  ;;  %v13614_v26 = vld [vmem:[%s16515_s3 + $0x20] sm:$0xff]  }
 0xb09   :  { %13202 = vmatprep.subr.bf16.mxu0 %v13614_v26 }
 0xb0a   :  { %13192 = vmatprep.mubr.msk.bf16.mxu1 %vm39_vm0, %v5727_v37  ;;  %v5723_v46 = vadd.f32 %v5716_v55, %v5711_v47  ;;  %v13615_v55 = vld [vmem:[%s16515_s3 + $0x18] sm:$0xff]  }
 0xb0c   :  { %v5728_v41 = vpack.c.bf16 %v5724_v60, %v5723_v46  ;;  %13203 = vmatpush3.bf16.msra.mxu0 %v13614_v26 }
 0xb0d   :  { %13204 = vmatprep.subr.bf16.mxu0 %v13615_v55 }
 0xb0e   :  { %13193 = vmatmul.mubr.msk.bf16.gmra.mxu1 %vm39_vm0, %v5728_v41 }
 0xb0f   :  { %6214 = vmatprep.mubr.bf16.mxu1 %v13999_v57 }
 0xb10   :  { %13205 = vmatpush3.bf16.msra.mxu0 %v13615_v55 }
 0xb11   :  { %13206 = vmatprep.subr.bf16.mxu0 %v13616_v4 }
 0xb14   :  { %13207 = vmatpush3.bf16.msra.mxu0 %v13616_v4 }
 0xb15   :  { %13208 = vmatprep.subr.bf16.mxu0 %v13617_v50 }
 0xb18   :  { %13209 = vmatpush3.bf16.msra.mxu0 %v13617_v50 }
 0xb19   :  { %13210 = vmatprep.subr.bf16.mxu0 %v13618_v30 }
 0xb1c   :  { %13211 = vmatpush3.bf16.msra.mxu0 %v13618_v30 }
 0xb1d   :  { %13220 = vmatprep.subr.mxu0 %v16522_v49 }
 0xb99   :  { %v13190_v0 = vpop.f32.mrf.mxu1 }
 0xb9a   :  { %v5804_v31 = vadd.f32 %v13190_v0, %v5736_v42 }
 0xb9b   :  { %v5795_v38 = vpop.f32.mrf.mxu1 }
 0xb9c   :  { %v5796_v53 = vadd.f32 %v5795_v38, %v5736_v42  ;;  %v5836_v61 = vmul.f32 0.70710677, %v5804_v31  ;;  %v5828_v8 = vmul.f32 0.5, %v5804_v31 }
 0xb9d   :  { %v13191_v16 = vpop.f32.mrf.mxu1 }
 0xb9e   :  { %v5834_v1 = vmul.f32 0.70710677, %v5796_v53  ;;  %v5807_v39 = vadd.f32 %v13191_v16, %v5736_v42  ;;  %v5826_v45 = vmul.f32 0.5, %v5796_v53 }
 0xb9f   :  { %v5798_v5 = vpop.f32.mrf.mxu1 }
 0xba0   :  { %13795 = verf.f32 %v5834_v1  ;;  %v5837_v15 = vmul.f32 0.70710677, %v5807_v39  ;;  %v5799_v59 = vadd.f32 %v5798_v5, %v5736_v42  ;;  %v5829_v21 = vmul.f32 0.5, %v5807_v39 }
 0xba1   :  { %13797 = verf.f32 %v5836_v61 }
 0xba2   :  { %13799 = verf.f32 %v5837_v15  ;;  %v5835_v62 = vmul.f32 0.70710677, %v5799_v59  ;;  %v5827_v6 = vmul.f32 0.5, %v5799_v59 }
 0xba4   :  { %13801 = verf.f32 %v5835_v62 }
 0xbad   :  { %v13796_v54 = vpop.eup %13795 }
 0xbae   :  { %v13798_v22 = vpop.eup %13797  ;;  %v5850_v24 = vadd.f32 1.0, %v13796_v54 }
 0xbaf   :  { %v13800_v28 = vpop.eup %13799  ;;  %v5852_v35 = vadd.f32 1.0, %v13798_v22 }
 0xbb0   :  { %v5853_v43 = vadd.f32 1.0, %v13800_v28  ;;  %v5858_v23 = vmul.f32 %v5850_v24, %v5826_v45  ;;  %v16519_v28 = vsub.s32 5, %v14138_v10 }
 0xbb1   :  { %v13802_v40 = vpop.eup %13801  ;;  %v5860_v3 = vmul.f32 %v5852_v35, %v5828_v8 }
 0xbb2   :  { %v5851_v56 = vadd.f32 1.0, %v13802_v40  ;;  %v5861_v34 = vmul.f32 %v5853_v43, %v5829_v21  ;;  %v5889_v24 = vrot.slane %v15182_v58, %v16519_v28 }
 0xbb4   :  { %v5859_v12 = vmul.f32 %v5851_v56, %v5827_v6  ;;  %v5867_v36 = vpack.c.bf16 %v5861_v34, %v5860_v3 }
 0xbb6   :  { %v5866_v20 = vpack.c.bf16 %v5859_v12, %v5858_v23 }
 0xbb8   :  { %13212 = vmatprep.mubr.bf16.mxu0 %v5866_v20 }
 0xbb9   :  { %13213 = vmatmul.mubr.bf16.vlgmr.msra.gmra.mxu0 %v5867_v36 }
 0xbce   :  { %v13194_v33 = vpop.f32.mrf.mxu1 }
 0xbcf   :  { %v5820_v63 = vadd.f32 %v13194_v33, %v5736_v42 }
 0xbd0   :  { %v5811_v37 = vpop.f32.mrf.mxu1 }
 0xbd1   :  { %v5812_v47 = vadd.f32 %v5811_v37, %v5736_v42  ;;  %v5840_v46 = vmul.f32 0.70710677, %v5820_v63  ;;  %v5832_v5 = vmul.f32 0.5, %v5820_v63 }
 0xbd2   :  { %v13195_v60 = vpop.f32.mrf.mxu1 }
 0xbd3   :  { %v5838_v41 = vmul.f32 0.70710677, %v5812_v47  ;;  %v5823_v44 = vadd.f32 %v13195_v60, %v5736_v42  ;;  %v5830_v16 = vmul.f32 0.5, %v5812_v47 }
 0xbd4   :  { %v5814_v7 = vpop.f32.mrf.mxu1 }
 0xbd5   :  { %13803 = verf.f32 %v5838_v41  ;;  %v5841_v9 = vmul.f32 0.70710677, %v5823_v44  ;;  %v5815_v26 = vadd.f32 %v5814_v7, %v5736_v42  ;;  %v5833_v61 = vmul.f32 0.5, %v5823_v44 }
 0xbd6   :  { %13805 = verf.f32 %v5840_v46 }
 0xbd7   :  { %13807 = verf.f32 %v5841_v9  ;;  %v5839_v55 = vmul.f32 0.70710677, %v5815_v26  ;;  %v5831_v1 = vmul.f32 0.5, %v5815_v26 }
 0xbd9   :  { %13809 = verf.f32 %v5839_v55 }
 0xbe2   :  { %v13804_v4 = vpop.eup %13803 }
 0xbe3   :  { %v13806_v50 = vpop.eup %13805  ;;  %v5854_v0 = vadd.f32 1.0, %v13804_v4 }
 0xbe4   :  { %v13808_v30 = vpop.eup %13807  ;;  %v5856_v53 = vadd.f32 1.0, %v13806_v50 }
 0xbe5   :  { %v5857_v31 = vadd.f32 1.0, %v13808_v30  ;;  %v5862_v59 = vmul.f32 %v5854_v0, %v5830_v16 }
 0xbe6   :  { %v13810_v38 = vpop.eup %13809  ;;  %v5864_v42 = vmul.f32 %v5856_v53, %v5832_v5 }
 0xbe7   :  { %v5855_v39 = vadd.f32 1.0, %v13810_v38  ;;  %v5865_v15 = vmul.f32 %v5857_v31, %v5833_v61 }
 0xbe9   :  { %v5863_v62 = vmul.f32 %v5855_v39, %v5831_v1  ;;  %v5869_v22 = vpack.c.bf16 %v5865_v15, %v5864_v42 }
 0xbeb   :  { %v5868_v54 = vpack.c.bf16 %v5863_v62, %v5862_v59 }
 0xbed   :  { %13216 = vmatprep.mubr.bf16.mxu0 %v5868_v54 }
 0xbee   :  { %13217 = vmatmul.mubr.bf16.gmra.mxu0 %v5869_v22  ;;  %v13621_v22 = vld [vmem:[%s16512_s1 + $0x34] ss:$8 sps:$4 sm:$0xff]  }
 0xbef   :  { %13222 = vmatprep.mubr.msk.f32.mxu0 %vm14001_vm1, %v16522_v49  ;;  %6194 = vmatprep.subr.bf16.mxu1 %v13621_v22 }
 0xc79   :  { %v13214_v43 = vpop.f32.mrf.mxu0 }
 0xc7a   :  { %v5981_v35 = vadd.f32 %v13214_v43, %v5889_v24  ;;  %v13624_v43 = vld [vmem:[%s16512_s1 + $0x24] ss:$8 sps:$4 sm:$0xff]  }
 0xc7b   :  { %v5972_v40 = vpop.f32.mrf.mxu0 }
 0xc7c   :  { %v5973_v21 = vadd.f32 %v5972_v40, %v5889_v24  ;;  %v15243_v8 = vadd.f32 %v5981_v35, %v15096_v14  ;;  %v13622_v40 = vld [vmem:[%s16512_s1 + $0x20] ss:$8 sps:$4 sm:$0xff]  }
 0xc7d   :  { %v13215_v45 = vpop.f32.mrf.mxu0 }
 0xc7e   :  { %v15240_v6 = vadd.f32 %v5973_v21, %v15087_v11  ;;  %16541 = vst [vmem:[#allocation6_spill] sm:$0xff] %v15243_v8  ;;  %v5984_v34 = vadd.f32 %v13215_v45, %v5889_v24  ;;  %v6019_v20 = vsel %vm39_vm0, %v15243_v8, 0.0 }
 0xc7f   :  { %v5975_v56 = vpop.f32.mrf.mxu0 }
 0xc80   :  { %v5976_v23 = vadd.f32 %v5975_v56, %v5889_v24  ;;  %v6013_v12 = vsel %vm39_vm0, %v15240_v6, 0.0  ;;  %v15251_v3 = vadd.f32 %v5984_v34, %v15101_v13 }
 0xc81   :  { %6014 = vadd.xlane.f32.xlu0 %v6013_v12 }
 0xc82   :  { %v15248_v58 = vadd.f32 %v5976_v23, %v15063_v51  ;;  %16543 = vst [vmem:[#allocation8_spill] sm:$0xff] %v15251_v3  ;;  %v6022_v14 = vsel %vm39_vm0, %v15251_v3, 0.0 }
 0xc84   :  { %16542 = vst [vmem:[#allocation7_spill] sm:$0xff] %v15248_v58  ;;  %v6016_v11 = vsel %vm39_vm0, %v15248_v58, 0.0 }
 0xc85   :  { %6017 = vadd.xlane.f32.xlu1 %v6016_v11  ;;  %6020 = vadd.xlane.f32.xlu0 %v6019_v20 }
 0xc89   :  { %6023 = vadd.xlane.f32.xlu1 %v6022_v14 }
 0xcae   :  { %v13218_v36 = vpop.f32.mrf.mxu0 }
 0xcaf   :  { %v5997_v63 = vadd.f32 %v13218_v36, %v5889_v24 }
 0xcb0   :  { %v5988_v33 = vpop.f32.mrf.mxu0 }
 0xcb1   :  { %v5989_v51 = vadd.f32 %v5988_v33, %v5889_v24  ;;  %v15263_v46 = vadd.f32 %v5997_v63, %v15119_v48 }
 0xcb2   :  { %v13219_v37 = vpop.f32.mrf.mxu0 }
 0xcb3   :  { %v15260_v13 = vadd.f32 %v5989_v51, %v15111_v25  ;;  %16545 = vst [vmem:[#allocation10_spill] sm:$0xff] %v15263_v46  ;;  %v6000_v60 = vadd.f32 %v13219_v37, %v5889_v24  ;;  %v6031_v26 = vsel %vm39_vm0, %v15263_v46, 0.0 }
 0xcb4   :  { %v5991_v47 = vpop.f32.mrf.mxu0 }
 0xcb5   :  { %16544 = vst [vmem:[#allocation9_spill] sm:$0xff] %v15260_v13  ;;  %v5992_v41 = vadd.f32 %v5991_v47, %v5889_v24  ;;  %v6025_v44 = vsel %vm39_vm0, %v15260_v13, 0.0  ;;  %v15271_v9 = vadd.f32 %v6000_v60, %v15079_v17  ;;  %v13619_v24 = vld [vmem:[%s16512_s1 + $0x30] ss:$8 sps:$4 sm:$0xff]  }
 0xcb6   :  { %6026 = vadd.xlane.f32.xlu0 %v6025_v44  ;;  %6195 = vmatpush1.bf16.msra.mxu1 %v13619_v24 }
 0xcb7   :  { %v15268_v7 = vadd.f32 %v5992_v41, %v15071_v29  ;;  %16547 = vst [vmem:[#allocation12_spill] sm:$0xff] %v15271_v9  ;;  %v6034_v48 = vsel %vm39_vm0, %v15271_v9, 0.0  ;;  %6196 = vmatprep.subr.bf16.mxu1 %v13624_v43 }
 0xcb9   :  { %16546 = vst [vmem:[#allocation11_spill] sm:$0xff] %v15268_v7  ;;  %v6028_v25 = vsel %vm39_vm0, %v15268_v7, 0.0 }
 0xcba   :  { %6029 = vadd.xlane.f32.xlu1 %v6028_v25  ;;  %6032 = vadd.xlane.f32.xlu0 %v6031_v26 }
 0xcbb   :  { %6197 = vmatpush1.bf16.msra.mxu1 %v13622_v40 }
 0xcbc   :  { %13230 = vmatprep.subr.mxu1 %v16522_v49 }
 0xcbe   :  { %6035 = vadd.xlane.f32.xlu1 %v6034_v48 }
 0xd0a   :  { %v6015_v55 = vpop.xlane.xlu0 %6014 }
 0xd0b   :  { %v6037_v4 = vmul.f32 0.03125, %v6015_v55 }
 0xd0d   :  { %v15280_v29 = vsub.f32 %v15240_v6, %v6037_v4 }
 0xd0e   :  { %v6018_v50 = vpop.xlane.xlu1 %6017  ;;  %v6021_v17 = vpop.xlane.xlu0 %6020 }
 0xd0f   :  { %v6038_v30 = vmul.f32 0.03125, %v6018_v50  ;;  %v6039_v0 = vmul.f32 0.03125, %v6021_v17  ;;  %v6053_v31 = vmul.f32 %v15280_v29, %v15280_v29 }
 0xd11   :  { %v15285_v38 = vsub.f32 %v15248_v58, %v6038_v30  ;;  %v15288_v53 = vsub.f32 %v15243_v8, %v6039_v0  ;;  %v6061_v61 = vsel %vm39_vm0, %v6053_v31, 0.0 }
 0xd12   :  { %v6024_v16 = vpop.xlane.xlu1 %6023  ;;  %6062 = vadd.xlane.f32.xlu0 %v6061_v61 }
 0xd13   :  { %v6040_v1 = vmul.f32 0.03125, %v6024_v16  ;;  %v6054_v39 = vmul.f32 %v15285_v38, %v15285_v38  ;;  %v6055_v5 = vmul.f32 %v15288_v53, %v15288_v53 }
 0xd15   :  { %v15296_v15 = vsub.f32 %v15251_v3, %v6040_v1  ;;  %v6064_v59 = vsel %vm39_vm0, %v6054_v39, 0.0  ;;  %v6067_v62 = vsel %vm39_vm0, %v6055_v5, 0.0  ;;  %v12423_v39 = vld [vmem:[%s16513_s4 + $0x8] sm:$0xff] }
 0xd16   :  { %6065 = vadd.xlane.f32.xlu1 %v6064_v59  ;;  %6068 = vadd.xlane.f32.xlu0 %v6067_v62  ;;  %v6120_v59 = vrot.slane %v12423_v39, %v14144_v18 }
 0xd17   :  { %v6056_v42 = vmul.f32 %v15296_v15, %v15296_v15 }
 0xd19   :  { %v6070_v54 = vsel %vm39_vm0, %v6056_v42, 0.0 }
 0xd1a   :  { %6071 = vadd.xlane.f32.xlu1 %v6070_v54  ;;  %v6132_v54 = vrot.slane %v12423_v39, %v14149_v32 }
 0xd3f   :  { %v6027_v35 = vpop.xlane.xlu0 %6026 }
 0xd40   :  { %v6041_v21 = vmul.f32 0.03125, %v6027_v35 }
 0xd42   :  { %v15317_v45 = vsub.f32 %v15260_v13, %v6041_v21 }
 0xd43   :  { %v6030_v56 = vpop.xlane.xlu1 %6029  ;;  %v6033_v34 = vpop.xlane.xlu0 %6032 }
 0xd44   :  { %v6042_v23 = vmul.f32 0.03125, %v6030_v56  ;;  %v6043_v12 = vmul.f32 0.03125, %v6033_v34  ;;  %v6057_v11 = vmul.f32 %v15317_v45, %v15317_v45 }
 0xd46   :  { %v15322_v20 = vsub.f32 %v15268_v7, %v6042_v23  ;;  %v15325_v14 = vsub.f32 %v15263_v46, %v6043_v12  ;;  %v6073_v36 = vsel %vm39_vm0, %v6057_v11, 0.0 }
 0xd47   :  { %v6036_v33 = vpop.xlane.xlu1 %6035  ;;  %6074 = vadd.xlane.f32.xlu0 %v6073_v36 }
 0xd48   :  { %v6044_v63 = vmul.f32 0.03125, %v6036_v33  ;;  %v6058_v51 = vmul.f32 %v15322_v20, %v15322_v20  ;;  %v6059_v37 = vmul.f32 %v15325_v14, %v15325_v14 }
 0xd4a   :  { %v15333_v47 = vsub.f32 %v15271_v9, %v6044_v63  ;;  %v6076_v60 = vsel %vm39_vm0, %v6058_v51, 0.0  ;;  %v6079_v41 = vsel %vm39_vm0, %v6059_v37, 0.0 }
 0xd4b   :  { %6077 = vadd.xlane.f32.xlu1 %v6076_v60  ;;  %6080 = vadd.xlane.f32.xlu0 %v6079_v41 }
 0xd4c   :  { %v6060_v44 = vmul.f32 %v15333_v47, %v15333_v47 }
 0xd4e   :  { %v6082_v25 = vsel %vm39_vm0, %v6060_v44, 0.0 }
 0xd4f   :  { %6083 = vadd.xlane.f32.xlu1 %v6082_v25 }
 0xd9b   :  { %v6063_v26 = vpop.xlane.xlu0 %6062 }
 0xd9c   :  { %v6085_v48 = vmul.f32 0.03125, %v6063_v26 }
 0xd9e   :  { %v6093_v55 = vadd.f32 1e-05, %v6085_v48 }
 0xd9f   :  { %v6066_v4 = vpop.xlane.xlu1 %6065  ;;  %v6069_v50 = vpop.xlane.xlu0 %6068 }
 0xda0   :  { %13811 = vrsqrt.f32 %v6093_v55  ;;  %v6086_v17 = vmul.f32 0.03125, %v6066_v4  ;;  %v6087_v30 = vmul.f32 0.03125, %v6069_v50 }
 0xda2   :  { %v6094_v0 = vadd.f32 1e-05, %v6086_v17  ;;  %v6095_v31 = vadd.f32 1e-05, %v6087_v30 }
 0xda3   :  { %v6072_v61 = vpop.xlane.xlu1 %6071 }
 0xda4   :  { %13813 = vrsqrt.f32 %v6094_v0  ;;  %v6088_v16 = vmul.f32 0.03125, %v6072_v61 }
 0xda5   :  { %13815 = vrsqrt.f32 %v6095_v31 }
 0xda6   :  { %v6096_v1 = vadd.f32 1e-05, %v6088_v16 }
 0xda8   :  { %13817 = vrsqrt.f32 %v6096_v1 }
 0xdad   :  { %v13812_v5 = vpop.eup %13811 }
 0xdae   :  { %v6109_v62 = vmul.f32 %v13812_v5, %v15280_v29 }
 0xdb0   :  { %v6121_v22 = vmul.f32 %v6120_v59, %v6109_v62 }
 0xdb1   :  { %v13814_v42 = vpop.eup %13813 }
 0xdb2   :  { %v6110_v24 = vmul.f32 %v13814_v42, %v15285_v38  ;;  %v13816_v43 = vpop.eup %13815  ;;  %v6133_v21 = vadd.f32 %v6132_v54, %v6121_v22 }
 0xdb3   :  { %v6111_v34 = vmul.f32 %v13816_v43, %v15288_v53 }
 0xdb4   :  { %v6122_v40 = vmul.f32 %v6120_v59, %v6110_v24 }
 0xdb5   :  { %v13818_v35 = vpop.eup %13817  ;;  %v6123_v29 = vmul.f32 %v6120_v59, %v6111_v34 }
 0xdb6   :  { %v6134_v56 = vadd.f32 %v6132_v54, %v6122_v40  ;;  %v6112_v23 = vmul.f32 %v13818_v35, %v15296_v15 }
 0xdb7   :  { %v6135_v33 = vadd.f32 %v6132_v54, %v6123_v29 }
 0xdb8   :  { %v6141_v12 = vpack.c.bf16 %v6134_v56, %v6133_v21  ;;  %v6124_v11 = vmul.f32 %v6120_v59, %v6112_v23 }
 0xdba   :  { %12432 = vmatmul.mubr.msk.bf16.vlgmr.msra.gmra.mxu1 %vm39_vm0, %v6141_v12  ;;  %v6136_v36 = vadd.f32 %v6132_v54, %v6124_v11 }
 0xdbb   :  { %6224 = vmatprep.mubr.bf16.mxu1 %v13999_v57 }
 0xdbc   :  { %v6142_v63 = vpack.c.bf16 %v6136_v36, %v6135_v33 }
 0xdc2   :  { %12433 = vmatmul.mubr.msk.bf16.gmra.mxu1 %vm39_vm0, %v6142_v63 }
 0xdc3   :  { %6234 = vmatprep.mubr.bf16.mxu1 %v13999_v57 }
 0xdd0   :  { %v6075_v38 = vpop.xlane.xlu0 %6074 }
 0xdd1   :  { %v6089_v51 = vmul.f32 0.03125, %v6075_v38 }
 0xdd3   :  { %v6097_v37 = vadd.f32 1e-05, %v6089_v51 }
 0xdd4   :  { %v6078_v53 = vpop.xlane.xlu1 %6077  ;;  %v6081_v60 = vpop.xlane.xlu0 %6080 }
 0xdd5   :  { %13819 = vrsqrt.f32 %v6097_v37  ;;  %v6090_v15 = vmul.f32 0.03125, %v6078_v53  ;;  %v6091_v41 = vmul.f32 0.03125, %v6081_v60 }
 0xdd7   :  { %v6098_v44 = vadd.f32 1e-05, %v6090_v15  ;;  %v6099_v25 = vadd.f32 1e-05, %v6091_v41 }
 0xdd8   :  { %v6084_v26 = vpop.xlane.xlu1 %6083 }
 0xdd9   :  { %13821 = vrsqrt.f32 %v6098_v44  ;;  %v6092_v48 = vmul.f32 0.03125, %v6084_v26 }
 0xdda   :  { %13823 = vrsqrt.f32 %v6099_v25 }
 0xddb   :  { %v6100_v55 = vadd.f32 1e-05, %v6092_v48 }
 0xddd   :  { %13825 = vrsqrt.f32 %v6100_v55 }
 0xde2   :  { %v13820_v4 = vpop.eup %13819 }
 0xde3   :  { %v6113_v50 = vmul.f32 %v13820_v4, %v15317_v45 }
 0xde5   :  { %v6125_v0 = vmul.f32 %v6120_v59, %v6113_v50 }
 0xde6   :  { %v13822_v17 = vpop.eup %13821 }
 0xde7   :  { %v6114_v30 = vmul.f32 %v13822_v17, %v15322_v20  ;;  %v13824_v31 = vpop.eup %13823  ;;  %v6137_v1 = vadd.f32 %v6132_v54, %v6125_v0 }
 0xde8   :  { %v6115_v5 = vmul.f32 %v13824_v31, %v15325_v14 }
 0xde9   :  { %v6126_v61 = vmul.f32 %v6120_v59, %v6114_v30 }
 0xdea   :  { %v13826_v16 = vpop.eup %13825  ;;  %v6127_v24 = vmul.f32 %v6120_v59, %v6115_v5 }
 0xdeb   :  { %v6138_v39 = vadd.f32 %v6132_v54, %v6126_v61  ;;  %v6116_v62 = vmul.f32 %v13826_v16, %v15333_v47 }
 0xdec   :  { %v6139_v43 = vadd.f32 %v6132_v54, %v6127_v24 }
 0xded   :  { %v6143_v42 = vpack.c.bf16 %v6138_v39, %v6137_v1  ;;  %v6128_v22 = vmul.f32 %v6120_v59, %v6116_v62 }
 0xdef   :  { %12434 = vmatmul.mubr.msk.bf16.gmra.mxu1 %vm39_vm0, %v6143_v42  ;;  %v6140_v45 = vadd.f32 %v6132_v54, %v6128_v22 }
 0xdf0   :  { %6244 = vmatprep.mubr.bf16.mxu1 %v13999_v57 }
 0xdf1   :  { %v6144_v20 = vpack.c.bf16 %v6140_v45, %v6139_v43 }
 0xdf7   :  { %12435 = vmatmul.mubr.msk.bf16.gmra.mxu1 %vm39_vm0, %v6144_v20 }
 0xdf8   :  { %13232 = vmatprep.mubr.msk.f32.mxu1 %vm14001_vm1, %v16522_v49 }
 0xe7a   :  { %v15362_v40 = vpop.f32.mrf.mxu1 }
 0xe7b   :  { %6256 = vrot.lane.b32.xlu0 %v15362_v40, %s14002_s27 }
 0xe7c   :  { %v15366_v14 = vpop.f32.mrf.mxu1 }
 0xe7e   :  { %v15368_v47 = vpop.f32.mrf.mxu1 }
 0xe7f   :  { %6969 = vrot.lane.b32.xlu0 %v15362_v40, %s14003_s28  ;;  %6333 = vrot.lane.b32.xlu1 %v15368_v47, %s14002_s27 }
 0xe80   :  { %v15374_v57 = vpop.f32.mrf.mxu1 }
 0xe82   :  { %v15380_v59 = vpop.f32.mrf.mxu1 }
 0xe83   :  { %6967 = vrot.lane.b32.xlu0 %v15362_v40, %s14004_s29  ;;  %7047 = vrot.lane.b32.xlu1 %v15368_v47, %s14003_s28 }
 0xe84   :  { %v15386_v54 = vpop.f32.mrf.mxu1 }
 0xe86   :  { %v15390_v35 = vpop.f32.mrf.mxu1 }
 0xe87   :  { %7045 = vrot.lane.b32.xlu1 %v15368_v47, %s14004_s29  ;;  %7125 = vrot.lane.b32.xlu0 %v15380_v59, %s14003_s28 }
 0xe88   :  { %v15396_v21 = vpop.f32.mrf.mxu1 }
 0xe8b   :  { %6410 = vrot.lane.b32.xlu1 %v15380_v59, %s14002_s27 }
 0xe8f   :  { %6487 = vrot.lane.b32.xlu1 %v15390_v35, %s14002_s27 }
 0xe93   :  { %7203 = vrot.lane.b32.xlu1 %v15390_v35, %s14003_s28 }
 0xeaf   :  { %v15398_v56 = vpop.f32.mrf.mxu1 }
 0xeb0   :  { %6564 = vrot.lane.b32.xlu0 %v15398_v56, %s14002_s27 }
 0xeb1   :  { %v15402_v34 = vpop.f32.mrf.mxu1 }
 0xeb3   :  { %v15404_v23 = vpop.f32.mrf.mxu1 }
 0xeb4   :  { %6641 = vrot.lane.b32.xlu1 %v15404_v23, %s14002_s27 }
 0xeb5   :  { %v15408_v12 = vpop.f32.mrf.mxu1 }
 0xeb7   :  { %v15410_v11 = vpop.f32.mrf.mxu1 }
 0xeb8   :  { %6718 = vrot.lane.b32.xlu0 %v15410_v11, %s14002_s27 }
 0xeb9   :  { %v15414_v29 = vpop.f32.mrf.mxu1 }
 0xebb   :  { %v15416_v36 = vpop.f32.mrf.mxu1 }
 0xebc   :  { %7123 = vrot.lane.b32.xlu0 %v15380_v59, %s14004_s29  ;;  %6795 = vrot.lane.b32.xlu1 %v15416_v36, %s14002_s27 }
 0xec0   :  { %7281 = vrot.lane.b32.xlu0 %v15398_v56, %s14003_s28  ;;  %7201 = vrot.lane.b32.xlu1 %v15390_v35, %s14004_s29 }
 0xec4   :  { %7279 = vrot.lane.b32.xlu0 %v15398_v56, %s14004_s29  ;;  %7359 = vrot.lane.b32.xlu1 %v15404_v23, %s14003_s28 }
 0xec8   :  { %7437 = vrot.lane.b32.xlu0 %v15410_v11, %s14003_s28  ;;  %7357 = vrot.lane.b32.xlu1 %v15404_v23, %s14004_s29 }
 0xecc   :  { %7435 = vrot.lane.b32.xlu0 %v15410_v11, %s14004_s29  ;;  %7515 = vrot.lane.b32.xlu1 %v15416_v36, %s14003_s28 }
 0xed0   :  { %7687 = vrot.lane.b32.xlu0 %v15362_v40, %s14005_s30  ;;  %7513 = vrot.lane.b32.xlu1 %v15416_v36, %s14004_s29 }
 0xed4   :  { %7839 = vrot.lane.b32.xlu0 %v15380_v59, %s14005_s30  ;;  %7763 = vrot.lane.b32.xlu1 %v15368_v47, %s14005_s30 }
 0xed8   :  { %8143 = vrot.lane.b32.xlu0 %v15410_v11, %s14005_s30  ;;  %7915 = vrot.lane.b32.xlu1 %v15390_v35, %s14005_s30 }
 0xedc   :  { %7991 = vrot.lane.b32.xlu1 %v15398_v56, %s14005_s30 }
 0xee0   :  { %8067 = vrot.lane.b32.xlu1 %v15404_v23, %s14005_s30 }
 0xee4   :  { %8219 = vrot.lane.b32.xlu1 %v15416_v36, %s14005_s30 }
 0xeed   :  { %v6257_v33 = vpop.permute.xlu0 %6256 }
 0xeee   :  { %13221 = vmatpush3.xpose.msk.msra.mxu0 %vm285_vm2, %v6257_v33 }
 0xeef   :  { %13225 = vmatprep.subr.mxu0 %v16522_v49 }
 0xef1   :  { %v6334_v63 = vpop.permute.xlu1 %6333  ;;  %13223 = vmatmul.mubr.msk.f32.vlgmr.msra.gmra.mxu0 %vm285_vm2, %v15362_v40  ;;  %v6970_v60 = vpop.permute.xlu0 %6969 }
 0xef2   :  { %13226 = vmatpush3.xpose.msk.msra.mxu0 %vm285_vm2, %v6334_v63  ;;  %13227 = vmatprep.mubr.msk.f32.mxu0 %vm14001_vm1, %v16522_v49 }
 0xef3   :  { %13235 = vmatprep.subr.mxu0 %v16522_v49 }
 0xef5   :  { %v7048_v38 = vpop.permute.xlu1 %7047  ;;  %13228 = vmatmul.mubr.msk.f32.vlgmr.msra.gmra.mxu0 %vm285_vm2, %v15368_v47  ;;  %v6968_v15 = vpop.permute.xlu0 %6967 }
 0xef6   :  { %13237 = vmatprep.mubr.msk.f32.mxu0 %vm14001_vm1, %v16522_v49 }
 0xef9   :  { %v7046_v51 = vpop.permute.xlu1 %7045  ;;  %v7126_v41 = vpop.permute.xlu0 %7125 }
 0xefd   :  { %v6411_v37 = vpop.permute.xlu1 %6410 }
 0xefe   :  { %13231 = vmatpush3.xpose.msk.msra.mxu1 %vm285_vm2, %v6411_v37 }
 0xeff   :  { %13240 = vmatprep.subr.mxu1 %v16522_v49 }
 0xf01   :  { %v6488_v53 = vpop.permute.xlu1 %6487  ;;  %13233 = vmatmul.mubr.msk.f32.vlgmr.msra.gmra.mxu1 %vm285_vm2, %v15380_v59 }
 0xf02   :  { %13236 = vmatpush3.xpose.msk.msra.mxu0 %vm285_vm2, %v6488_v53  ;;  %13242 = vmatprep.mubr.msk.f32.mxu1 %vm14001_vm1, %v16522_v49 }
 0xf03   :  { %13245 = vmatprep.subr.mxu0 %v16522_v49 }
 0xf05   :  { %13238 = vmatmul.mubr.msk.f32.vlgmr.msra.gmra.mxu0 %vm285_vm2, %v15390_v35  ;;  %v7204_v44 = vpop.permute.xlu1 %7203 }
 0xf06   :  { %13247 = vmatprep.mubr.msk.f32.mxu0 %vm14001_vm1, %v16522_v49 }
 0xf22   :  { %v6565_v25 = vpop.permute.xlu0 %6564 }
 0xf23   :  { %13241 = vmatpush3.xpose.msk.msra.mxu1 %vm285_vm2, %v6565_v25 }
 0xf24   :  { %13250 = vmatprep.subr.mxu1 %v16522_v49 }
 0xf26   :  { %v6642_v26 = vpop.permute.xlu1 %6641  ;;  %13243 = vmatmul.mubr.msk.f32.vlgmr.msra.gmra.mxu1 %vm285_vm2, %v15398_v56 }
 0xf27   :  { %13246 = vmatpush3.xpose.msk.msra.mxu0 %vm285_vm2, %v6642_v26  ;;  %13252 = vmatprep.mubr.msk.f32.mxu1 %vm14001_vm1, %v16522_v49 }
 0xf28   :  { %13255 = vmatprep.subr.mxu0 %v16522_v49 }
 0xf2a   :  { %13248 = vmatmul.mubr.msk.f32.vlgmr.msra.gmra.mxu0 %vm285_vm2, %v15404_v23  ;;  %v6719_v48 = vpop.permute.xlu0 %6718 }
 0xf2b   :  { %13251 = vmatpush3.xpose.msk.msra.mxu1 %vm285_vm2, %v6719_v48  ;;  %13257 = vmatprep.mubr.msk.f32.mxu0 %vm14001_vm1, %v16522_v49 }
 0xf2c   :  { %13260 = vmatprep.subr.mxu1 %v16522_v49 }
 0xf2e   :  { %v6796_v55 = vpop.permute.xlu1 %6795  ;;  %13253 = vmatmul.mubr.msk.f32.vlgmr.msra.gmra.mxu1 %vm285_vm2, %v15410_v11  ;;  %v7124_v4 = vpop.permute.xlu0 %7123 }
 0xf2f   :  { %13256 = vmatpush3.xpose.msk.msra.mxu0 %vm285_vm2, %v6796_v55  ;;  %13261 = vmatpush3.xpose.msk.msra.mxu1 %vm285_vm2, %v6970_v60 }
 0xf30   :  { %13262 = vmatprep.mubr.msk.f32.mxu1 %vm14001_vm1, %v16522_v49  ;;  %13265 = vmatprep.subr.mxu0 %v16522_v49 }
 0xf31   :  { %13270 = vmatprep.subr.mxu1 %v16522_v49 }
 0xf32   :  { %v7202_v50 = vpop.permute.xlu1 %7201  ;;  %13258 = vmatmul.mubr.msk.f32.vlgmr.msra.gmra.mxu0 %vm285_vm2, %v15416_v36  ;;  %13263 = vmatmul.mubr.msk.f32.vlgmr.msra.gmra.mxu1 %vm285_vm2, %v6968_v15  ;;  %v7282_v17 = vpop.permute.xlu0 %7281 }
 0xf33   :  { %13266 = vmatpush3.xpose.msk.msra.mxu0 %vm285_vm2, %v7048_v38  ;;  %13271 = vmatpush3.xpose.msk.msra.mxu1 %vm285_vm2, %v7126_v41  ;;  %v15558_v38 = vpop.f32.mrf.mxu1 }
 0xf34   :  { %13267 = vmatprep.mubr.msk.f32.mxu0 %vm14001_vm1, %v16522_v49  ;;  %13272 = vmatprep.mubr.msk.f32.mxu1 %vm14001_vm1, %v16522_v49 }
 0xf35   :  { %13275 = vmatprep.subr.mxu0 %v16522_v49  ;;  %13280 = vmatprep.subr.mxu1 %v16522_v49 }
 0xf36   :  { %v7360_v30 = vpop.permute.xlu1 %7359  ;;  %13268 = vmatmul.mubr.msk.f32.vlgmr.msra.gmra.mxu0 %vm285_vm2, %v7046_v51  ;;  %13273 = vmatmul.mubr.msk.f32.vlgmr.msra.gmra.mxu1 %vm285_vm2, %v7124_v4  ;;  %v7280_v0 = vpop.permute.xlu0 %7279 }
 0xf37   :  { %13276 = vmatpush3.xpose.msk.msra.mxu0 %vm285_vm2, %v7204_v44  ;;  %13281 = vmatpush3.xpose.msk.msra.mxu1 %vm285_vm2, %v7282_v17 }
 0xf38   :  { %13277 = vmatprep.mubr.msk.f32.mxu0 %vm14001_vm1, %v16522_v49  ;;  %13282 = vmatprep.mubr.msk.f32.mxu1 %vm14001_vm1, %v16522_v49 }
 0xf39   :  { %13285 = vmatprep.subr.mxu0 %v16522_v49  ;;  %13290 = vmatprep.subr.mxu1 %v16522_v49 }
 0xf3a   :  { %v7358_v31 = vpop.permute.xlu1 %7357  ;;  %13278 = vmatmul.mubr.msk.f32.vlgmr.msra.gmra.mxu0 %vm285_vm2, %v7202_v50  ;;  %13283 = vmatmul.mubr.msk.f32.vlgmr.msra.gmra.mxu1 %vm285_vm2, %v7280_v0  ;;  %v7438_v61 = vpop.permute.xlu0 %7437 }
 0xf3b   :  { %13286 = vmatpush3.xpose.msk.msra.mxu0 %vm285_vm2, %v7360_v30  ;;  %13291 = vmatpush3.xpose.msk.msra.mxu1 %vm285_vm2, %v7438_v61 }
 0xf3c   :  { %13287 = vmatprep.mubr.msk.f32.mxu0 %vm14001_vm1, %v16522_v49  ;;  %13292 = vmatprep.mubr.msk.f32.mxu1 %vm14001_vm1, %v16522_v49 }
 0xf3d   :  { %13295 = vmatprep.subr.mxu0 %v16522_v49  ;;  %13300 = vmatprep.subr.mxu1 %v16522_v49 }
 0xf3e   :  { %v7516_v16 = vpop.permute.xlu1 %7515  ;;  %13288 = vmatmul.mubr.msk.f32.vlgmr.msra.gmra.mxu0 %vm285_vm2, %v7358_v31  ;;  %v7436_v1 = vpop.permute.xlu0 %7435 }
 0xf3f   :  { %13293 = vmatmul.mubr.msk.f32.vlgmr.msra.gmra.mxu1 %vm285_vm2, %v7436_v1  ;;  %13296 = vmatpush3.xpose.msk.msra.mxu0 %vm285_vm2, %v7516_v16 }
 0xf40   :  { %13297 = vmatprep.mubr.msk.f32.mxu0 %vm14001_vm1, %v16522_v49  ;;  %13305 = vmatprep.subr.mxu0 %v16522_v49 }
 0xf41   :  { %13302 = vmatprep.mubr.msk.f32.mxu1 %vm14001_vm1, %v16522_v49 }
 0xf42   :  { %v7514_v39 = vpop.permute.xlu1 %7513  ;;  %v7688_v5 = vpop.permute.xlu0 %7687 }
 0xf43   :  { %13298 = vmatmul.mubr.msk.f32.vlgmr.msra.gmra.mxu0 %vm285_vm2, %v7514_v39  ;;  %13301 = vmatpush3.msra.mxu1 %v7688_v5 }
 0xf44   :  { %13310 = vmatprep.subr.mxu1 %v16522_v49  ;;  %13307 = vmatprep.mubr.msk.f32.mxu0 %vm14001_vm1, %v16522_v49 }
 0xf46   :  { %v7764_v62 = vpop.permute.xlu1 %7763 }
 0xf47   :  { %13306 = vmatpush3.msra.mxu0 %v7764_v62 }
 0xf48   :  { %13315 = vmatprep.subr.mxu0 %v16522_v49 }
 0xfb1   :  { %v6328_v42 = vpop.f32.mrf.mxu0 }
 0xfb2   :  { %v15548_v22 = vsel %vm37_vm3, %v6328_v42, -1e+30 }
 0xfb3   :  { %v6879_v24 = vsel %vm285_vm2, %v15548_v22, -inf  ;;  %v13224_v45 = vpop.f32.mrf.mxu0 }
 0xfb4   :  { %6880 = vmax.xlane.f32.xlu0 %v6879_v24 }
 0xfb5   :  { %v6405_v43 = vpop.f32.mrf.mxu0 }
 0xfb6   :  { %v15554_v20 = vsel %vm37_vm3, %v6405_v43, -1e+30 }
 0xfb7   :  { %v6882_v33 = vsel %vm285_vm2, %v15554_v20, -inf  ;;  %v13229_v63 = vpop.f32.mrf.mxu0 }
 0xfb8   :  { %6883 = vmax.xlane.f32.xlu1 %v6882_v33 }
 0xfc1   :  { %v6482_v51 = vpop.f32.mrf.mxu1 }
 0xfc2   :  { %v15562_v37 = vsel %vm37_vm3, %v6482_v51, -1e+30 }
 0xfc3   :  { %v6885_v53 = vsel %vm285_vm2, %v15562_v37, -inf  ;;  %v13234_v60 = vpop.f32.mrf.mxu1 }
 0xfc4   :  { %6886 = vmax.xlane.f32.xlu0 %v6885_v53 }
 0xfc5   :  { %v6559_v15 = vpop.f32.mrf.mxu0 }
 0xfc6   :  { %v15568_v41 = vsel %vm37_vm3, %v6559_v15, -1e+30 }
 0xfc7   :  { %v6888_v44 = vsel %vm285_vm2, %v15568_v41, -inf  ;;  %v13239_v25 = vpop.f32.mrf.mxu0 }
 0xfc8   :  { %6889 = vmax.xlane.f32.xlu1 %v6888_v44 }
 0xfe6   :  { %v6636_v26 = vpop.f32.mrf.mxu1 }
 0xfe7   :  { %v15574_v48 = vsel %vm37_vm3, %v6636_v26, -1e+30 }
 0xfe8   :  { %v6891_v55 = vsel %vm285_vm2, %v15574_v48, -inf  ;;  %v13244_v4 = vpop.f32.mrf.mxu1 }
 0xfe9   :  { %6892 = vmax.xlane.f32.xlu0 %v6891_v55 }
 0xfea   :  { %v6713_v50 = vpop.f32.mrf.mxu0 }
 0xfeb   :  { %v15580_v17 = vsel %vm37_vm3, %v6713_v50, -1e+30 }
 0xfec   :  { %v6894_v30 = vsel %vm285_vm2, %v15580_v17, -inf  ;;  %v13249_v0 = vpop.f32.mrf.mxu0 }
 0xfed   :  { %6895 = vmax.xlane.f32.xlu1 %v6894_v30 }
 0xfee   :  { %v6790_v31 = vpop.f32.mrf.mxu1 }
 0xfef   :  { %v15586_v61 = vsel %vm37_vm3, %v6790_v31, -1e+30 }
 0xff0   :  { %v6897_v16 = vsel %vm285_vm2, %v15586_v61, -inf  ;;  %v13254_v1 = vpop.f32.mrf.mxu1 }
 0xff1   :  { %6898 = vmax.xlane.f32.xlu0 %v6897_v16 }
 0xff2   :  { %v6867_v39 = vpop.f32.mrf.mxu0  ;;  %v7041_v5 = vpop.f32.mrf.mxu1 }
 0xff3   :  { %v15592_v62 = vsel %vm37_vm3, %v6867_v39, -1e+30  ;;  %v15596_v42 = vsel %vm37_vm3, %v7041_v5, -1e+30 }
 0xff4   :  { %v6900_v24 = vsel %vm285_vm2, %v15592_v62, -inf  ;;  %v7599_v45 = vsel %vm285_vm2, %v15596_v42, -inf  ;;  %v13259_v43 = vpop.f32.mrf.mxu0  ;;  %v13264_v33 = vpop.f32.mrf.mxu1 }
 0xff5   :  { %6901 = vmax.xlane.f32.xlu1 %v6900_v24  ;;  %7600 = vmax.xlane.f32.xlu0 %v7599_v45 }
 0xff6   :  { %v7119_v63 = vpop.f32.mrf.mxu0  ;;  %v7197_v51 = vpop.f32.mrf.mxu1 }
 0xff7   :  { %v15604_v53 = vsel %vm37_vm3, %v7119_v63, -1e+30  ;;  %v15608_v60 = vsel %vm37_vm3, %v7197_v51, -1e+30 }
 0xff8   :  { %v7602_v15 = vsel %vm285_vm2, %v15604_v53, -inf  ;;  %v7605_v44 = vsel %vm285_vm2, %v15608_v60, -inf  ;;  %v13269_v25 = vpop.f32.mrf.mxu0  ;;  %v13274_v26 = vpop.f32.mrf.mxu1 }
 0xff9   :  { %7603 = vmax.xlane.f32.xlu1 %v7602_v15  ;;  %7606 = vmax.xlane.f32.xlu0 %v7605_v44  ;;  %v15648_v25 = vpop.permute.xlu0 %7839 }
 0xffa   :  { %v7275_v55 = vpop.f32.mrf.mxu0  ;;  %v7353_v4 = vpop.f32.mrf.mxu1 }
 0xffb   :  { %v15616_v50 = vsel %vm37_vm3, %v7275_v55, -1e+30  ;;  %v15622_v16 = vsel %vm37_vm3, %v7353_v4, -1e+30 }
 0xffc   :  { %v7608_v30 = vsel %vm285_vm2, %v15616_v50, -inf  ;;  %v13279_v0 = vpop.f32.mrf.mxu0  ;;  %v13284_v31 = vpop.f32.mrf.mxu1  ;;  %v7611_v24 = vsel %vm285_vm2, %v15622_v16, -inf }
 0xffd   :  { %7609 = vmax.xlane.f32.xlu0 %v7608_v30  ;;  %v15654_v55 = vpop.permute.xlu0 %8143  ;;  %v15658_v30 = vpop.permute.xlu1 %7915 }
 0xffe   :  { %v7431_v1 = vpop.f32.mrf.mxu0 }
 0xfff   :  { %v15626_v39 = vsel %vm37_vm3, %v7431_v1, -1e+30  ;;  %v7509_v5 = vpop.f32.mrf.mxu1 }
0x1000   :  { %v7614_v45 = vsel %vm285_vm2, %v15626_v39, -inf  ;;  %v13289_v43 = vpop.f32.mrf.mxu0  ;;  %v15634_v33 = vsel %vm37_vm3, %v7509_v5, -1e+30 }
0x1001   :  { %7615 = vmax.xlane.f32.xlu1 %v7614_v45  ;;  %7612 = vmax.xlane.f32.xlu0 %v7611_v24  ;;  %v13294_v63 = vpop.f32.mrf.mxu1  ;;  %v7617_v15 = vsel %vm285_vm2, %v15634_v33, -inf  ;;  %v15661_v5 = vpop.permute.xlu1 %7991 }
0x1003   :  { %v7587_v51 = vpop.f32.mrf.mxu0 }
0x1004   :  { %v15652_v26 = vsel %vm37_vm3, %v7587_v51, -1e+30 }
0x1005   :  { %v13299_v44 = vpop.f32.mrf.mxu0  ;;  %7618 = vmax.xlane.f32.xlu0 %v7617_v15  ;;  %v7620_v4 = vsel %vm285_vm2, %v15652_v26, -inf  ;;  %v15663_v24 = vpop.permute.xlu1 %8067 }
0x1009   :  { %v15670_v51 = vpop.permute.xlu1 %8219 }
0x1012   :  { %8371 = vrot.lane.b32.xlu1 %v15368_v47, %s14006_s8 }
0x1016   :  { %8523 = vrot.lane.b32.xlu1 %v15390_v35, %s14006_s8 }
0x101b   :  { %8295 = vrot.lane.b32.xlu0 %v15362_v40, %s14006_s8 }
0x101f   :  { %8447 = vrot.lane.b32.xlu0 %v15380_v59, %s14006_s8 }
0x1023   :  { %8599 = vrot.lane.b32.xlu0 %v15398_v56, %s14006_s8 }
0x103a   :  { %7621 = vmax.xlane.f32.xlu1 %v7620_v4 }
0x103d   :  { %v6881_v0 = vpop.xlane.xlu0 %6880 }
0x103e   :  { %v6903_v31 = vsub.f32 %v15548_v22, %v6881_v0 }
0x1040   :  { %v6911_v1 = vmul.f32 1.442695, %v6903_v31 }
0x1041   :  { %v6884_v44 = vpop.xlane.xlu1 %6883 }
0x1042   :  { %13827 = vpow2.f32 %v6911_v1  ;;  %v6904_v4 = vsub.f32 %v15554_v20, %v6884_v44 }
0x1044   :  { %v6913_v31 = vmul.f32 1.442695, %v6904_v4 }
0x104b   :  { %8675 = vrot.lane.b32.xlu1 %v15404_v23, %s14006_s8 }
0x104d   :  { %v6887_v45 = vpop.xlane.xlu0 %6886 }
0x104e   :  { %v6905_v43 = vsub.f32 %v15562_v37, %v6887_v45 }
0x104f   :  { %v15668_v63 = vpop.eup %13827 }
0x1050   :  { %v6915_v15 = vmul.f32 1.442695, %v6905_v43  ;;  %v6927_v22 = vsel %vm285_vm2, %v15668_v63, 0.0 }
0x1051   :  { %6928 = vadd.xlane.f32.xlu0 %v6927_v22  ;;  %v6890_v0 = vpop.xlane.xlu1 %6889 }
0x1052   :  { %13829 = vpow2.f32 %v6915_v15  ;;  %v6906_v1 = vsub.f32 %v15568_v41, %v6890_v0 }
0x1053   :  { %13831 = vpow2.f32 %v6913_v31 }
0x1054   :  { %v6917_v28 = vmul.f32 1.442695, %v6906_v1 }
0x1056   :  { %13833 = vpow2.f32 %v6917_v28 }
0x105f   :  { %v15676_v37 = vpop.eup %13829 }
0x1060   :  { %v6933_v45 = vsel %vm285_vm2, %v15676_v37, 0.0  ;;  %v15680_v43 = vpop.eup %13831 }
0x1061   :  { %6934 = vadd.xlane.f32.xlu0 %v6933_v45  ;;  %v6930_v15 = vsel %vm285_vm2, %v15680_v43, 0.0 }
0x1063   :  { %v15684_v22 = vpop.eup %13833 }
0x1064   :  { %v6936_v41 = vsel %vm285_vm2, %v15684_v22, 0.0 }
0x106f   :  { %6931 = vadd.xlane.f32.xlu1 %v6930_v15 }
0x1072   :  { %v6893_v20 = vpop.xlane.xlu0 %6892 }
0x1073   :  { %v6907_v44 = vsub.f32 %v15574_v48, %v6893_v20  ;;  %6937 = vadd.xlane.f32.xlu1 %v6936_v41 }
0x1075   :  { %v6919_v4 = vmul.f32 1.442695, %v6907_v44 }
0x1076   :  { %v6896_v0 = vpop.xlane.xlu1 %6895 }
0x1077   :  { %13835 = vpow2.f32 %v6919_v4  ;;  %v6908_v28 = vsub.f32 %v15580_v17, %v6896_v0 }
0x1079   :  { %v6921_v31 = vmul.f32 1.442695, %v6908_v28 }
0x107a   :  { %v6899_v1 = vpop.xlane.xlu0 %6898 }
0x107b   :  { %13837 = vpow2.f32 %v6921_v31  ;;  %v6909_v45 = vsub.f32 %v15586_v61, %v6899_v1 }
0x107d   :  { %v6923_v19 = vmul.f32 1.442695, %v6909_v45 }
0x107e   :  { %v6902_v27 = vpop.xlane.xlu1 %6901  ;;  %v7601_v15 = vpop.xlane.xlu0 %7600 }
0x107f   :  { %13839 = vpow2.f32 %v6923_v19  ;;  %v6910_v49 = vsub.f32 %v15592_v62, %v6902_v27  ;;  %v7623_v32 = vsub.f32 %v15596_v42, %v7601_v15 }
0x1081   :  { %v7631_v48 = vmul.f32 1.442695, %v7623_v32  ;;  %v6925_v20 = vmul.f32 1.442695, %v6910_v49 }
0x1082   :  { %v7604_v41 = vpop.xlane.xlu1 %7603  ;;  %v7607_v44 = vpop.xlane.xlu0 %7606 }
0x1083   :  { %v7624_v4 = vsub.f32 %v15604_v53, %v7604_v41  ;;  %v7625_v17 = vsub.f32 %v15608_v60, %v7607_v44  ;;  %13841 = vpow2.f32 %v7631_v48 }
0x1084   :  { %v15695_v0 = vpop.eup %13835  ;;  %13843 = vpow2.f32 %v6925_v20 }
0x1085   :  { %v7633_v61 = vmul.f32 1.442695, %v7624_v4  ;;  %v6939_v28 = vsel %vm285_vm2, %v15695_v0, 0.0  ;;  %v7635_v19 = vmul.f32 1.442695, %v7625_v17 }
0x1086   :  { %6940 = vadd.xlane.f32.xlu0 %v6939_v28  ;;  %v7610_v27 = vpop.xlane.xlu0 %7609 }
0x1087   :  { %13845 = vpow2.f32 %v7633_v61  ;;  %v7626_v32 = vsub.f32 %v15616_v50, %v7610_v27 }
0x1088   :  { %v15700_v49 = vpop.eup %13837  ;;  %13847 = vpow2.f32 %v7635_v19 }
0x1089   :  { %v7637_v62 = vmul.f32 1.442695, %v7626_v32  ;;  %v6942_v42 = vsel %vm285_vm2, %v15700_v49, 0.0 }
0x108a   :  { %v7616_v53 = vpop.xlane.xlu1 %7615  ;;  %6943 = vadd.xlane.f32.xlu1 %v6942_v42  ;;  %v7613_v60 = vpop.xlane.xlu0 %7612 }
0x108b   :  { %13849 = vpow2.f32 %v7637_v62  ;;  %v7628_v31 = vsub.f32 %v15626_v39, %v7616_v53  ;;  %v7627_v1 = vsub.f32 %v15622_v16, %v7613_v60 }
0x108c   :  { %v15706_v45 = vpop.eup %13839 }
0x108d   :  { %v7641_v15 = vmul.f32 1.442695, %v7628_v31  ;;  %v7639_v48 = vmul.f32 1.442695, %v7627_v1  ;;  %v6945_v50 = vsel %vm285_vm2, %v15706_v45, 0.0 }
0x108e   :  { %6946 = vadd.xlane.f32.xlu1 %v6945_v50  ;;  %v7619_v20 = vpop.xlane.xlu0 %7618 }
0x108f   :  { %13851 = vpow2.f32 %v7641_v15  ;;  %v7629_v41 = vsub.f32 %v15634_v33, %v7619_v20  ;;  %v15747_v15 = vpop.permute.xlu1 %8371 }
0x1090   :  { %13853 = vpow2.f32 %v7639_v48  ;;  %v15711_v44 = vpop.eup %13841 }
0x1091   :  { %v7643_v4 = vmul.f32 1.442695, %v7629_v41  ;;  %v7647_v39 = vsel %vm285_vm2, %v15711_v44, 0.0  ;;  %v15715_v16 = vpop.eup %13843 }
0x1092   :  { %7648 = vadd.xlane.f32.xlu0 %v7647_v39  ;;  %v6948_v33 = vsel %vm285_vm2, %v15715_v16, 0.0  ;;  %v15786_v39 = vpop.permute.xlu0 %8295 }
0x1093   :  { %13855 = vpow2.f32 %v7643_v4  ;;  %v15753_v48 = vpop.permute.xlu1 %8523 }
0x1094   :  { %v15717_v17 = vpop.eup %13845 }
0x1095   :  { %v7650_v61 = vsel %vm285_vm2, %v15717_v17, 0.0  ;;  %v15723_v28 = vpop.eup %13847 }
0x1096   :  { %7651 = vadd.xlane.f32.xlu1 %v7650_v61  ;;  %6949 = vadd.xlane.f32.xlu0 %v6948_v33  ;;  %v7653_v32 = vsel %vm285_vm2, %v15723_v28, 0.0  ;;  %v15790_v61 = vpop.permute.xlu0 %8447 }
0x1098   :  { %v15725_v19 = vpop.eup %13849 }
0x1099   :  { %v7656_v27 = vsel %vm285_vm2, %v15725_v19, 0.0 }
0x109a   :  { %7657 = vadd.xlane.f32.xlu1 %v7656_v27  ;;  %7654 = vadd.xlane.f32.xlu0 %v7653_v32  ;;  %v15796_v32 = vpop.permute.xlu0 %8599 }
0x109c   :  { %v15731_v62 = vpop.eup %13851 }
0x109d   :  { %v15733_v42 = vpop.eup %13853  ;;  %v7662_v53 = vsel %vm285_vm2, %v15731_v62, 0.0 }
0x109e   :  { %7663 = vadd.xlane.f32.xlu1 %v7662_v53  ;;  %v7659_v60 = vsel %vm285_vm2, %v15733_v42, 0.0 }
0x109f   :  { %7660 = vadd.xlane.f32.xlu0 %v7659_v60 }
0x10a0   :  { %v15739_v31 = vpop.eup %13855 }
0x10a1   :  { %v7665_v1 = vsel %vm285_vm2, %v15739_v31, 0.0 }
0x10a3   :  { %7666 = vadd.xlane.f32.xlu0 %v7665_v1 }
0x10af   :  { %8827 = vrot.lane.b32.xlu1 %v15416_v36, %s14006_s8 }
0x10b3   :  { %8983 = vrot.lane.b32.xlu1 %v15368_v47, %s14007_s9 }
0x10b9   :  { %8751 = vrot.lane.b32.xlu0 %v15410_v11, %s14006_s8 }
0x10bd   :  { %8905 = vrot.lane.b32.xlu0 %v15362_v40, %s14007_s9 }
0x10c1   :  { %8903 = vrot.lane.b32.xlu0 %v15362_v40, %s14008_s10 }
0x10c3   :  { %v7622_v50 = vpop.xlane.xlu1 %7621 }
0x10c4   :  { %v7630_v20 = vsub.f32 %v15652_v26, %v7622_v50 }
0x10c5   :  { %9061 = vrot.lane.b32.xlu0 %v15380_v59, %s14007_s9 }
0x10c6   :  { %v7645_v41 = vmul.f32 1.442695, %v7630_v20 }
0x10c7   :  { %v15792_v33 = vpop.permute.xlu1 %8675 }
0x10c8   :  { %13857 = vpow2.f32 %v7645_v41 }
0x10c9   :  { %9059 = vrot.lane.b32.xlu0 %v15380_v59, %s14008_s10 }
0x10cd   :  { %9217 = vrot.lane.b32.xlu0 %v15398_v56, %s14007_s9 }
0x10d1   :  { %9215 = vrot.lane.b32.xlu0 %v15398_v56, %s14008_s10 }
0x10d5   :  { %v15766_v4 = vpop.eup %13857  ;;  %9373 = vrot.lane.b32.xlu0 %v15410_v11, %s14007_s9 }
0x10d6   :  { %v7668_v26 = vsel %vm285_vm2, %v15766_v4, 0.0 }
0x10d7   :  { %7669 = vadd.xlane.f32.xlu1 %v7668_v26 }
0x10d9   :  { %9371 = vrot.lane.b32.xlu0 %v15410_v11, %s14008_s10 }
0x10da   :  { %v6929_v53 = vpop.xlane.xlu0 %6928 }
0x10e8   :  { %8981 = vrot.lane.b32.xlu1 %v15368_v47, %s14008_s10 }
0x10ea   :  { %v6935_v1 = vpop.xlane.xlu0 %6934 }
0x10ec   :  { %9139 = vrot.lane.b32.xlu1 %v15390_v35, %s14007_s9 }
0x10f0   :  { %9137 = vrot.lane.b32.xlu1 %v15390_v35, %s14008_s10 }
0x10f4   :  { %9295 = vrot.lane.b32.xlu1 %v15404_v23, %s14007_s9 }
0x10f8   :  { %9293 = vrot.lane.b32.xlu1 %v15404_v23, %s14008_s10  ;;  %v15794_v27 = vpop.xlane.xlu1 %6931 }
0x10fc   :  { %9451 = vrot.lane.b32.xlu1 %v15416_v36, %s14007_s9  ;;  %v15798_v60 = vpop.xlane.xlu1 %6937 }
0x1100   :  { %9449 = vrot.lane.b32.xlu1 %v15416_v36, %s14008_s10 }
0x110f   :  { %v6941_v20 = vpop.xlane.xlu0 %6940 }
0x1113   :  { %v15800_v50 = vpop.xlane.xlu1 %6943 }
0x1117   :  { %v6947_v41 = vpop.xlane.xlu1 %6946 }
0x111b   :  { %v7649_v26 = vpop.xlane.xlu0 %7648 }
0x111c   :  { %13859 = vrcp.f32 %v7649_v26  ;;  %v16548_v26 = vmov 0.0  }
0x111f   :  { %v7652_v18 = vpop.xlane.xlu1 %7651  ;;  %v15802_v2 = vpop.xlane.xlu0 %6949 }
0x1120   :  { %13861 = vrcp.f32 %v7652_v18 }
0x1123   :  { %v7658_v10 = vpop.xlane.xlu1 %7657  ;;  %v7655_v46 = vpop.xlane.xlu0 %7654 }
0x1124   :  { %13863 = vrcp.f32 %v7658_v10 }
0x1125   :  { %13865 = vrcp.f32 %v7655_v46 }
0x1127   :  { %v7664_v9 = vpop.xlane.xlu1 %7663 }
0x1128   :  { %13867 = vrcp.f32 %v7664_v9  ;;  %v7661_v13 = vpop.xlane.xlu0 %7660 }
0x1129   :  { %13869 = vrcp.f32 %v7661_v13  ;;  %v13860_v7 = vpop.eup %13859 }
0x112a   :  { %v7679_v3 = vmul.f32 %v13860_v7, %v15711_v44 }
0x112c   :  { %v7667_v58 = vpop.xlane.xlu0 %7666  ;;  %13303 = vmatmul.mubr.msk.f32.vlgmr.msra.gmra.mxu1 %vm285_vm2, %v7679_v3 }
0x112d   :  { %v13862_v8 = vpop.eup %13861  ;;  %13871 = vrcp.f32 %v7667_v58  ;;  %13311 = vmatpush3.msra.mxu1 %v15648_v25  ;;  %13312 = vmatprep.mubr.msk.f32.mxu1 %vm14001_vm1, %v16548_v26 }
0x112e   :  { %v7680_v18 = vmul.f32 %v13862_v8, %v15717_v17  ;;  %13873 = vrcp.f32 %v6929_v53  ;;  %13320 = vmatprep.subr.mxu1 %v16548_v26 }
0x112f   :  { %13875 = vrcp.f32 %v6935_v1 }
0x1130   :  { %v8752_v10 = vpop.permute.xlu0 %8751  ;;  %13308 = vmatmul.mubr.msk.f32.vlgmr.msra.gmra.mxu0 %vm285_vm2, %v7680_v18  ;;  %13877 = vrcp.f32 %v6941_v20 }
0x1131   :  { %v13864_v13 = vpop.eup %13863  ;;  %13316 = vmatpush3.msra.mxu0 %v15658_v30  ;;  %13317 = vmatprep.mubr.msk.f32.mxu0 %vm14001_vm1, %v16548_v26  ;;  %13879 = vrcp.f32 %v6947_v41 }
0x1132   :  { %v13866_v58 = vpop.eup %13865  ;;  %13325 = vmatprep.subr.mxu0 %v16548_v26  ;;  %v7682_v8 = vmul.f32 %v13864_v13, %v15725_v19 }
0x1133   :  { %v7681_v3 = vmul.f32 %v13866_v58, %v15723_v28 }
0x1134   :  { %v8906_v46 = vpop.permute.xlu0 %8905  ;;  %13318 = vmatmul.mubr.msk.f32.vlgmr.msra.gmra.mxu0 %vm285_vm2, %v7682_v8 }
0x1135   :  { %v13868_v7 = vpop.eup %13867  ;;  %13313 = vmatmul.mubr.msk.f32.vlgmr.msra.gmra.mxu1 %vm285_vm2, %v7681_v3  ;;  %13326 = vmatpush3.msra.mxu0 %v15663_v24 }
0x1136   :  { %v13870_v9 = vpop.eup %13869  ;;  %13321 = vmatpush3.msra.mxu1 %v15661_v5  ;;  %13322 = vmatprep.mubr.msk.f32.mxu1 %vm14001_vm1, %v16548_v26  ;;  %v7684_v25 = vmul.f32 %v13868_v7, %v15731_v62 }
0x1137   :  { %v7683_v30 = vmul.f32 %v13870_v9, %v15733_v42  ;;  %13327 = vmatprep.mubr.msk.f32.mxu0 %vm14001_vm1, %v16548_v26  ;;  %13330 = vmatprep.subr.mxu1 %v16548_v26 }
0x1138   :  { %13335 = vmatprep.subr.mxu0 %v16548_v26  ;;  %v8904_v44 = vpop.permute.xlu0 %8903  ;;  %13328 = vmatmul.mubr.msk.f32.vlgmr.msra.gmra.mxu0 %vm285_vm2, %v7684_v25 }
0x1139   :  { %13323 = vmatmul.mubr.msk.f32.vlgmr.msra.gmra.mxu1 %vm285_vm2, %v7683_v30  ;;  %13336 = vmatpush3.msra.mxu0 %v15670_v51 }
0x113a   :  { %v13872_v5 = vpop.eup %13871  ;;  %13331 = vmatpush3.msra.mxu1 %v15654_v55  ;;  %13332 = vmatprep.mubr.msk.f32.mxu1 %vm14001_vm1, %v16548_v26 }
0x113b   :  { %v7685_v24 = vmul.f32 %v13872_v5, %v15739_v31  ;;  %13340 = vmatprep.subr.mxu1 %v16548_v26  ;;  %13337 = vmatprep.mubr.msk.f32.mxu0 %vm14001_vm1, %v16548_v26  ;;  %v13874_v17 = vpop.eup %13873 }
0x113c   :  { %13345 = vmatprep.subr.mxu0 %v16548_v26  ;;  %v9062_v51 = vpop.permute.xlu0 %9061  ;;  %v6959_v55 = vmul.f32 %v13874_v17, %v15668_v63  ;;  %v13876_v28 = vpop.eup %13875 }
0x113d   :  { %13333 = vmatmul.mubr.msk.f32.vlgmr.msra.gmra.mxu1 %vm285_vm2, %v7685_v24  ;;  %v6961_v19 = vmul.f32 %v13876_v28, %v15676_v37  ;;  %v13878_v62 = vpop.eup %13877 }
0x113e   :  { %13341 = vmatpush3.msra.mxu1 %v15786_v39  ;;  %13342 = vmatprep.mubr.msk.f32.mxu1 %vm14001_vm1, %v16548_v26  ;;  %v6963_v63 = vmul.f32 %v13878_v62, %v15695_v0  ;;  %v13880_v31 = vpop.eup %13879 }
0x113f   :  { %13350 = vmatprep.subr.mxu1 %v16548_v26  ;;  %v6965_v37 = vmul.f32 %v13880_v31, %v15706_v45  ;;  %v8828_v45 = vpop.permute.xlu1 %8827 }
0x1140   :  { %v9060_v42 = vpop.permute.xlu0 %9059 }
0x1141   :  { %13343 = vmatmul.mubr.msk.f32.vlgmr.msra.gmra.mxu1 %vm285_vm2, %v6959_v55 }
0x1142   :  { %13351 = vmatpush3.msra.mxu1 %v15790_v61  ;;  %13352 = vmatprep.mubr.msk.f32.mxu1 %vm14001_vm1, %v16548_v26 }
0x1143   :  { %13360 = vmatprep.subr.mxu1 %v16548_v26 }
0x1144   :  { %v9218_v39 = vpop.permute.xlu0 %9217 }
0x1145   :  { %13353 = vmatmul.mubr.msk.f32.vlgmr.msra.gmra.mxu1 %vm285_vm2, %v6961_v19 }
0x1146   :  { %13361 = vmatpush3.msra.mxu1 %v15796_v32  ;;  %13362 = vmatprep.mubr.msk.f32.mxu1 %vm14001_vm1, %v16548_v26  ;;  %v8984_v32 = vpop.permute.xlu1 %8983 }
0x1147   :  { %13370 = vmatprep.subr.mxu1 %v16548_v26 }
0x1148   :  { %v9216_v0 = vpop.permute.xlu0 %9215 }
0x1149   :  { %13363 = vmatmul.mubr.msk.f32.vlgmr.msra.gmra.mxu1 %vm285_vm2, %v6963_v63 }
0x114a   :  { %13371 = vmatpush3.msra.mxu1 %v8752_v10  ;;  %13372 = vmatprep.mubr.msk.f32.mxu1 %vm14001_vm1, %v16548_v26 }
0x114b   :  { %13380 = vmatprep.subr.mxu1 %v16548_v26 }
0x114c   :  { %v9374_v61 = vpop.permute.xlu0 %9373 }
0x114d   :  { %13373 = vmatmul.mubr.msk.f32.vlgmr.msra.gmra.mxu1 %vm285_vm2, %v6965_v37 }
0x114e   :  { %13381 = vmatpush3.xpose.msk.msra.mxu1 %vm285_vm2, %v8906_v46  ;;  %13382 = vmatprep.mubr.msk.f32.mxu1 %vm14001_vm1, %v16548_v26 }
0x114f   :  { %13390 = vmatprep.subr.mxu1 %v16548_v26 }
0x1150   :  { %v9372_v53 = vpop.permute.xlu0 %9371 }
0x1151   :  { %13383 = vmatmul.mubr.msk.f32.vlgmr.msra.gmra.mxu1 %vm285_vm2, %v8904_v44 }
0x1152   :  { %13391 = vmatpush3.xpose.msk.msra.mxu1 %vm285_vm2, %v9062_v51  ;;  %13392 = vmatprep.mubr.msk.f32.mxu1 %vm14001_vm1, %v16548_v26 }
0x1153   :  { %13400 = vmatprep.subr.mxu1 %v16548_v26 }
0x1155   :  { %13393 = vmatmul.mubr.msk.f32.vlgmr.msra.gmra.mxu1 %vm285_vm2, %v9060_v42 }
0x1156   :  { %13401 = vmatpush3.xpose.msk.msra.mxu1 %vm285_vm2, %v9218_v39  ;;  %13402 = vmatprep.mubr.msk.f32.mxu1 %vm14001_vm1, %v16548_v26 }
0x1157   :  { %13410 = vmatprep.subr.mxu1 %v16548_v26 }
0x1159   :  { %13403 = vmatmul.mubr.msk.f32.vlgmr.msra.gmra.mxu1 %vm285_vm2, %v9216_v0 }
0x115a   :  { %13411 = vmatpush3.xpose.msk.msra.mxu1 %vm285_vm2, %v9374_v61  ;;  %13412 = vmatprep.mubr.msk.f32.mxu1 %vm14001_vm1, %v16548_v26 }
0x115b   :  { %13420 = vmatprep.subr.mxu1 %v16548_v26 }
0x115d   :  { %13413 = vmatmul.mubr.msk.f32.vlgmr.msra.gmra.mxu1 %vm285_vm2, %v9372_v53 }
0x115e   :  { %13421 = vmatpush3.msra.mxu1 %v15366_v14  ;;  %13422 = vmatprep.mubr.msk.f32.mxu1 %vm14001_vm1, %v16548_v26 }
0x115f   :  { %13430 = vmatprep.subr.mxu1 %v16548_v26 }
0x1160   :  { %v7670_v1 = vpop.xlane.xlu1 %7669 }
0x1161   :  { %13881 = vrcp.f32 %v7670_v1 }
0x1162   :  { %13883 = vrcp.f32 %v15794_v27 }
0x1163   :  { %13885 = vrcp.f32 %v15798_v60 }
0x1164   :  { %13887 = vrcp.f32 %v15800_v50  ;;  %v8982_v20 = vpop.permute.xlu1 %8981 }
0x1165   :  { %13889 = vrcp.f32 %v15802_v2 }
0x1168   :  { %v9140_v13 = vpop.permute.xlu1 %9139 }
0x116e   :  { %v13882_v41 = vpop.eup %13881 }
0x116f   :  { %v7686_v18 = vmul.f32 %v13882_v41, %v15766_v4  ;;  %v13884_v10 = vpop.eup %13883  ;;  %v9138_v4 = vpop.permute.xlu1 %9137 }
0x1170   :  { %v6960_v27 = vmul.f32 %v13884_v10, %v15680_v43  ;;  %v13886_v60 = vpop.eup %13885 }
0x1171   :  { %13338 = vmatmul.mubr.msk.f32.vlgmr.msra.gmra.mxu0 %vm285_vm2, %v7686_v18  ;;  %v6962_v2 = vmul.f32 %v13886_v60, %v15684_v22 }
0x1172   :  { %13346 = vmatpush3.msra.mxu0 %v15747_v15  ;;  %13347 = vmatprep.mubr.msk.f32.mxu0 %vm14001_vm1, %v16548_v26  ;;  %v13888_v15 = vpop.eup %13887 }
0x1173   :  { %13355 = vmatprep.subr.mxu0 %v16548_v26  ;;  %v6964_v43 = vmul.f32 %v13888_v15, %v15700_v49  ;;  %v9296_v50 = vpop.permute.xlu1 %9295 }
0x1175   :  { %13348 = vmatmul.mubr.msk.f32.vlgmr.msra.gmra.mxu0 %vm285_vm2, %v6960_v27 }
0x1176   :  { %13356 = vmatpush3.msra.mxu0 %v15753_v48  ;;  %13357 = vmatprep.mubr.msk.f32.mxu0 %vm14001_vm1, %v16548_v26  ;;  %v13890_v48 = vpop.eup %13889 }
0x1177   :  { %13365 = vmatprep.subr.mxu0 %v16548_v26  ;;  %v6966_v22 = vmul.f32 %v13890_v48, %v15715_v16  ;;  %v9294_v49 = vpop.permute.xlu1 %9293 }
0x1179   :  { %13358 = vmatmul.mubr.msk.f32.vlgmr.msra.gmra.mxu0 %vm285_vm2, %v6962_v2 }
0x117a   :  { %13366 = vmatpush3.msra.mxu0 %v15792_v33  ;;  %13367 = vmatprep.mubr.msk.f32.mxu0 %vm14001_vm1, %v16548_v26 }
0x117b   :  { %13375 = vmatprep.subr.mxu0 %v16548_v26  ;;  %v9452_v16 = vpop.permute.xlu1 %9451 }
0x117d   :  { %13368 = vmatmul.mubr.msk.f32.vlgmr.msra.gmra.mxu0 %vm285_vm2, %v6964_v43 }
0x117e   :  { %13376 = vmatpush3.msra.mxu0 %v8828_v45  ;;  %13377 = vmatprep.mubr.msk.f32.mxu0 %vm14001_vm1, %v16548_v26 }
0x117f   :  { %13385 = vmatprep.subr.mxu0 %v16548_v26  ;;  %v9450_v33 = vpop.permute.xlu1 %9449 }
0x1181   :  { %13378 = vmatmul.mubr.msk.f32.vlgmr.msra.gmra.mxu0 %vm285_vm2, %v6966_v22 }
0x1182   :  { %13386 = vmatpush3.xpose.msk.msra.mxu0 %vm285_vm2, %v8984_v32  ;;  %13387 = vmatprep.mubr.msk.f32.mxu0 %vm14001_vm1, %v16548_v26 }
0x1183   :  { %13395 = vmatprep.subr.mxu0 %v16548_v26 }
0x1185   :  { %13388 = vmatmul.mubr.msk.f32.vlgmr.msra.gmra.mxu0 %vm285_vm2, %v8982_v20 }
0x1186   :  { %13396 = vmatpush3.xpose.msk.msra.mxu0 %vm285_vm2, %v9140_v13  ;;  %13397 = vmatprep.mubr.msk.f32.mxu0 %vm14001_vm1, %v16548_v26 }
0x1187   :  { %13405 = vmatprep.subr.mxu0 %v16548_v26 }
0x1189   :  { %13398 = vmatmul.mubr.msk.f32.vlgmr.msra.gmra.mxu0 %vm285_vm2, %v9138_v4 }
0x118a   :  { %13406 = vmatpush3.xpose.msk.msra.mxu0 %vm285_vm2, %v9296_v50  ;;  %13407 = vmatprep.mubr.msk.f32.mxu0 %vm14001_vm1, %v16548_v26 }
0x118b   :  { %13415 = vmatprep.subr.mxu0 %v16548_v26 }
0x118d   :  { %13408 = vmatmul.mubr.msk.f32.vlgmr.msra.gmra.mxu0 %vm285_vm2, %v9294_v49 }
0x118e   :  { %13416 = vmatpush3.xpose.msk.msra.mxu0 %vm285_vm2, %v9452_v16  ;;  %13417 = vmatprep.mubr.msk.f32.mxu0 %vm14001_vm1, %v16548_v26 }
0x118f   :  { %13425 = vmatprep.subr.mxu0 %v16548_v26 }
0x1191   :  { %13418 = vmatmul.mubr.msk.f32.vlgmr.msra.gmra.mxu0 %vm285_vm2, %v9450_v33 }
0x1192   :  { %13426 = vmatpush3.msra.mxu0 %v15374_v57  ;;  %13427 = vmatprep.mubr.msk.f32.mxu0 %vm14001_vm1, %v16548_v26 }
0x1193   :  { %13435 = vmatprep.subr.mxu0 %v16548_v26 }
0x11ec   :  { %v7759_v58 = vpop.f32.mrf.mxu1 }
0x11ee   :  { %v13304_v8 = vpop.f32.mrf.mxu1 }
0x11f0   :  { %v15942_v3 = vpop.f32.mrf.mxu0 }
0x11f2   :  { %v13309_v46 = vpop.f32.mrf.mxu0 }
0x11f4   :  { %v15944_v7 = vpop.f32.mrf.mxu0 }
0x11f5   :  { %v7911_v9 = vpop.f32.mrf.mxu1 }
0x11f6   :  { %v13319_v25 = vpop.f32.mrf.mxu0 }
0x11f7   :  { %v13314_v30 = vpop.f32.mrf.mxu1 }
0x11f8   :  { %v15946_v44 = vpop.f32.mrf.mxu0 }
0x11f9   :  { %v8063_v5 = vpop.f32.mrf.mxu1 }
0x11fa   :  { %v13329_v24 = vpop.f32.mrf.mxu0 }
0x11fb   :  { %v13324_v17 = vpop.f32.mrf.mxu1 }
0x11fd   :  { %v8215_v51 = vpop.f32.mrf.mxu1 }
0x11ff   :  { %v13334_v55 = vpop.f32.mrf.mxu1 }
0x1201   :  { %v8367_v28 = vpop.f32.mrf.mxu1 }
0x1202   :  { %v15948_v19 = vadd.f32 %v8367_v28, %v7759_v58 }
0x1203   :  { %v13344_v62 = vpop.f32.mrf.mxu1 }
0x1205   :  { %v8519_v42 = vpop.f32.mrf.mxu1 }
0x1206   :  { %v15950_v63 = vadd.f32 %v8519_v42, %v7911_v9 }
0x1207   :  { %v13354_v31 = vpop.f32.mrf.mxu1 }
0x1209   :  { %v8671_v39 = vpop.f32.mrf.mxu1 }
0x120a   :  { %v15952_v37 = vadd.f32 %v8671_v39, %v8063_v5 }
0x120b   :  { %v13364_v0 = vpop.f32.mrf.mxu1 }
0x120d   :  { %v8823_v45 = vpop.f32.mrf.mxu1 }
0x120e   :  { %v15954_v61 = vadd.f32 %v8823_v45, %v8215_v51 }
0x120f   :  { %v13374_v32 = vpop.f32.mrf.mxu1 }
0x1211   :  { %v8977_v53 = vpop.f32.mrf.mxu1 }
0x1212   :  { %v9527_v1 = vsel %vm37_vm3, %v8977_v53, -1e+30 }
0x1213   :  { %v9535_v20 = vsel %vm285_vm2, %v9527_v1, -inf  ;;  %v13384_v41 = vpop.f32.mrf.mxu1 }
0x1214   :  { %9536 = vmax.xlane.f32.xlu0 %v9535_v20 }
0x1215   :  { %v9133_v18 = vpop.f32.mrf.mxu1 }
0x1216   :  { %v9529_v10 = vsel %vm37_vm3, %v9133_v18, -1e+30 }
0x1217   :  { %v9541_v13 = vsel %vm285_vm2, %v9529_v10, -inf  ;;  %v13394_v27 = vpop.f32.mrf.mxu1 }
0x1218   :  { %9542 = vmax.xlane.f32.xlu0 %v9541_v13 }
0x1219   :  { %v9289_v60 = vpop.f32.mrf.mxu1 }
0x121a   :  { %v9531_v62 = vsel %vm37_vm3, %v9289_v60, -1e+30 }
0x121b   :  { %v13404_v2 = vpop.f32.mrf.mxu1  ;;  %v9547_v39 = vsel %vm285_vm2, %v9531_v62, -inf }
0x121d   :  { %v9445_v15 = vpop.f32.mrf.mxu1 }
0x121e   :  { %v9533_v32 = vsel %vm37_vm3, %v9445_v15, -1e+30 }
0x121f   :  { %v13414_v4 = vpop.f32.mrf.mxu1  ;;  %v9553_v20 = vsel %vm285_vm2, %v9533_v32, -inf }
0x1231   :  { %v8291_v43 = vpop.f32.mrf.mxu0 }
0x1233   :  { %v13339_v48 = vpop.f32.mrf.mxu0 }
0x1235   :  { %v15962_v50 = vpop.f32.mrf.mxu0 }
0x1237   :  { %v13349_v22 = vpop.f32.mrf.mxu0 }
0x1239   :  { %v15964_v49 = vpop.f32.mrf.mxu0 }
0x123b   :  { %v13359_v16 = vpop.f32.mrf.mxu0 }
0x123d   :  { %v15966_v33 = vpop.f32.mrf.mxu0 }
0x123f   :  { %v13369_v58 = vpop.f32.mrf.mxu0 }
0x1241   :  { %v8899_v8 = vpop.f32.mrf.mxu0 }
0x1242   :  { %v15968_v46 = vadd.f32 %v8899_v8, %v8291_v43 }
0x1243   :  { %v13379_v9 = vpop.f32.mrf.mxu0 }
0x1245   :  { %v9055_v25 = vpop.f32.mrf.mxu0 }
0x1246   :  { %v9528_v30 = vsel %vm37_vm3, %v9055_v25, -1e+30 }
0x1247   :  { %v9538_v5 = vsel %vm285_vm2, %v9528_v30, -inf  ;;  %v13389_v24 = vpop.f32.mrf.mxu0 }
0x1248   :  { %9539 = vmax.xlane.f32.xlu1 %v9538_v5 }
0x1249   :  { %v9211_v17 = vpop.f32.mrf.mxu0 }
0x124a   :  { %v9530_v51 = vsel %vm37_vm3, %v9211_v17, -1e+30 }
0x124b   :  { %v9544_v55 = vsel %vm285_vm2, %v9530_v51, -inf  ;;  %v13399_v28 = vpop.f32.mrf.mxu0 }
0x124c   :  { %9545 = vmax.xlane.f32.xlu0 %v9544_v55 }
0x124d   :  { %v9367_v42 = vpop.f32.mrf.mxu0 }
0x124e   :  { %v9532_v31 = vsel %vm37_vm3, %v9367_v42, -1e+30 }
0x124f   :  { %v9550_v0 = vsel %vm285_vm2, %v9532_v31, -inf  ;;  %v13409_v45 = vpop.f32.mrf.mxu0 }
0x1250   :  { %9551 = vmax.xlane.f32.xlu1 %v9550_v0  ;;  %9548 = vmax.xlane.f32.xlu0 %v9547_v39 }
0x1251   :  { %v9523_v53 = vpop.f32.mrf.mxu0 }
0x1252   :  { %v15997_v18 = vsel %vm37_vm3, %v9523_v53, -1e+30 }
0x1253   :  { %v13419_v41 = vpop.f32.mrf.mxu0  ;;  %v9556_v13 = vsel %vm285_vm2, %v15997_v18, -inf }
0x1254   :  { %9554 = vmax.xlane.f32.xlu0 %v9553_v20 }
0x1261   :  { %10295 = vrot.lane.b32.xlu1 %v15368_v47, %s14009_s11 }
0x1265   :  { %10215 = vrot.lane.b32.xlu1 %v15362_v40, %s14010_s12 }
0x1269   :  { %10293 = vrot.lane.b32.xlu1 %v15368_v47, %s14010_s12 }
0x126a   :  { %10217 = vrot.lane.b32.xlu0 %v15362_v40, %s14009_s11 }
0x126e   :  { %10373 = vrot.lane.b32.xlu0 %v15380_v59, %s14009_s11 }
0x128d   :  { %9557 = vmax.xlane.f32.xlu1 %v9556_v13 }
0x129d   :  { %v9537_v27 = vpop.xlane.xlu0 %9536 }
0x129e   :  { %v9559_v60 = vsub.f32 %v9527_v1, %v9537_v27  ;;  %10451 = vrot.lane.b32.xlu1 %v15390_v35, %s14009_s11 }
0x12a0   :  { %v9567_v47 = vmul.f32 1.442695, %v9559_v60 }
0x12a1   :  { %v9543_v2 = vpop.xlane.xlu0 %9542 }
0x12a2   :  { %13891 = vpow2.f32 %v9567_v47  ;;  %v9561_v40 = vsub.f32 %v9529_v10, %v9543_v2 }
0x12a4   :  { %v9571_v15 = vmul.f32 1.442695, %v9561_v40 }
0x12a6   :  { %13893 = vpow2.f32 %v9571_v15 }
0x12af   :  { %v16003_v4 = vpop.eup %13891 }
0x12b0   :  { %v9583_v43 = vsel %vm285_vm2, %v16003_v4, 0.0 }
0x12b1   :  { %9584 = vadd.xlane.f32.xlu0 %v9583_v43 }
0x12b3   :  { %v16007_v48 = vpop.eup %13893 }
0x12b4   :  { %v9589_v1 = vsel %vm285_vm2, %v16007_v48, 0.0 }
0x12b5   :  { %9590 = vadd.xlane.f32.xlu0 %v9589_v1 }
0x12d1   :  { %v9540_v22 = vpop.xlane.xlu1 %9539 }
0x12d2   :  { %v9560_v16 = vsub.f32 %v9528_v30, %v9540_v22 }
0x12d4   :  { %v9569_v58 = vmul.f32 1.442695, %v9560_v16 }
0x12d5   :  { %v9546_v8 = vpop.xlane.xlu0 %9545 }
0x12d6   :  { %13895 = vpow2.f32 %v9569_v58  ;;  %v9562_v10 = vsub.f32 %v9530_v51, %v9546_v8 }
0x12d8   :  { %v9573_v9 = vmul.f32 1.442695, %v9562_v10 }
0x12d9   :  { %v9552_v25 = vpop.xlane.xlu1 %9551  ;;  %v9549_v5 = vpop.xlane.xlu0 %9548 }
0x12da   :  { %13897 = vpow2.f32 %v9573_v9  ;;  %v9564_v24 = vsub.f32 %v9532_v31, %v9552_v25  ;;  %v9563_v17 = vsub.f32 %v9531_v62, %v9549_v5 }
0x12dc   :  { %v9577_v55 = vmul.f32 1.442695, %v9564_v24  ;;  %v9575_v28 = vmul.f32 1.442695, %v9563_v17 }
0x12dd   :  { %v9555_v42 = vpop.xlane.xlu0 %9554  ;;  %v16035_v27 = vpop.permute.xlu1 %10295 }
0x12de   :  { %13899 = vpow2.f32 %v9577_v55  ;;  %v9565_v39 = vsub.f32 %v9533_v32, %v9555_v42 }
0x12df   :  { %13901 = vpow2.f32 %v9575_v28 }
0x12e0   :  { %v9579_v0 = vmul.f32 1.442695, %v9565_v39 }
0x12e1   :  { %v16039_v60 = vpop.permute.xlu1 %10215 }
0x12e2   :  { %13903 = vpow2.f32 %v9579_v0 }
0x12e3   :  { %v16011_v45 = vpop.eup %13895 }
0x12e4   :  { %v9586_v30 = vsel %vm285_vm2, %v16011_v45, 0.0 }
0x12e5   :  { %9587 = vadd.xlane.f32.xlu1 %v9586_v30  ;;  %v16045_v47 = vpop.permute.xlu1 %10293 }
0x12e7   :  { %v16015_v51 = vpop.eup %13897 }
0x12e8   :  { %v9592_v31 = vsel %vm285_vm2, %v16015_v51, 0.0 }
0x12e9   :  { %9593 = vadd.xlane.f32.xlu1 %v9592_v31 }
0x12eb   :  { %v16019_v62 = vpop.eup %13899 }
0x12ec   :  { %v16021_v53 = vpop.eup %13901  ;;  %v9598_v32 = vsel %vm285_vm2, %v16019_v62, 0.0 }
0x12ed   :  { %9599 = vadd.xlane.f32.xlu1 %v9598_v32  ;;  %v9595_v20 = vsel %vm285_vm2, %v16021_v53, 0.0 }
0x12ee   :  { %9596 = vadd.xlane.f32.xlu0 %v9595_v20 }
0x12ef   :  { %v16027_v41 = vpop.eup %13903 }
0x12f0   :  { %v9601_v13 = vsel %vm285_vm2, %v16027_v41, 0.0 }
0x12f2   :  { %9602 = vadd.xlane.f32.xlu0 %v9601_v13 }
0x12fe   :  { %10449 = vrot.lane.b32.xlu1 %v15390_v35, %s14010_s12 }
0x1302   :  { %10607 = vrot.lane.b32.xlu1 %v15404_v23, %s14009_s11 }
0x1308   :  { %10371 = vrot.lane.b32.xlu0 %v15380_v59, %s14010_s12 }
0x130c   :  { %10529 = vrot.lane.b32.xlu0 %v15398_v56, %s14009_s11 }
0x1310   :  { %10527 = vrot.lane.b32.xlu0 %v15398_v56, %s14010_s12  ;;  %v10218_v56 = vpop.permute.xlu0 %10217 }
0x1314   :  { %10685 = vrot.lane.b32.xlu0 %v15410_v11, %s14009_s11  ;;  %v16056_v43 = vpop.permute.xlu0 %10373 }
0x1316   :  { %v9558_v35 = vpop.xlane.xlu1 %9557 }
0x1317   :  { %v9566_v2 = vsub.f32 %v15997_v18, %v9558_v35 }
0x1318   :  { %10683 = vrot.lane.b32.xlu0 %v15410_v11, %s14010_s12 }
0x1319   :  { %v9581_v59 = vmul.f32 1.442695, %v9566_v2 }
0x131b   :  { %13905 = vpow2.f32 %v9581_v59 }
0x1328   :  { %v16052_v40 = vpop.eup %13905 }
0x1329   :  { %v9604_v15 = vsel %vm285_vm2, %v16052_v40, 0.0 }
0x132a   :  { %9605 = vadd.xlane.f32.xlu1 %v9604_v15 }
0x133a   :  { %v9585_v1 = vpop.xlane.xlu0 %9584 }
0x133b   :  { %13907 = vrcp.f32 %v9585_v1  ;;  %10605 = vrot.lane.b32.xlu1 %v15404_v23, %s14010_s12 }
0x133e   :  { %v9591_v18 = vpop.xlane.xlu0 %9590 }
0x133f   :  { %13909 = vrcp.f32 %v9591_v18  ;;  %10763 = vrot.lane.b32.xlu1 %v15416_v36, %s14009_s11 }
0x1343   :  { %10761 = vrot.lane.b32.xlu1 %v15416_v36, %s14010_s12  ;;  %v16076_v36 = vpop.permute.xlu1 %10451 }
0x1348   :  { %v13908_v11 = vpop.eup %13907 }
0x1349   :  { %v9615_v22 = vmul.f32 %v13908_v11, %v16003_v4 }
0x134b   :  { %13423 = vmatmul.mubr.msk.f32.vlgmr.msra.gmra.mxu1 %vm285_vm2, %v9615_v22  ;;  %v8596_v22 = vadd.f32 %v15964_v49, %v15944_v7 }
0x134c   :  { %v13910_v16 = vpop.eup %13909  ;;  %13431 = vmatpush3.msra.mxu1 %v15386_v54  ;;  %13432 = vmatprep.mubr.msk.f32.mxu1 %vm14001_vm1, %v16548_v26 }
0x134d   :  { %v9617_v23 = vmul.f32 %v13910_v16, %v16007_v48  ;;  %13440 = vmatprep.subr.mxu1 %v16548_v26 }
0x134f   :  { %13433 = vmatmul.mubr.msk.f32.vlgmr.msra.gmra.mxu1 %vm285_vm2, %v9617_v23 }
0x1350   :  { %13441 = vmatpush3.msra.mxu1 %v15402_v34  ;;  %13442 = vmatprep.mubr.msk.f32.mxu1 %vm14001_vm1, %v16548_v26 }
0x1351   :  { %13450 = vmatprep.subr.mxu1 %v16548_v26 }
0x136e   :  { %v9588_v4 = vpop.xlane.xlu1 %9587 }
0x136f   :  { %13911 = vrcp.f32 %v9588_v4 }
0x1372   :  { %v9594_v58 = vpop.xlane.xlu1 %9593 }
0x1373   :  { %13913 = vrcp.f32 %v9594_v58 }
0x1376   :  { %v9600_v8 = vpop.xlane.xlu1 %9599 }
0x1377   :  { %13915 = vrcp.f32 %v9600_v8  ;;  %v9597_v48 = vpop.xlane.xlu0 %9596 }
0x1378   :  { %13917 = vrcp.f32 %v9597_v48 }
0x137b   :  { %v9603_v10 = vpop.xlane.xlu0 %9602 }
0x137c   :  { %v13912_v9 = vpop.eup %13911  ;;  %13919 = vrcp.f32 %v9603_v10 }
0x137d   :  { %v9616_v25 = vmul.f32 %v13912_v9, %v16011_v45 }
0x137f   :  { %13428 = vmatmul.mubr.msk.f32.vlgmr.msra.gmra.mxu0 %vm285_vm2, %v9616_v25  ;;  %v10372_v17 = vpop.permute.xlu0 %10371 }
0x1380   :  { %v13914_v5 = vpop.eup %13913  ;;  %13436 = vmatpush3.msra.mxu0 %v15396_v21  ;;  %13437 = vmatprep.mubr.msk.f32.mxu0 %vm14001_vm1, %v16548_v26 }
0x1381   :  { %v9618_v24 = vmul.f32 %v13914_v5, %v16015_v51  ;;  %13445 = vmatprep.subr.mxu0 %v16548_v26 }
0x1383   :  { %13438 = vmatmul.mubr.msk.f32.vlgmr.msra.gmra.mxu0 %vm285_vm2, %v9618_v24  ;;  %v10530_v45 = vpop.permute.xlu0 %10529 }
0x1384   :  { %v13916_v55 = vpop.eup %13915  ;;  %13446 = vmatpush3.msra.mxu0 %v15408_v12  ;;  %13447 = vmatprep.mubr.msk.f32.mxu0 %vm14001_vm1, %v16548_v26 }
0x1385   :  { %v13918_v28 = vpop.eup %13917  ;;  %v9620_v42 = vmul.f32 %v13916_v55, %v16019_v62  ;;  %13455 = vmatprep.subr.mxu0 %v16548_v26 }
0x1386   :  { %v9619_v39 = vmul.f32 %v13918_v28, %v16021_v53  ;;  %v10450_v53 = vpop.permute.xlu1 %10449 }
0x1387   :  { %13448 = vmatmul.mubr.msk.f32.vlgmr.msra.gmra.mxu0 %vm285_vm2, %v9620_v42  ;;  %v10528_v51 = vpop.permute.xlu0 %10527 }
0x1388   :  { %13443 = vmatmul.mubr.msk.f32.vlgmr.msra.gmra.mxu1 %vm285_vm2, %v9619_v39  ;;  %13456 = vmatpush3.msra.mxu0 %v15558_v38 }
0x1389   :  { %v13920_v0 = vpop.eup %13919  ;;  %13451 = vmatpush3.msra.mxu1 %v15414_v29  ;;  %13452 = vmatprep.mubr.msk.f32.mxu1 %vm14001_vm1, %v16548_v26 }
0x138a   :  { %v9621_v30 = vmul.f32 %v13920_v0, %v16027_v41  ;;  %13460 = vmatprep.subr.mxu1 %v16548_v26  ;;  %13457 = vmatprep.mubr.msk.f32.mxu0 %vm14001_vm1, %v16548_v26  ;;  %v10608_v32 = vpop.permute.xlu1 %10607 }
0x138b   :  { %13465 = vmatprep.subr.mxu0 %v16548_v26  ;;  %v10686_v31 = vpop.permute.xlu0 %10685 }
0x138c   :  { %13453 = vmatmul.mubr.msk.f32.vlgmr.msra.gmra.mxu1 %vm285_vm2, %v9621_v30 }
0x138d   :  { %13461 = vmatpush3.xpose.msk.msra.mxu1 %vm285_vm2, %v10218_v56  ;;  %13462 = vmatprep.mubr.msk.f32.mxu1 %vm14001_vm1, %v16548_v26 }
0x138e   :  { %13470 = vmatprep.subr.mxu1 %v16548_v26 }
0x138f   :  { %v10684_v62 = vpop.permute.xlu0 %10683 }
0x1390   :  { %13463 = vmatmul.mubr.msk.f32.vlgmr.msra.gmra.mxu1 %vm285_vm2, %v16039_v60 }
0x1391   :  { %13471 = vmatpush3.xpose.msk.msra.mxu1 %vm285_vm2, %v16056_v43  ;;  %13472 = vmatprep.mubr.msk.f32.mxu1 %vm14001_vm1, %v16548_v26  ;;  %v8444_v43 = vadd.f32 %v15962_v50, %v15942_v3 }
0x1392   :  { %13480 = vmatprep.subr.mxu1 %v16548_v26 }
0x1394   :  { %13473 = vmatmul.mubr.msk.f32.vlgmr.msra.gmra.mxu1 %vm285_vm2, %v10372_v17 }
0x1395   :  { %13481 = vmatpush3.xpose.msk.msra.mxu1 %vm285_vm2, %v10530_v45  ;;  %13482 = vmatprep.mubr.msk.f32.mxu1 %vm14001_vm1, %v16548_v26 }
0x1396   :  { %13490 = vmatprep.subr.mxu1 %v16548_v26 }
0x1398   :  { %13483 = vmatmul.mubr.msk.f32.vlgmr.msra.gmra.mxu1 %vm285_vm2, %v10528_v51 }
0x1399   :  { %13491 = vmatpush3.xpose.msk.msra.mxu1 %vm285_vm2, %v10686_v31  ;;  %13492 = vmatprep.mubr.msk.f32.mxu1 %vm14001_vm1, %v16548_v26 }
0x139a   :  { %13500 = vmatprep.subr.mxu1 %v16548_v26 }
0x139c   :  { %13493 = vmatmul.mubr.msk.f32.vlgmr.msra.gmra.mxu1 %vm285_vm2, %v10684_v62 }
0x139d   :  { %13502 = vmatprep.mubr.msk.f32.mxu1 %vm14001_vm1, %v16548_v26 }
0x13b3   :  { %v9606_v20 = vpop.xlane.xlu1 %9605 }
0x13b4   :  { %13921 = vrcp.f32 %v9606_v20 }
0x13b7   :  { %v10606_v60 = vpop.permute.xlu1 %10605 }
0x13c1   :  { %v13922_v41 = vpop.eup %13921 }
0x13c2   :  { %v9622_v13 = vmul.f32 %v13922_v41, %v16052_v40 }
0x13c4   :  { %13458 = vmatmul.mubr.msk.f32.vlgmr.msra.gmra.mxu0 %vm285_vm2, %v9622_v13 }
0x13c5   :  { %13466 = vmatpush3.xpose.msk.msra.mxu0 %vm285_vm2, %v16035_v27  ;;  %13467 = vmatprep.mubr.msk.f32.mxu0 %vm14001_vm1, %v16548_v26  ;;  %v10764_v27 = vpop.permute.xlu1 %10763 }
0x13c6   :  { %13475 = vmatprep.subr.mxu0 %v16548_v26 }
0x13c8   :  { %13468 = vmatmul.mubr.msk.f32.vlgmr.msra.gmra.mxu0 %vm285_vm2, %v16045_v47 }
0x13c9   :  { %13476 = vmatpush3.xpose.msk.msra.mxu0 %vm285_vm2, %v16076_v36  ;;  %13477 = vmatprep.mubr.msk.f32.mxu0 %vm14001_vm1, %v16548_v26  ;;  %v10762_v47 = vpop.permute.xlu1 %10761  ;;  %v8748_v36 = vadd.f32 %v15966_v33, %v15946_v44 }
0x13ca   :  { %13485 = vmatprep.subr.mxu0 %v16548_v26 }
0x13cc   :  { %13478 = vmatmul.mubr.msk.f32.vlgmr.msra.gmra.mxu0 %vm285_vm2, %v10450_v53 }
0x13cd   :  { %13486 = vmatpush3.xpose.msk.msra.mxu0 %vm285_vm2, %v10608_v32  ;;  %13487 = vmatprep.mubr.msk.f32.mxu0 %vm14001_vm1, %v16548_v26 }
0x13ce   :  { %13495 = vmatprep.subr.mxu0 %v16548_v26 }
0x13d0   :  { %13488 = vmatmul.mubr.msk.f32.vlgmr.msra.gmra.mxu0 %vm285_vm2, %v10606_v60 }
0x13d1   :  { %13496 = vmatpush3.xpose.msk.msra.mxu0 %vm285_vm2, %v10764_v27  ;;  %13497 = vmatprep.mubr.msk.f32.mxu0 %vm14001_vm1, %v16548_v26 }
0x13d2   :  { %13505 = vmatprep.subr.mxu0 %v16548_v26 }
0x13d4   :  { %13498 = vmatmul.mubr.msk.f32.vlgmr.msra.gmra.mxu0 %vm285_vm2, %v10762_v47 }
0x13d5   :  { %13507 = vmatprep.mubr.msk.f32.mxu0 %vm14001_vm1, %v16548_v26 }
0x140b   :  { %v9692_v35 = vpop.f32.mrf.mxu1 }
0x140c   :  { %v16156_v2 = vadd.f32 %v9692_v35, %v15948_v19 }
0x140d   :  { %v13424_v59 = vpop.f32.mrf.mxu1 }
0x140f   :  { %v9838_v40 = vpop.f32.mrf.mxu1 }
0x1410   :  { %v16159_v15 = vadd.f32 %v9838_v40, %v15950_v63 }
0x1411   :  { %v13434_v56 = vpop.f32.mrf.mxu1 }
0x143f   :  { %v9765_v1 = vpop.f32.mrf.mxu0 }
0x1440   :  { %v16163_v18 = vadd.f32 %v9765_v1, %v8444_v43 }
0x1441   :  { %v13429_v11 = vpop.f32.mrf.mxu0 }
0x1443   :  { %v9911_v16 = vpop.f32.mrf.mxu0 }
0x1444   :  { %v16167_v23 = vadd.f32 %v9911_v16, %v8596_v22 }
0x1445   :  { %v13439_v19 = vpop.f32.mrf.mxu0 }
0x1447   :  { %v10057_v63 = vpop.f32.mrf.mxu0 }
0x1448   :  { %v9984_v4 = vpop.f32.mrf.mxu1  ;;  %v16171_v58 = vadd.f32 %v10057_v63, %v8748_v36 }
0x1449   :  { %v16174_v3 = vadd.f32 %v9984_v4, %v15952_v37  ;;  %v13449_v50 = vpop.f32.mrf.mxu0 }
0x144a   :  { %v13444_v8 = vpop.f32.mrf.mxu1 }
0x144c   :  { %v10130_v48 = vpop.f32.mrf.mxu1 }
0x144d   :  { %v16177_v10 = vadd.f32 %v10130_v48, %v15954_v61 }
0x144e   :  { %v13454_v7 = vpop.f32.mrf.mxu1 }
0x1450   :  { %v10289_v49 = vpop.f32.mrf.mxu1 }
0x1451   :  { %v10839_v9 = vsel %vm37_vm3, %v10289_v49, -1e+30 }
0x1452   :  { %v10847_v44 = vsel %vm285_vm2, %v10839_v9, -inf  ;;  %v13464_v33 = vpop.f32.mrf.mxu1 }
0x1453   :  { %10848 = vmax.xlane.f32.xlu0 %v10847_v44 }
0x1454   :  { %v10445_v25 = vpop.f32.mrf.mxu1 }
0x1455   :  { %v10841_v37 = vsel %vm37_vm3, %v10445_v25, -1e+30 }
0x1456   :  { %v10853_v5 = vsel %vm285_vm2, %v10841_v37, -inf  ;;  %v13474_v24 = vpop.f32.mrf.mxu1 }
0x1457   :  { %10854 = vmax.xlane.f32.xlu0 %v10853_v5 }
0x1458   :  { %v10601_v17 = vpop.f32.mrf.mxu1 }
0x145a   :  { %v13484_v61 = vpop.f32.mrf.mxu1 }
0x145c   :  { %v10757_v55 = vpop.f32.mrf.mxu1 }
0x145d   :  { %v10845_v35 = vsel %vm37_vm3, %v10757_v55, -1e+30 }
0x145e   :  { %v13494_v28 = vpop.f32.mrf.mxu1  ;;  %v10865_v56 = vsel %vm285_vm2, %v10845_v35, -inf }
0x1484   :  { %v10203_v42 = vpop.f32.mrf.mxu0 }
0x1485   :  { %v16186_v39 = vadd.f32 %v10203_v42, %v15968_v46  ;;  %v10843_v46 = vsel %vm37_vm3, %v10601_v17, -1e+30 }
0x1486   :  { %v13459_v0 = vpop.f32.mrf.mxu0  ;;  %v10859_v60 = vsel %vm285_vm2, %v10843_v46, -inf }
0x1488   :  { %v10367_v45 = vpop.f32.mrf.mxu0 }
0x1489   :  { %v10840_v30 = vsel %vm37_vm3, %v10367_v45, -1e+30 }
0x148a   :  { %v10850_v51 = vsel %vm285_vm2, %v10840_v30, -inf  ;;  %v13469_v31 = vpop.f32.mrf.mxu0 }
0x148b   :  { %10851 = vmax.xlane.f32.xlu1 %v10850_v51 }
0x148c   :  { %v10523_v62 = vpop.f32.mrf.mxu0 }
0x148d   :  { %v10842_v53 = vsel %vm37_vm3, %v10523_v62, -1e+30 }
0x148e   :  { %v10856_v32 = vsel %vm285_vm2, %v10842_v53, -inf  ;;  %v13479_v20 = vpop.f32.mrf.mxu0 }
0x148f   :  { %10857 = vmax.xlane.f32.xlu0 %v10856_v32 }
0x1490   :  { %v10679_v41 = vpop.f32.mrf.mxu0 }
0x1491   :  { %v10844_v13 = vsel %vm37_vm3, %v10679_v41, -1e+30 }
0x1492   :  { %v10862_v27 = vsel %vm285_vm2, %v10844_v13, -inf  ;;  %v13489_v47 = vpop.f32.mrf.mxu0 }
0x1493   :  { %10863 = vmax.xlane.f32.xlu1 %v10862_v27  ;;  %10860 = vmax.xlane.f32.xlu0 %v10859_v60 }
0x1494   :  { %v10835_v59 = vpop.f32.mrf.mxu0 }
0x1495   :  { %v10846_v40 = vsel %vm37_vm3, %v10835_v59, -1e+30 }
0x1496   :  { %v10868_v43 = vsel %vm285_vm2, %v10846_v40, -inf  ;;  %v13499_v1 = vpop.f32.mrf.mxu0 }
0x1497   :  { %10869 = vmax.xlane.f32.xlu1 %v10868_v43  ;;  %10866 = vmax.xlane.f32.xlu0 %v10865_v56 }
0x14a8   :  { %11013 = vrot.lane.b32.xlu1 %v15374_v57, %s14002_s27 }
0x14ac   :  { %11090 = vrot.lane.b32.xlu1 %v15386_v54, %s14002_s27 }
0x14ad   :  { %10936 = vrot.lane.b32.xlu0 %v15366_v14, %s14002_s27 }
0x14b0   :  { %11167 = vrot.lane.b32.xlu1 %v15396_v21, %s14002_s27 }
0x14b1   :  { %11244 = vrot.lane.b32.xlu0 %v15402_v34, %s14002_s27 }
0x14b4   :  { %11321 = vrot.lane.b32.xlu1 %v15408_v12, %s14002_s27 }
0x14dc   :  { %v10849_v52 = vpop.xlane.xlu0 %10848 }
0x14dd   :  { %v10871_v11 = vsub.f32 %v10839_v9, %v10849_v52 }
0x14df   :  { %v10879_v22 = vmul.f32 1.442695, %v10871_v11 }
0x14e0   :  { %v10855_v16 = vpop.xlane.xlu0 %10854 }
0x14e1   :  { %13923 = vpow2.f32 %v10879_v22  ;;  %v10873_v57 = vsub.f32 %v10841_v37, %v10855_v16 }
0x14e3   :  { %v10883_v19 = vmul.f32 1.442695, %v10873_v57 }
0x14e5   :  { %13925 = vpow2.f32 %v10883_v19 }
0x14ee   :  { %v13924_v54 = vpop.eup %13923 }
0x14ef   :  { %v10895_v14 = vsel %vm285_vm2, %v13924_v54, 0.0 }
0x14f0   :  { %10896 = vadd.xlane.f32.xlu0 %v10895_v14 }
0x14f2   :  { %v16219_v36 = vpop.eup %13925 }
0x14f3   :  { %v10901_v21 = vsel %vm285_vm2, %v16219_v36, 0.0 }
0x14f4   :  { %10902 = vadd.xlane.f32.xlu0 %v10901_v21 }
0x1514   :  { %v10852_v34 = vpop.xlane.xlu1 %10851 }
0x1515   :  { %v10872_v12 = vsub.f32 %v10840_v30, %v10852_v34 }
0x1517   :  { %v10881_v63 = vmul.f32 1.442695, %v10872_v12 }
0x1518   :  { %v10858_v4 = vpop.xlane.xlu0 %10857 }
0x1519   :  { %13927 = vpow2.f32 %v10881_v63  ;;  %v10874_v50 = vsub.f32 %v10842_v53, %v10858_v4 }
0x151b   :  { %v10885_v8 = vmul.f32 1.442695, %v10874_v50 }
0x151c   :  { %v10864_v48 = vpop.xlane.xlu1 %10863  ;;  %v10861_v7 = vpop.xlane.xlu0 %10860 }
0x151d   :  { %13929 = vpow2.f32 %v10885_v8  ;;  %v10876_v49 = vsub.f32 %v10844_v13, %v10864_v48  ;;  %v10875_v9 = vsub.f32 %v10843_v46, %v10861_v7 }
0x151f   :  { %v10889_v44 = vmul.f32 1.442695, %v10876_v49  ;;  %v10887_v33 = vmul.f32 1.442695, %v10875_v9 }
0x1520   :  { %v10870_v25 = vpop.xlane.xlu1 %10869  ;;  %v10867_v37 = vpop.xlane.xlu0 %10866 }
0x1521   :  { %13931 = vpow2.f32 %v10889_v44  ;;  %v10878_v5 = vsub.f32 %v10846_v40, %v10870_v25  ;;  %v10877_v24 = vsub.f32 %v10845_v35, %v10867_v37 }
0x1522   :  { %13933 = vpow2.f32 %v10887_v33 }
0x1523   :  { %v10893_v17 = vmul.f32 1.442695, %v10878_v5  ;;  %v10891_v61 = vmul.f32 1.442695, %v10877_v24 }
0x1524   :  { %v11014_v55 = vpop.permute.xlu1 %11013  ;;  %v10937_v28 = vpop.permute.xlu0 %10936 }
0x1525   :  { %13935 = vpow2.f32 %v10893_v17  ;;  %13501 = vmatpush3.msra.mxu1 %v10937_v28  ;;  %13506 = vmatpush3.msra.mxu0 %v11014_v55  ;;  %v16549_v17 = vld [vmem:[#allocation6_spill] sm:$0xff] }
0x1526   :  { %v13928_v42 = vpop.eup %13927  ;;  %13937 = vpow2.f32 %v10891_v61  ;;  %13510 = vmatprep.subr.mxu1 %v16548_v26  ;;  %13515 = vmatprep.subr.mxu0 %v16548_v26 }
0x1527   :  { %v10898_v0 = vsel %vm285_vm2, %v13928_v42, 0.0 }
0x1528   :  { %10899 = vadd.xlane.f32.xlu1 %v10898_v0  ;;  %v11245_v13 = vpop.permute.xlu0 %11244  ;;  %v11091_v59 = vpop.permute.xlu1 %11090 }
0x152a   :  { %v13930_v45 = vpop.eup %13929 }
0x152b   :  { %v10904_v30 = vsel %vm285_vm2, %v13930_v45, 0.0 }
0x152c   :  { %10905 = vadd.xlane.f32.xlu1 %v10904_v30 }
0x152e   :  { %v13932_v51 = vpop.eup %13931 }
0x152f   :  { %v13934_v31 = vpop.eup %13933  ;;  %v10910_v62 = vsel %vm285_vm2, %v13932_v51, 0.0 }
0x1530   :  { %10911 = vadd.xlane.f32.xlu1 %v10910_v62  ;;  %v10907_v53 = vsel %vm285_vm2, %v13934_v31, 0.0 }
0x1531   :  { %10908 = vadd.xlane.f32.xlu0 %v10907_v53 }
0x1532   :  { %v16229_v32 = vpop.eup %13935 }
0x1533   :  { %v16231_v20 = vpop.eup %13937  ;;  %v10916_v46 = vsel %vm285_vm2, %v16229_v32, 0.0 }
0x1534   :  { %10917 = vadd.xlane.f32.xlu1 %v10916_v46  ;;  %v10913_v41 = vsel %vm285_vm2, %v16231_v20, 0.0 }
0x1535   :  { %10914 = vadd.xlane.f32.xlu0 %v10913_v41 }
0x1545   :  { %11475 = vrot.lane.b32.xlu1 %v15558_v38, %s14002_s27 }
0x154b   :  { %11398 = vrot.lane.b32.xlu0 %v15414_v29, %s14002_s27  ;;  %v11168_v29 = vpop.permute.xlu1 %11167 }
0x154f   :  { %v11322_v56 = vpop.permute.xlu1 %11321 }
0x1579   :  { %v10897_v60 = vpop.xlane.xlu0 %10896 }
0x157a   :  { %13939 = vrcp.f32 %v10897_v60 }
0x157d   :  { %v10903_v27 = vpop.xlane.xlu0 %10902 }
0x157e   :  { %13941 = vrcp.f32 %v10903_v27  ;;  %v16553_v27 = vld [vmem:[#allocation9_spill] sm:$0xff] }
0x1587   :  { %v13940_v47 = vpop.eup %13939 }
0x1588   :  { %v10927_v35 = vmul.f32 %v13940_v47, %v13924_v54 }
0x158a   :  { %13503 = vmatmul.mubr.msk.f32.vlgmr.msra.gmra.mxu1 %vm285_vm2, %v10927_v35 }
0x158b   :  { %v13942_v40 = vpop.eup %13941  ;;  %13511 = vmatpush3.msra.mxu1 %v11091_v59  ;;  %13512 = vmatprep.mubr.msk.f32.mxu1 %vm14001_vm1, %v16548_v26 }
0x158c   :  { %v10929_v38 = vmul.f32 %v13942_v40, %v16219_v36  ;;  %13520 = vmatprep.subr.mxu1 %v16548_v26 }
0x158e   :  { %13513 = vmatmul.mubr.msk.f32.vlgmr.msra.gmra.mxu1 %vm285_vm2, %v10929_v38 }
0x158f   :  { %13521 = vmatpush3.msra.mxu1 %v11245_v13  ;;  %13522 = vmatprep.mubr.msk.f32.mxu1 %vm14001_vm1, %v16548_v26 }
0x1590   :  { %13530 = vmatprep.subr.mxu1 %v16548_v26 }
0x15b1   :  { %v10900_v43 = vpop.xlane.xlu1 %10899 }
0x15b2   :  { %13943 = vrcp.f32 %v10900_v43 }
0x15b5   :  { %v10906_v1 = vpop.xlane.xlu1 %10905 }
0x15b6   :  { %13945 = vrcp.f32 %v10906_v1 }
0x15b9   :  { %v10912_v52 = vpop.xlane.xlu1 %10911 }
0x15ba   :  { %13947 = vrcp.f32 %v10912_v52  ;;  %v10909_v11 = vpop.xlane.xlu0 %10908  ;;  %v16555_v52 = vld [vmem:[#allocation10_spill] sm:$0xff] }
0x15bb   :  { %13949 = vrcp.f32 %v10909_v11 }
0x15bd   :  { %v10918_v22 = vpop.xlane.xlu1 %10917 }
0x15be   :  { %13951 = vrcp.f32 %v10918_v22  ;;  %v10915_v16 = vpop.xlane.xlu0 %10914 }
0x15bf   :  { %v13944_v57 = vpop.eup %13943  ;;  %13953 = vrcp.f32 %v10915_v16 }
0x15c0   :  { %v10928_v19 = vmul.f32 %v13944_v57, %v13928_v42  ;;  %v16550_v42 = vld [vmem:[#allocation7_spill] sm:$0xff] }
0x15c1   :  { %v11476_v63 = vpop.permute.xlu1 %11475 }
0x15c2   :  { %13508 = vmatmul.mubr.msk.f32.vlgmr.msra.gmra.mxu0 %vm285_vm2, %v10928_v19  ;;  %v11399_v50 = vpop.permute.xlu0 %11398 }
0x15c3   :  { %v13946_v54 = vpop.eup %13945  ;;  %13516 = vmatpush3.msra.mxu0 %v11168_v29  ;;  %13517 = vmatprep.mubr.msk.f32.mxu0 %vm14001_vm1, %v16548_v26 }
0x15c4   :  { %v10930_v14 = vmul.f32 %v13946_v54, %v13930_v45  ;;  %13525 = vmatprep.subr.mxu0 %v16548_v26 }
0x15c6   :  { %13518 = vmatmul.mubr.msk.f32.vlgmr.msra.gmra.mxu0 %vm285_vm2, %v10930_v14 }
0x15c7   :  { %v13948_v36 = vpop.eup %13947  ;;  %13526 = vmatpush3.msra.mxu0 %v11322_v56  ;;  %13527 = vmatprep.mubr.msk.f32.mxu0 %vm14001_vm1, %v16548_v26  ;;  %v16554_v56 = vld [vmem:[#allocation12_spill] sm:$0xff] }
0x15c8   :  { %v13950_v21 = vpop.eup %13949  ;;  %v10932_v34 = vmul.f32 %v13948_v36, %v13932_v51  ;;  %13535 = vmatprep.subr.mxu0 %v16548_v26 }
0x15c9   :  { %v10931_v12 = vmul.f32 %v13950_v21, %v13934_v31  ;;  %v16551_v31 = vld [vmem:[#allocation8_spill] sm:$0xff] }
0x15ca   :  { %13528 = vmatmul.mubr.msk.f32.vlgmr.msra.gmra.mxu0 %vm285_vm2, %v10932_v34 }
0x15cb   :  { %v13952_v4 = vpop.eup %13951  ;;  %13523 = vmatmul.mubr.msk.f32.vlgmr.msra.gmra.mxu1 %vm285_vm2, %v10931_v12  ;;  %13536 = vmatpush3.msra.mxu0 %v11476_v63 }
0x15cc   :  { %v13954_v8 = vpop.eup %13953  ;;  %v10934_v48 = vmul.f32 %v13952_v4, %v16229_v32  ;;  %13531 = vmatpush3.msra.mxu1 %v11399_v50  ;;  %13532 = vmatprep.mubr.msk.f32.mxu1 %vm14001_vm1, %v16548_v26 }
0x15cd   :  { %v10933_v7 = vmul.f32 %v13954_v8, %v16231_v20  ;;  %13537 = vmatprep.mubr.msk.f32.mxu0 %vm14001_vm1, %v16548_v26 }
0x15ce   :  { %13538 = vmatmul.mubr.msk.f32.vlgmr.msra.gmra.mxu0 %vm285_vm2, %v10934_v48 }
0x15cf   :  { %13533 = vmatmul.mubr.msk.f32.vlgmr.msra.gmra.mxu1 %vm285_vm2, %v10933_v7 }
0x164a   :  { %v11008_v49 = vpop.f32.mrf.mxu1 }
0x164b   :  { %v11551_v9 = vadd.f32 %v11008_v49, %v16156_v2 }
0x164c   :  { %v13504_v44 = vpop.f32.mrf.mxu1 }
0x164d   :  { %v16270_v33 = vadd.f32 %v11551_v9, %v15240_v6 }
0x164e   :  { %v11162_v25 = vpop.f32.mrf.mxu1 }
0x164f   :  { %v11553_v37 = vadd.f32 %v11162_v25, %v16159_v15  ;;  %v11567_v5 = vsel %vm39_vm0, %v16270_v33, 0.0 }
0x1650   :  { %11568 = vadd.xlane.f32.xlu0 %v11567_v5  ;;  %v13514_v24 = vpop.f32.mrf.mxu1 }
0x1651   :  { %v16276_v61 = vadd.f32 %v11553_v37, %v16549_v17 }
0x1653   :  { %v11573_v55 = vsel %vm39_vm0, %v16276_v61, 0.0 }
0x1654   :  { %11574 = vadd.xlane.f32.xlu0 %v11573_v55 }
0x1682   :  { %v11085_v2 = vpop.f32.mrf.mxu0 }
0x1683   :  { %v11552_v28 = vadd.f32 %v11085_v2, %v16163_v18 }
0x1684   :  { %v13509_v6 = vpop.f32.mrf.mxu0 }
0x1685   :  { %v16282_v0 = vadd.f32 %v11552_v28, %v16550_v42 }
0x1686   :  { %v11239_v15 = vpop.f32.mrf.mxu0 }
0x1687   :  { %v11554_v45 = vadd.f32 %v11239_v15, %v16167_v23  ;;  %v11570_v30 = vsel %vm39_vm0, %v16282_v0, 0.0  ;;  %v16552_v23 = vld [vmem:[#allocation11_spill] sm:$0xff] }
0x1688   :  { %11571 = vadd.xlane.f32.xlu1 %v11570_v30  ;;  %v13519_v51 = vpop.f32.mrf.mxu0 }
0x1689   :  { %v16288_v62 = vadd.f32 %v11554_v45, %v16551_v31 }
0x168a   :  { %v11393_v53 = vpop.f32.mrf.mxu0 }
0x168b   :  { %v11316_v32 = vpop.f32.mrf.mxu1  ;;  %v11556_v20 = vadd.f32 %v11393_v53, %v16171_v58  ;;  %v11576_v18 = vsel %vm39_vm0, %v16288_v62, 0.0 }
0x168c   :  { %v11555_v46 = vadd.f32 %v11316_v32, %v16174_v3  ;;  %v13529_v41 = vpop.f32.mrf.mxu0  ;;  %11577 = vadd.xlane.f32.xlu0 %v11576_v18 }
0x168d   :  { %v16295_v13 = vadd.f32 %v11556_v20, %v16552_v23  ;;  %v13524_v60 = vpop.f32.mrf.mxu1  ;;  %v13625_v23 = vld [vmem:[%s16514_s2 + $0x18] sm:$0xff]  }
0x168e   :  { %v16298_v47 = vadd.f32 %v11555_v46, %v16553_v27  ;;  %v11547_v35 = vpop.f32.mrf.mxu0  ;;  %13540 = vmatprep.subr.bf16.mxu1 %v13625_v23  ;;  %v13626_v60 = vld [vmem:[%s16514_s2 + $0x10] sm:$0xff]  }
0x168f   :  { %v11470_v59 = vpop.f32.mrf.mxu1  ;;  %v11558_v40 = vadd.f32 %v11547_v35, %v16186_v39  ;;  %v11582_v58 = vsel %vm39_vm0, %v16295_v13, 0.0  ;;  %13541 = vmatpush3.bf16.msra.mxu1 %v13625_v23 }
0x1690   :  { %v11557_v38 = vadd.f32 %v11470_v59, %v16177_v10  ;;  %11583 = vadd.xlane.f32.xlu1 %v11582_v58  ;;  %v13539_v3 = vpop.f32.mrf.mxu0  ;;  %v11579_v29 = vsel %vm39_vm0, %v16298_v47, 0.0  ;;  %13542 = vmatprep.subr.bf16.mxu1 %v13626_v60 }
0x1691   :  { %v16307_v43 = vadd.f32 %v11558_v40, %v16554_v56  ;;  %11580 = vadd.xlane.f32.xlu0 %v11579_v29  ;;  %v13534_v1 = vpop.f32.mrf.mxu1 }
0x1692   :  { %v16310_v11 = vadd.f32 %v11557_v38, %v16555_v52 }
0x1693   :  { %v11588_v39 = vsel %vm39_vm0, %v16307_v43, 0.0  ;;  %13543 = vmatpush3.bf16.msra.mxu1 %v13626_v60 }
0x1694   :  { %11589 = vadd.xlane.f32.xlu1 %v11588_v39  ;;  %v11585_v10 = vsel %vm39_vm0, %v16310_v11, 0.0  ;;  %13576 = vmatprep.subr.mxu1 %v16548_v26 }
0x1695   :  { %11586 = vadd.xlane.f32.xlu0 %v11585_v10 }
0x16d9   :  { %v11569_v22 = vpop.xlane.xlu0 %11568 }
0x16da   :  { %v11591_v16 = vmul.f32 0.03125, %v11569_v22 }
0x16dc   :  { %v16317_v57 = vsub.f32 %v16270_v33, %v11591_v16 }
0x16dd   :  { %v11575_v19 = vpop.xlane.xlu0 %11574 }
0x16de   :  { %v11593_v54 = vmul.f32 0.03125, %v11575_v19  ;;  %v11607_v14 = vmul.f32 %v16317_v57, %v16317_v57 }
0x16e0   :  { %v16322_v36 = vsub.f32 %v16276_v61, %v11593_v54  ;;  %v11615_v21 = vsel %vm39_vm0, %v11607_v14, 0.0 }
0x16e1   :  { %11616 = vadd.xlane.f32.xlu0 %v11615_v21 }
0x16e2   :  { %v11609_v34 = vmul.f32 %v16322_v36, %v16322_v36 }
0x16e4   :  { %v11621_v12 = vsel %vm39_vm0, %v11609_v34, 0.0 }
0x16e5   :  { %11622 = vadd.xlane.f32.xlu0 %v11621_v12 }
0x1711   :  { %v11572_v63 = vpop.xlane.xlu1 %11571 }
0x1712   :  { %v11592_v4 = vmul.f32 0.03125, %v11572_v63 }
0x1714   :  { %v16329_v50 = vsub.f32 %v16282_v0, %v11592_v4 }
0x1715   :  { %v11578_v8 = vpop.xlane.xlu0 %11577 }
0x1716   :  { %v11594_v48 = vmul.f32 0.03125, %v11578_v8  ;;  %v11608_v7 = vmul.f32 %v16329_v50, %v16329_v50  ;;  %v16374_v8 = vld [vmem:[%s16513_s4 + $0x8] sm:$0xff] }
0x1718   :  { %v16334_v49 = vsub.f32 %v16288_v62, %v11594_v48  ;;  %v11618_v9 = vsel %vm39_vm0, %v11608_v7, 0.0  ;;  %v16556_v48 = vld [vmem:[#allocation2_spill] sm:$0xff] }
0x1719   :  { %11619 = vadd.xlane.f32.xlu1 %v11618_v9  ;;  %v11584_v44 = vpop.xlane.xlu1 %11583  ;;  %v16557_v7 = vsub.s32 3, %v16556_v48  ;;  %vm11986_vm4 = vcmp.eq.s32.totalorder %v16556_v48, 0 }
0x171a   :  { %v11596_v25 = vmul.f32 0.03125, %v11584_v44  ;;  %v11581_v37 = vpop.xlane.xlu0 %11580  ;;  %v11610_v5 = vmul.f32 %v16334_v49, %v16334_v49 }
0x171b   :  { %v11595_v24 = vmul.f32 0.03125, %v11581_v37  ;;  %v11674_v9 = vrot.slane %v16374_v8, %v16557_v7 }
0x171c   :  { %v16340_v17 = vsub.f32 %v16295_v13, %v11596_v25  ;;  %v11624_v55 = vsel %vm39_vm0, %v11610_v5, 0.0 }
0x171d   :  { %v16344_v2 = vsub.f32 %v16298_v47, %v11595_v24  ;;  %v11590_v28 = vpop.xlane.xlu1 %11589  ;;  %11625 = vadd.xlane.f32.xlu1 %v11624_v55 }
0x171e   :  { %v11598_v6 = vmul.f32 0.03125, %v11590_v28  ;;  %v11587_v42 = vpop.xlane.xlu0 %11586  ;;  %v11612_v15 = vmul.f32 %v16340_v17, %v16340_v17 }
0x171f   :  { %v11597_v45 = vmul.f32 0.03125, %v11587_v42  ;;  %v11611_v30 = vmul.f32 %v16344_v2, %v16344_v2  ;;  %v16558_v42 = vsub.s32 4, %v16556_v48 }
0x1720   :  { %v16351_v51 = vsub.f32 %v16307_v43, %v11598_v6  ;;  %v11630_v31 = vsel %vm39_vm0, %v11612_v15, 0.0 }
0x1721   :  { %v16355_v53 = vsub.f32 %v16310_v11, %v11597_v45  ;;  %11631 = vadd.xlane.f32.xlu1 %v11630_v31  ;;  %v11627_v32 = vsel %vm39_vm0, %v11611_v30, 0.0  ;;  %v11686_v15 = vrot.slane %v16374_v8, %v16558_v42 }
0x1722   :  { %11628 = vadd.xlane.f32.xlu0 %v11627_v32  ;;  %v11614_v20 = vmul.f32 %v16351_v51, %v16351_v51 }
0x1723   :  { %v11613_v18 = vmul.f32 %v16355_v53, %v16355_v53 }
0x1724   :  { %v11636_v46 = vsel %vm39_vm0, %v11614_v20, 0.0 }
0x1725   :  { %11637 = vadd.xlane.f32.xlu1 %v11636_v46  ;;  %v11633_v41 = vsel %vm39_vm0, %v11613_v18, 0.0 }
0x1726   :  { %11634 = vadd.xlane.f32.xlu0 %v11633_v41 }
0x176a   :  { %v11617_v27 = vpop.xlane.xlu0 %11616 }
0x176b   :  { %v11639_v35 = vmul.f32 0.03125, %v11617_v27 }
0x176d   :  { %v11647_v40 = vadd.f32 1e-05, %v11639_v35 }
0x176e   :  { %v11623_v59 = vpop.xlane.xlu0 %11622 }
0x176f   :  { %v11641_v58 = vmul.f32 0.03125, %v11623_v59  ;;  %13955 = vrsqrt.f32 %v11647_v40 }
0x1771   :  { %v11649_v38 = vadd.f32 1e-05, %v11641_v58 }
0x1773   :  { %13957 = vrsqrt.f32 %v11649_v38 }
0x177c   :  { %v13956_v14 = vpop.eup %13955 }
0x177d   :  { %v11663_v25 = vmul.f32 %v13956_v14, %v16317_v57  ;;  %v13633_v14 = vld [vmem:[%s16515_s3 + $0x48] sm:$0xff]  }
0x177f   :  { %v11675_v6 = vmul.f32 %v11674_v9, %v11663_v25 }
0x1780   :  { %v13958_v37 = vpop.eup %13957 }
0x1781   :  { %v11665_v55 = vmul.f32 %v13958_v37, %v16322_v36  ;;  %v11687_v57 = vadd.f32 %v11686_v15, %v11675_v6 }
0x1783   :  { %v11677_v31 = vmul.f32 %v11674_v9, %v11665_v55 }
0x1785   :  { %v11689_v36 = vadd.f32 %v11686_v15, %v11677_v31 }
0x17a2   :  { %v11620_v3 = vpop.xlane.xlu1 %11619 }
0x17a3   :  { %v11640_v29 = vmul.f32 0.03125, %v11620_v3 }
0x17a5   :  { %v11648_v56 = vadd.f32 1e-05, %v11640_v29 }
0x17a6   :  { %v11626_v1 = vpop.xlane.xlu1 %11625 }
0x17a7   :  { %13959 = vrsqrt.f32 %v11648_v56  ;;  %v11642_v52 = vmul.f32 0.03125, %v11626_v1 }
0x17a9   :  { %v11650_v39 = vadd.f32 1e-05, %v11642_v52 }
0x17aa   :  { %v11632_v10 = vpop.xlane.xlu1 %11631 }
0x17ab   :  { %13961 = vrsqrt.f32 %v11650_v39  ;;  %v11644_v22 = vmul.f32 0.03125, %v11632_v10  ;;  %v11629_v16 = vpop.xlane.xlu0 %11628 }
0x17ac   :  { %v11643_v19 = vmul.f32 0.03125, %v11629_v16  ;;  %v13630_v16 = vld [vmem:[%s16515_s3 + $0x60] sm:$0xff]  }
0x17ad   :  { %v11652_v54 = vadd.f32 1e-05, %v11644_v22  ;;  %v13629_v22 = vld [vmem:[%s16515_s3 + $0x68] sm:$0xff]  }
0x17ae   :  { %v11651_v21 = vadd.f32 1e-05, %v11643_v19  ;;  %v11638_v34 = vpop.xlane.xlu1 %11637  ;;  %v13631_v19 = vld [vmem:[%s16515_s3 + $0x58] sm:$0xff]  }
0x17af   :  { %13963 = vrsqrt.f32 %v11652_v54  ;;  %v11646_v12 = vmul.f32 0.03125, %v11638_v34  ;;  %v11635_v63 = vpop.xlane.xlu0 %11634  ;;  %v13632_v54 = vld [vmem:[%s16515_s3 + $0x50] sm:$0xff]   ;;  %v16559_v34 = vld [vmem:[#allocation5_spill] sm:$0xff] }
0x17b0   :  { %13965 = vrsqrt.f32 %v11651_v21  ;;  %v11645_v4 = vmul.f32 0.03125, %v11635_v63  ;;  %v13634_v21 = vld [vmem:[%s16515_s3 + $0x40] sm:$0xff]  }
0x17b1   :  { %v11654_v44 = vadd.f32 1e-05, %v11646_v12  ;;  %v11707_v12 = vrot.slane %v16374_v8, %v16559_v34 }
0x17b2   :  { %v11653_v5 = vadd.f32 1e-05, %v11645_v4 }
0x17b3   :  { %13967 = vrsqrt.f32 %v11654_v44 }
0x17b4   :  { %v13960_v24 = vpop.eup %13959  ;;  %13969 = vrsqrt.f32 %v11653_v5 }
0x17b5   :  { %v11664_v28 = vmul.f32 %v13960_v24, %v16329_v50 }
0x17b7   :  { %v11676_v45 = vmul.f32 %v11674_v9, %v11664_v28 }
0x17b8   :  { %v13962_v30 = vpop.eup %13961 }
0x17b9   :  { %v11666_v32 = vmul.f32 %v13962_v30, %v16334_v49  ;;  %v11688_v20 = vadd.f32 %v11686_v15, %v11676_v45 }
0x17bb   :  { %v11678_v18 = vmul.f32 %v11674_v9, %v11666_v32  ;;  %v11695_v46 = vpack.c.bf16 %v11688_v20, %v11687_v57 }
0x17bc   :  { %v13964_v41 = vpop.eup %13963 }
0x17bd   :  { %v13966_v23 = vpop.eup %13965  ;;  %13544 = vmatprep.mubr.msk.bf16.mxu1 %vm39_vm0, %v11695_v46  ;;  %v11690_v50 = vadd.f32 %v11686_v15, %v11678_v18  ;;  %v11668_v60 = vmul.f32 %v13964_v41, %v16340_v17 }
0x17be   :  { %v11667_v27 = vmul.f32 %v13966_v23, %v16344_v2 }
0x17bf   :  { %v11696_v35 = vpack.c.bf16 %v11690_v50, %v11689_v36  ;;  %v11680_v59 = vmul.f32 %v11674_v9, %v11668_v60 }
0x17c0   :  { %v13968_v40 = vpop.eup %13967  ;;  %v11679_v58 = vmul.f32 %v11674_v9, %v11667_v27 }
0x17c1   :  { %v13970_v38 = vpop.eup %13969  ;;  %v11670_v49 = vmul.f32 %v13968_v40, %v16351_v51  ;;  %13545 = vmatmul.mubr.msk.bf16.vlgmr.msra.gmra.mxu1 %vm39_vm0, %v11696_v35  ;;  %v11692_v3 = vadd.f32 %v11686_v15, %v11680_v59  ;;  %v13627_v51 = vld [vmem:[%s16515_s3 + $0x78] sm:$0xff]  }
0x17c2   :  { %v11669_v29 = vmul.f32 %v13970_v38, %v16355_v53  ;;  %v11691_v56 = vadd.f32 %v11686_v15, %v11679_v58  ;;  %13552 = vmatprep.subr.bf16.mxu0 %v13627_v51  ;;  %v13628_v53 = vld [vmem:[%s16515_s3 + $0x70] sm:$0xff]  }
0x17c3   :  { %v11682_v1 = vmul.f32 %v11674_v9, %v11670_v49  ;;  %13553 = vmatpush3.bf16.msra.mxu0 %v13627_v51 }
0x17c4   :  { %v11697_v52 = vpack.c.bf16 %v11692_v3, %v11691_v56  ;;  %v11681_v39 = vmul.f32 %v11674_v9, %v11669_v29  ;;  %13554 = vmatprep.subr.bf16.mxu0 %v13628_v53 }
0x17c5   :  { %v11694_v10 = vadd.f32 %v11686_v15, %v11682_v1 }
0x17c6   :  { %13548 = vmatprep.mubr.msk.bf16.mxu1 %vm39_vm0, %v11697_v52  ;;  %v11693_v17 = vadd.f32 %v11686_v15, %v11681_v39 }
0x17c7   :  { %13555 = vmatpush3.bf16.msra.mxu0 %v13628_v53 }
0x17c8   :  { %v11698_v2 = vpack.c.bf16 %v11694_v10, %v11693_v17  ;;  %13556 = vmatprep.subr.bf16.mxu0 %v13629_v22 }
0x17ca   :  { %13549 = vmatmul.mubr.msk.bf16.gmra.mxu1 %vm39_vm0, %v11698_v2 }
0x17cb   :  { %13584 = vmatprep.mubr.msk.f32.mxu1 %vm14001_vm1, %v16548_v26  ;;  %13557 = vmatpush3.bf16.msra.mxu0 %v13629_v22 }
0x17cc   :  { %13558 = vmatprep.subr.bf16.mxu0 %v13630_v16 }
0x17cf   :  { %13559 = vmatpush3.bf16.msra.mxu0 %v13630_v16 }
0x17d0   :  { %13560 = vmatprep.subr.bf16.mxu0 %v13631_v19 }
0x17d3   :  { %13561 = vmatpush3.bf16.msra.mxu0 %v13631_v19 }
0x17d4   :  { %13562 = vmatprep.subr.bf16.mxu0 %v13632_v54 }
0x17d7   :  { %13563 = vmatpush3.bf16.msra.mxu0 %v13632_v54 }
0x17d8   :  { %13564 = vmatprep.subr.bf16.mxu0 %v13633_v14 }
0x17db   :  { %13565 = vmatpush3.bf16.msra.mxu0 %v13633_v14 }
0x17dc   :  { %13566 = vmatprep.subr.bf16.mxu0 %v13634_v21 }
0x17df   :  { %13567 = vmatpush3.bf16.msra.mxu0 %v13634_v21 }
0x1881   :  { %v13546_v63 = vpop.f32.mrf.mxu1 }
0x1882   :  { %v11775_v4 = vadd.f32 %v13546_v63, %v11707_v12 }
0x1883   :  { %v11766_v7 = vpop.f32.mrf.mxu1 }
0x1884   :  { %v11767_v9 = vadd.f32 %v11766_v7, %v11707_v12  ;;  %v11807_v44 = vmul.f32 0.70710677, %v11775_v4  ;;  %v11799_v29 = vmul.f32 0.5, %v11775_v4 }
0x1885   :  { %v13547_v25 = vpop.f32.mrf.mxu1 }
0x1886   :  { %v11805_v37 = vmul.f32 0.70710677, %v11767_v9  ;;  %v11778_v5 = vadd.f32 %v13547_v25, %v11707_v12  ;;  %v11797_v38 = vmul.f32 0.5, %v11767_v9 }
0x1887   :  { %v11769_v24 = vpop.f32.mrf.mxu1 }
0x1888   :  { %13971 = verf.f32 %v11805_v37  ;;  %v11808_v55 = vmul.f32 0.70710677, %v11778_v5  ;;  %v11770_v28 = vadd.f32 %v11769_v24, %v11707_v12  ;;  %v11800_v58 = vmul.f32 0.5, %v11778_v5 }
0x1889   :  { %13973 = verf.f32 %v11807_v44  ;;  %v16560_v24 = vsub.s32 5, %v16556_v48 }
0x188a   :  { %13975 = verf.f32 %v11808_v55  ;;  %v11806_v6 = vmul.f32 0.70710677, %v11770_v28  ;;  %v13550_v42 = vpop.f32.mrf.mxu1  ;;  %v11798_v49 = vmul.f32 0.5, %v11770_v28 }
0x188b   :  { %v11791_v15 = vadd.f32 %v13550_v42, %v11707_v12  ;;  %v11861_v55 = vrot.slane %v16374_v8, %v16560_v24 }
0x188c   :  { %13977 = verf.f32 %v11806_v6  ;;  %v11782_v45 = vpop.f32.mrf.mxu1 }
0x188d   :  { %v11783_v30 = vadd.f32 %v11782_v45, %v11707_v12  ;;  %v11811_v31 = vmul.f32 0.70710677, %v11791_v15  ;;  %v11803_v4 = vmul.f32 0.5, %v11791_v15 }
0x188e   :  { %v13551_v32 = vpop.f32.mrf.mxu1 }
0x188f   :  { %v11809_v57 = vmul.f32 0.70710677, %v11783_v30  ;;  %v11794_v20 = vadd.f32 %v13551_v32, %v11707_v12  ;;  %v11801_v21 = vmul.f32 0.5, %v11783_v30 }
0x1890   :  { %v11785_v18 = vpop.f32.mrf.mxu1 }
0x1891   :  { %13979 = verf.f32 %v11809_v57  ;;  %v11812_v46 = vmul.f32 0.70710677, %v11794_v20  ;;  %v11786_v41 = vadd.f32 %v11785_v18, %v11707_v12  ;;  %v11804_v14 = vmul.f32 0.5, %v11794_v20 }
0x1892   :  { %13981 = verf.f32 %v11811_v31 }
0x1893   :  { %13983 = verf.f32 %v11812_v46  ;;  %v11810_v23 = vmul.f32 0.70710677, %v11786_v41  ;;  %v11802_v12 = vmul.f32 0.5, %v11786_v41 }
0x1895   :  { %v13972_v36 = vpop.eup %13971  ;;  %13985 = verf.f32 %v11810_v23 }
0x1896   :  { %v13974_v50 = vpop.eup %13973  ;;  %v11821_v27 = vadd.f32 1.0, %v13972_v36 }
0x1897   :  { %v13976_v60 = vpop.eup %13975  ;;  %v11823_v40 = vadd.f32 1.0, %v13974_v50 }
0x1898   :  { %v11824_v35 = vadd.f32 1.0, %v13976_v60  ;;  %v11829_v1 = vmul.f32 %v11821_v27, %v11797_v38 }
0x1899   :  { %v13978_v59 = vpop.eup %13977  ;;  %v11831_v39 = vmul.f32 %v11823_v40, %v11799_v29 }
0x189a   :  { %v11822_v3 = vadd.f32 1.0, %v13978_v59  ;;  %v11832_v56 = vmul.f32 %v11824_v35, %v11800_v58 }
0x189c   :  { %v11830_v52 = vmul.f32 %v11822_v3, %v11798_v49  ;;  %v11838_v51 = vpack.c.bf16 %v11832_v56, %v11831_v39 }
0x189e   :  { %v13980_v10 = vpop.eup %13979  ;;  %v11837_v17 = vpack.c.bf16 %v11830_v52, %v11829_v1 }
0x189f   :  { %v13982_v2 = vpop.eup %13981  ;;  %v11825_v22 = vadd.f32 1.0, %v13980_v10 }
0x18a0   :  { %v13984_v53 = vpop.eup %13983  ;;  %13568 = vmatprep.mubr.bf16.mxu0 %v11837_v17  ;;  %v11827_v54 = vadd.f32 1.0, %v13982_v2 }
0x18a1   :  { %v11828_v16 = vadd.f32 1.0, %v13984_v53  ;;  %13569 = vmatmul.mubr.bf16.vlgmr.msra.gmra.mxu0 %v11838_v51  ;;  %v11833_v9 = vmul.f32 %v11825_v22, %v11801_v21 }
0x18a2   :  { %v13986_v19 = vpop.eup %13985  ;;  %v11835_v25 = vmul.f32 %v11827_v54, %v11803_v4 }
0x18a3   :  { %v11826_v63 = vadd.f32 1.0, %v13986_v19  ;;  %v11836_v7 = vmul.f32 %v11828_v16, %v11804_v14 }
0x18a5   :  { %v11834_v44 = vmul.f32 %v11826_v63, %v11802_v12  ;;  %v11840_v5 = vpack.c.bf16 %v11836_v7, %v11835_v25 }
0x18a7   :  { %v11839_v37 = vpack.c.bf16 %v11834_v44, %v11833_v9 }
0x18a9   :  { %13572 = vmatprep.mubr.bf16.mxu0 %v11839_v37 }
0x18aa   :  { %13573 = vmatmul.mubr.bf16.gmra.mxu0 %v11840_v5 }
0x1961   :  { %v13570_v28 = vpop.f32.mrf.mxu0 }
0x1962   :  { %v11953_v6 = vadd.f32 %v13570_v28, %v11861_v55 }
0x1963   :  { %v11944_v42 = vpop.f32.mrf.mxu0 }
0x1964   :  { %v11977_v45 = vadd.f32 %v11953_v6, %v16276_v61  ;;  %v11945_v15 = vadd.f32 %v11944_v42, %v11861_v55 }
0x1965   :  { %v13571_v30 = vpop.f32.mrf.mxu0 }
0x1966   :  { %v11991_v31 = vsel %vm11986_vm4, %v11977_v45, 0.0  ;;  %v11975_v32 = vadd.f32 %v11945_v15, %v16270_v33  ;;  %v11956_v57 = vadd.f32 %v13571_v30, %v11861_v55 }
0x1967   :  { %v12011_v20 = vsel %vm39_vm0, %v11991_v31, 0.0  ;;  %v11947_v18 = vpop.f32.mrf.mxu0 }
0x1968   :  { %v12012_v46 = vrot.slane %v12011_v20, 4  ;;  %v11989_v8 = vsel %vm11986_vm4, %v11975_v32, 0.0  ;;  %v11978_v41 = vadd.f32 %v11956_v57, %v16288_v62  ;;  %v11948_v23 = vadd.f32 %v11947_v18, %v11861_v55 }
0x1969   :  { %v11997_v61 = vsel %vm39_vm0, %v11989_v8, 0.0 }
0x196a   :  { %v12013_v36 = vadd.f32 %v12012_v46, %v12011_v20  ;;  %v11998_v50 = vrot.slane %v11997_v61, 4  ;;  %v11992_v60 = vsel %vm11986_vm4, %v11978_v41, 0.0  ;;  %v11976_v33 = vadd.f32 %v11948_v23, %v16282_v0  ;;  %v13574_v27 = vpop.f32.mrf.mxu0 }
0x196b   :  { %v12018_v35 = vsel %vm39_vm0, %v11992_v60, 0.0  ;;  %v11969_v59 = vadd.f32 %v13574_v27, %v11861_v55 }
0x196c   :  { %v11999_v40 = vadd.f32 %v11998_v50, %v11997_v61  ;;  %v12019_v58 = vrot.slane %v12018_v35, 4  ;;  %v11990_v38 = vsel %vm11986_vm4, %v11976_v33, 0.0  ;;  %v11960_v62 = vpop.f32.mrf.mxu0  ;;  %v12014_v56 = vrot.slane %v12013_v36, 2 }
0x196d   :  { %v12004_v49 = vsel %vm39_vm0, %v11990_v38, 0.0  ;;  %v11981_v3 = vadd.f32 %v11969_v59, %v16310_v11  ;;  %v11961_v29 = vadd.f32 %v11960_v62, %v11861_v55 }
0x196e   :  { %v12000_v1 = vrot.slane %v11999_v40, 2  ;;  %v12020_v52 = vadd.f32 %v12019_v58, %v12018_v35  ;;  %v12005_v39 = vrot.slane %v12004_v49, 4  ;;  %v13575_v0 = vpop.f32.mrf.mxu0  ;;  %v12015_v21 = vadd.f32 %v12014_v56, %v12013_v36 }
0x196f   :  { %v11995_v10 = vsel %vm11986_vm4, %v11981_v3, 0.0  ;;  %v11979_v17 = vadd.f32 %v11961_v29, %v16298_v47  ;;  %v11972_v2 = vadd.f32 %v13575_v0, %v11861_v55 }
0x1970   :  { %v12001_v51 = vadd.f32 %v12000_v1, %v11999_v40  ;;  %v12021_v53 = vrot.slane %v12020_v52, 2  ;;  %v12006_v22 = vadd.f32 %v12005_v39, %v12004_v49  ;;  %v11963_v16 = vpop.f32.mrf.mxu0  ;;  %v12039_v19 = vsel %vm39_vm0, %v11995_v10, 0.0 }
0x1971   :  { %v11993_v11 = vsel %vm11986_vm4, %v11979_v17, 0.0  ;;  %v11982_v54 = vadd.f32 %v11972_v2, %v16307_v43  ;;  %v11964_v14 = vadd.f32 %v11963_v16, %v11861_v55  ;;  %v12040_v4 = vrot.slane %v12039_v19, 4 }
0x1972   :  { %v12002_v12 = vrot.slane %v12001_v51, 1  ;;  %v12007_v63 = vrot.slane %v12006_v22, 2  ;;  %v12025_v7 = vsel %vm39_vm0, %v11993_v11, 0.0  ;;  %v12022_v37 = vadd.f32 %v12021_v53, %v12020_v52 }
0x1973   :  { %v11996_v47 = vsel %vm11986_vm4, %v11982_v54, 0.0  ;;  %v11980_v9 = vadd.f32 %v11964_v14, %v16295_v13  ;;  %v12026_v25 = vrot.slane %v12025_v7, 4  ;;  %v12041_v5 = vadd.f32 %v12040_v4, %v12039_v19 }
0x1974   :  { %v12008_v44 = vadd.f32 %v12007_v63, %v12006_v22  ;;  %v12046_v24 = vsel %vm39_vm0, %v11996_v47, 0.0  ;;  %v12016_v42 = vrot.slane %v12015_v21, 1  ;;  %v12003_v45 = vadd.f32 %v12002_v12, %v12001_v51 }
0x1975   :  { %v11994_v43 = vsel %vm11986_vm4, %v11980_v9, 0.0  ;;  %v12027_v28 = vadd.f32 %v12026_v25, %v12025_v7  ;;  %v12047_v6 = vrot.slane %v12046_v24, 4  ;;  %v12042_v15 = vrot.slane %v12041_v5, 2 }
0x1976   :  { %v12009_v55 = vrot.slane %v12008_v44, 1  ;;  %v12032_v30 = vsel %vm39_vm0, %v11994_v43, 0.0  ;;  %v12023_v20 = vrot.slane %v12022_v37, 1  ;;  %v12017_v41 = vadd.f32 %v12016_v42, %v12015_v21 }
0x1977   :  { %v12028_v13 = vrot.slane %v12027_v28, 2  ;;  %v12048_v32 = vadd.f32 %v12047_v6, %v12046_v24  ;;  %v12033_v57 = vrot.slane %v12032_v30, 4  ;;  %v12043_v23 = vadd.f32 %v12042_v15, %v12041_v5 }
0x1978   :  { %v12010_v31 = vadd.f32 %v12009_v55, %v12008_v44  ;;  %v12024_v33 = vadd.f32 %v12023_v20, %v12022_v37 }
0x1979   :  { %v12029_v46 = vadd.f32 %v12028_v13, %v12027_v28  ;;  %v12049_v48 = vrot.slane %v12048_v32, 2  ;;  %v12034_v8 = vadd.f32 %v12033_v57, %v12032_v30  ;;  %v12044_v35 = vrot.slane %v12043_v23, 1 }
0x197a   :  { %v12062_v18 = vsel %vm12061_vm5, %v12010_v31, %v12003_v45 }
0x197b   :  { %v12030_v61 = vrot.slane %v12029_v46, 1  ;;  %v12050_v36 = vadd.f32 %v12049_v48, %v12048_v32  ;;  %v12035_v50 = vrot.slane %v12034_v8, 2  ;;  %v12064_v60 = vsel %vm12063_vm6, %v12017_v41, %v12062_v18 }
0x197c   :  { %v12066_v38 = vsel %vm12065_vm7, %v12024_v33, %v12064_v60  ;;  %v12045_v49 = vadd.f32 %v12044_v35, %v12043_v23  ;;  %v12198_v23 = vld [vmem:[%s16516_s6 + $0x8] sm:$0xff] }
0x197d   :  { %v12036_v27 = vadd.f32 %v12035_v50, %v12034_v8  ;;  %v12031_v59 = vadd.f32 %v12030_v61, %v12029_v46  ;;  %v12051_v58 = vrot.slane %v12050_v36, 1  ;;  %v12200_v8 = vld [vmem:[%s16516_s6 + $0x18] sm:$0xff]  ;;  %v12197_v61 = vld [vmem:[%s16516_s6] sm:$0xff]  ;;  %v16561_v35 = vld [vmem:[#allocation3_spill] sm:$0xff] }
0x197e   :  { %13577 = vmatpush3.msra.mxu1 %v12200_v8 }
0x197f   :  { %v12037_v40 = vrot.slane %v12036_v27, 1  ;;  %v12068_v3 = vsel %vm12067_vm8, %v12031_v59, %v12066_v38  ;;  %v12052_v29 = vadd.f32 %v12051_v58, %v12050_v36  ;;  %13578 = vmatprep.subr.mxu1 %v16548_v26 }
0x1981   :  { %v12038_v62 = vadd.f32 %v12037_v40, %v12036_v27  ;;  %v16562_v40 = vld [vmem:[#allocation4_spill] sm:$0xff] }
0x1983   :  { %v12070_v56 = vsel %vm12069_vm9, %v12038_v62, %v12068_v3 }
0x1984   :  { %v12072_v1 = vsel %vm12071_vm10, %v12045_v49, %v12070_v56 }
0x1985   :  { %v12074_v52 = vsel %vm12073_vm11, %v12052_v29, %v12072_v1 }
0x1986   :  { %v12076_v39 = vsel %vm39_vm0, %v12074_v52, 0.0 }
0x1987   :  { %12077 = vadd.xlane.f32.xlu0 %v12076_v39 }
0x1a10   :  { %v12078_v0 = vpop.xlane.xlu0 %12077 }
0x1a11   :  { %v12079_v10 = vmul.f32 0.03125, %v12078_v0 }
0x1a13   :  { %v12081_v17 = vrot.slane %v12079_v10, 1  ;;  %v12082_v2 = vrot.slane %v12079_v10, 2  ;;  %v12083_v51 = vrot.slane %v12079_v10, 3  ;;  %v12084_v53 = vrot.slane %v12079_v10, 4 }
0x1a14   :  { %v12085_v22 = vrot.slane %v12079_v10, 5  ;;  %v12086_v16 = vrot.slane %v12079_v10, 6  ;;  %v12087_v19 = vrot.slane %v12079_v10, 7  ;;  %v12096_v11 = vsub.f32 %v12003_v45, %v12079_v10 }
0x1a15   :  { %v12097_v54 = vsub.f32 %v12010_v31, %v12081_v17  ;;  %v12098_v14 = vsub.f32 %v12017_v41, %v12082_v2  ;;  %v12099_v21 = vsub.f32 %v12024_v33, %v12083_v51  ;;  %v12100_v12 = vsub.f32 %v12031_v59, %v12084_v53  ;;  %v12199_v41 = vld [vmem:[%s16516_s6 + $0x10] sm:$0xff]  ;;  %v16492_v33 = vld [vmem:[%s16517_s5] sm:$0xff] }
0x1a16   :  { %v12101_v63 = vsub.f32 %v12038_v62, %v12085_v22  ;;  %v12102_v4 = vsub.f32 %v12045_v49, %v12086_v16  ;;  %v12103_v7 = vsub.f32 %v12052_v29, %v12087_v19  ;;  %v12104_v37 = vmul.f32 %v12096_v11, %v12096_v11  ;;  %13579 = vmatpush3.msra.mxu1 %v12199_v41 }
0x1a17   :  { %v12105_v47 = vmul.f32 %v12097_v54, %v12097_v54  ;;  %v12106_v9 = vmul.f32 %v12098_v14, %v12098_v14  ;;  %v12107_v44 = vmul.f32 %v12099_v21, %v12099_v21  ;;  %v12108_v25 = vmul.f32 %v12100_v12, %v12100_v12  ;;  %13580 = vmatprep.subr.mxu1 %v16548_v26 }
0x1a18   :  { %v12109_v5 = vmul.f32 %v12101_v63, %v12101_v63  ;;  %v12110_v55 = vmul.f32 %v12102_v4, %v12102_v4  ;;  %v12111_v28 = vmul.f32 %v12103_v7, %v12103_v7  ;;  %13581 = vmatpush3.msra.mxu1 %v12198_v23  ;;  %v12168_v59 = vrot.slane %v16492_v33, %v16561_v35 }
0x1a19   :  { %v12120_v24 = vrot.slane %v12105_v47, 7  ;;  %v12122_v43 = vrot.slane %v12106_v9, 6  ;;  %v12124_v42 = vrot.slane %v12107_v44, 5  ;;  %v12126_v15 = vrot.slane %v12108_v25, 4  ;;  %13582 = vmatprep.subr.mxu1 %v16548_v26 }
0x1a1a   :  { %v12128_v31 = vrot.slane %v12109_v5, 3  ;;  %v12130_v32 = vrot.slane %v12110_v55, 2  ;;  %v12132_v20 = vrot.slane %v12111_v28, 1  ;;  %13583 = vmatpush3.msra.mxu1 %v12197_v61  ;;  %v12180_v58 = vrot.slane %v16492_v33, %v16562_v40 }
0x1a1b   :  { %v12121_v6 = vsel %vm12061_vm5, %v12120_v24, %v12104_v37  ;;  %v12204_v61 = vrot.slane %v16492_v33, %v16559_v34 }
0x1a1c   :  { %v12123_v45 = vsel %vm12063_vm6, %v12122_v43, %v12121_v6 }
0x1a1d   :  { %v12125_v30 = vsel %vm12065_vm7, %v12124_v42, %v12123_v45 }
0x1a1e   :  { %v12127_v13 = vsel %vm12067_vm8, %v12126_v15, %v12125_v30 }
0x1a1f   :  { %v12129_v57 = vsel %vm12069_vm9, %v12128_v31, %v12127_v13 }
0x1a20   :  { %v12131_v18 = vsel %vm12071_vm10, %v12130_v32, %v12129_v57 }
0x1a21   :  { %v12133_v46 = vsel %vm12073_vm11, %v12132_v20, %v12131_v18 }
0x1a22   :  { %v12135_v48 = vsel %vm39_vm0, %v12133_v46, 0.0 }
0x1a23   :  { %12136 = vadd.xlane.f32.xlu1 %v12135_v48 }
0x1aac   :  { %v12137_v36 = vpop.xlane.xlu1 %12136 }
0x1aad   :  { %v12138_v50 = vmul.f32 0.03125, %v12137_v36 }
0x1aaf   :  { %v12139_v60 = vadd.f32 1e-05, %v12138_v50 }
0x1ab1   :  { %13987 = vrsqrt.f32 %v12139_v60 }
0x1abe   :  { %v13988_v27 = vpop.eup %13987 }
0x1abf   :  { %v12142_v38 = vrot.slane %v13988_v27, 1  ;;  %v12143_v62 = vrot.slane %v13988_v27, 2  ;;  %v12144_v26 = vrot.slane %v13988_v27, 3  ;;  %v12145_v49 = vrot.slane %v13988_v27, 4 }
0x1ac0   :  { %v12146_v3 = vrot.slane %v13988_v27, 5  ;;  %v12147_v29 = vrot.slane %v13988_v27, 6  ;;  %v12148_v56 = vrot.slane %v13988_v27, 7  ;;  %v12157_v1 = vmul.f32 %v13988_v27, %v12096_v11 }
0x1ac1   :  { %v12158_v52 = vmul.f32 %v12142_v38, %v12097_v54  ;;  %v12159_v39 = vmul.f32 %v12143_v62, %v12098_v14  ;;  %v12160_v0 = vmul.f32 %v12144_v26, %v12099_v21  ;;  %v12161_v10 = vmul.f32 %v12145_v49, %v12100_v12 }
0x1ac2   :  { %v12162_v17 = vmul.f32 %v12146_v3, %v12101_v63  ;;  %v12163_v2 = vmul.f32 %v12147_v29, %v12102_v4  ;;  %v12164_v51 = vmul.f32 %v12148_v56, %v12103_v7  ;;  %v12169_v53 = vmul.f32 %v12168_v59, %v12157_v1 }
0x1ac3   :  { %v12170_v22 = vmul.f32 %v12168_v59, %v12158_v52  ;;  %v12171_v16 = vmul.f32 %v12168_v59, %v12159_v39  ;;  %v12172_v19 = vmul.f32 %v12168_v59, %v12160_v0  ;;  %v12173_v47 = vmul.f32 %v12168_v59, %v12161_v10 }
0x1ac4   :  { %v12174_v9 = vmul.f32 %v12168_v59, %v12162_v17  ;;  %v12175_v44 = vmul.f32 %v12168_v59, %v12163_v2  ;;  %v12176_v25 = vmul.f32 %v12168_v59, %v12164_v51  ;;  %v12181_v37 = vadd.f32 %v12180_v58, %v12169_v53 }
0x1ac5   :  { %v12182_v5 = vadd.f32 %v12180_v58, %v12170_v22  ;;  %v12183_v24 = vadd.f32 %v12180_v58, %v12171_v16  ;;  %v12184_v43 = vadd.f32 %v12180_v58, %v12172_v19  ;;  %v12185_v11 = vadd.f32 %v12180_v58, %v12173_v47 }
0x1ac6   :  { %v12186_v54 = vadd.f32 %v12180_v58, %v12174_v9  ;;  %v12187_v14 = vadd.f32 %v12180_v58, %v12175_v44  ;;  %v12188_v21 = vadd.f32 %v12180_v58, %v12176_v25  ;;  %v12189_v55 = vmax.f32 %v12181_v37, 0.0 }
0x1ac7   :  { %v12190_v12 = vmax.f32 %v12182_v5, 0.0  ;;  %v12191_v63 = vmax.f32 %v12183_v24, 0.0  ;;  %v12192_v4 = vmax.f32 %v12184_v43, 0.0  ;;  %v12193_v7 = vmax.f32 %v12185_v11, 0.0 }
0x1ac8   :  { %v12194_v28 = vmax.f32 %v12186_v54, 0.0  ;;  %v12195_v45 = vmax.f32 %v12187_v14, 0.0  ;;  %v12196_v15 = vmax.f32 %v12188_v21, 0.0 }
0x1ac9   :  { %v12213_v6 = vrot.slane %v12190_v12, 7  ;;  %v12215_v42 = vrot.slane %v12191_v63, 6  ;;  %v12217_v31 = vrot.slane %v12192_v4, 5  ;;  %v12219_v32 = vrot.slane %v12193_v7, 4 }
0x1aca   :  { %v12221_v20 = vrot.slane %v12194_v28, 3  ;;  %v12223_v46 = vrot.slane %v12195_v45, 2  ;;  %v12225_v8 = vrot.slane %v12196_v15, 1 }
0x1acb   :  { %v12214_v30 = vsel %vm12061_vm5, %v12213_v6, %v12189_v55 }
0x1acc   :  { %v12216_v13 = vsel %vm12063_vm6, %v12215_v42, %v12214_v30 }
0x1acd   :  { %v12218_v57 = vsel %vm12065_vm7, %v12217_v31, %v12216_v13 }
0x1ace   :  { %v12220_v18 = vsel %vm12067_vm8, %v12219_v32, %v12218_v57 }
0x1acf   :  { %v12222_v48 = vsel %vm12069_vm9, %v12221_v20, %v12220_v18 }
0x1ad0   :  { %v12224_v41 = vsel %vm12071_vm10, %v12223_v46, %v12222_v48 }
0x1ad1   :  { %v12226_v23 = vsel %vm12073_vm11, %v12225_v8, %v12224_v41 }
0x1ad2   :  { %13585 = vmatmul.mubr.msk.f32.vlgmr.msra.gmra.mxu1 %vm39_vm0, %v12226_v23 }
0x1b92   :  { %v12295_v36 = vpop.f32.mrf.mxu1 }
0x1b93   :  { %v12296_v50 = vadd.f32 %v12295_v36, %v12204_v61 }
0x1b94   :  { %v13586_v60 = vpop.f32.mrf.mxu1 }
0x1b95   :  { %12300 = vst.msk [vmem:[%s16518_s7] sm:$0xff] %vm12299_vm12, %v12296_v50 }

</bundles_post_ra>
